<compile_context>
chip_gen: v6e
topology: v6e:2x2x1
jax: 0.10.0
libtpu: 0.0.40
codegen_flags: <defaults>
</compile_context>

<pallas_src>
import functools
import math

import jax
import jax.numpy as jnp
from jax.experimental import pallas as pl
from jax.experimental.pallas import tpu as pltpu


def _encoder_kernel(x_ref, wqkv_ref, bqkv_ref, wo_ref, vecs_ref, o_ref,
                    attn_scr, *, nhead, eps, kv_block):
    """One grid step = `Bblk` batch elements, full sequence.

    x_ref:    (Bblk, S, E)   f32 input slice
    wqkv_ref: (E, 3E)        bf16 fused, pre-transposed q/k/v weight (1/sqrt(Dh)
                             already folded into the q columns)
    bqkv_ref: (1, 3E)        f32 fused q/k/v bias (q part pre-scaled)
    wo_ref:   (E, E)         bf16 pre-transposed out-proj weight
    vecs_ref: (3, E)         f32 rows = [out-proj bias, LN gamma, LN beta]
    o_ref:    (Bblk, S, E)   f32 output slice
    attn_scr: (Bblk*S, E)    f32 VMEM scratch holding the concatenated head
                             outputs (written per-head at lane offsets — no
                             jnp.concatenate along the lane axis).
    """
    Bblk, S, E = x_ref.shape
    Dh = E // nhead
    num_kv = S // kv_block

    x = x_ref[...]                                     # (Bblk, S, E) f32
    x2d = x.reshape(Bblk * S, E)

    # --- fused QKV projection: one MXU pass with N = 3E (bf16 operands,
    # f32 accumulation). The 1/sqrt(Dh) scale is folded into Wq/bq in the
    # wrapper, so no in-kernel scale multiply. ---
    qkv = jnp.dot(x2d.astype(jnp.bfloat16), wqkv_ref[...],
                  preferred_element_type=jnp.float32) + bqkv_ref[...]   # (Bblk*S, 3E)
    qkv3 = qkv.reshape(Bblk, S, 3 * E)

    # --- attention: per-head flash (online-softmax) over KV tiles. Only a
    # (Bblk, S, kv_block) score tile is ever live, never the full (S, S)
    # matrix. Softmax kept in f32; probs cast to bf16 only for the MXU p@v.
    # TODO(synk): fold the head loop into a single multi-batch-dim dot_general
    # (einsum 'bqhd,bkhd->bhqk') once Mosaic supports it on all target
    # generations; heads are statically unrolled with single-batch-dim
    # einsums here, which is the known-good lowering path.
    for h in range(nhead):
        lo = h * Dh
        qh = qkv3[:, :, lo:lo + Dh].astype(jnp.bfloat16)                # (Bblk, S, Dh)
        kh = qkv3[:, :, E + lo:E + lo + Dh].astype(jnp.bfloat16)
        vh = qkv3[:, :, 2 * E + lo:2 * E + lo + Dh].astype(jnp.bfloat16)

        m_i = l_i = acc = None
        for t in range(num_kv):
            kt = kh[:, t * kv_block:(t + 1) * kv_block, :]              # (Bblk, kvb, Dh)
            vt = vh[:, t * kv_block:(t + 1) * kv_block, :]
            s = jnp.einsum('bqd,bkd->bqk', qh, kt,
                           preferred_element_type=jnp.float32)          # (Bblk, S, kvb)
            m_t = jnp.max(s, axis=-1, keepdims=True)
            if t == 0:
                m_new = m_t
                p = jnp.exp(s - m_new)
                l_i = jnp.sum(p, axis=-1, keepdims=True)
                acc = jnp.einsum('bqk,bkd->bqd', p.astype(jnp.bfloat16), vt,
                                 preferred_element_type=jnp.float32)    # (Bblk, S, Dh)
            else:
                m_new = jnp.maximum(m_i, m_t)
                alpha = jnp.exp(m_i - m_new)
                p = jnp.exp(s - m_new)
                l_i = alpha * l_i + jnp.sum(p, axis=-1, keepdims=True)
                acc = alpha * acc + jnp.einsum('bqk,bkd->bqd',
                                               p.astype(jnp.bfloat16), vt,
                                               preferred_element_type=jnp.float32)
            m_i = m_new
        # Exact normalizer (true divide), not approx reciprocal — keeps the
        # softmax numerics tight enough for a ~1e-2 tolerance.
        head_out = acc / l_i                                            # (Bblk, S, Dh) f32
        attn_scr[:, lo:lo + Dh] = head_out.reshape(Bblk * S, Dh)
        # TODO(synk): attention-weight dropout (training mode only) not applied.

    # --- output projection over the full K=E contraction (pre-transposed W_o) ---
    src2 = jnp.dot(attn_scr[...].astype(jnp.bfloat16), wo_ref[...],
                   preferred_element_type=jnp.float32) + vecs_ref[0:1, :]

    # --- residual (+ dropout == identity in eval) and single-pass LayerNorm:
    # one reduction pass for sum and sum-of-squares instead of two mean passes.
    y = x2d + src2
    inv_e = 1.0 / E
    mean = jnp.sum(y, axis=-1, keepdims=True) * inv_e
    var = jnp.sum(y * y, axis=-1, keepdims=True) * inv_e - mean * mean
    y_hat = (y - mean) * jax.lax.rsqrt(var + eps)
    out = y_hat * vecs_ref[1:2, :] + vecs_ref[2:3, :]
    o_ref[...] = out.reshape(Bblk, S, E)


def _num_tensorcores():
    """Best-effort TensorCore-per-chip count (1 on v5e/v6e, 2 on v7x)."""
    try:
        info = pltpu.get_tpu_info()
        for name in ("num_tensorcores", "tensorcores_per_chip", "num_cores",
                     "cores_per_chip", "core_count"):
            val = getattr(info, name, None)
            if isinstance(val, int) and val > 0:
                return val
    except Exception:
        pass
    try:
        val = getattr(jax.devices()[0], "num_cores", None)
        if isinstance(val, int) and val > 0:
            return val
    except Exception:
        pass
    return 1


def _pick_kv_block(S, max_kv=512):
    """Largest KV tile <= max_kv that divides S (prefer multiples of 128)."""
    if S <= max_kv:
        return S
    for cand in (512, 384, 256, 128):
        if cand <= max_kv and S % cand == 0:
            return cand
    for cand in range(max_kv, 0, -1):
        if S % cand == 0:
            return cand
    return S


def _pick_block_b(B, S, E, target_m=512, act_budget_bytes=24 << 20):
    """block_b from an MXU M-fill target (block_b*S ~ 512 rows), clamped to a
    VMEM activation budget; only force >=2 grid blocks on multi-TensorCore
    chips (v7x), since on v5e/v6e the grid is a sequential loop."""
    bb = max(1, min(B, -(-target_m // S)))      # ceil(target_m / S)
    per_row = 48 * E                            # rough live activation bytes per row
    while bb > 1 and bb * S * per_row > act_budget_bytes:
        bb = max(1, bb // 2)
    if _num_tensorcores() > 1 and B >= 2 and pl.cdiv(B, bb) < 2:
        bb = max(1, B // 2)
    return min(bb, B)


def transformer_encoder_simplified(x, params, *, nhead, eps=1e-5, block_b=None):
    """x: (B, S, E) float32. Returns (B, S, E) float32. Eval-mode forward."""
    B, S, E = x.shape
    wq, wk, wv, bq, bk, bv, wo, bo, gamma, beta = params
    Dh = E // nhead

    # All fusing / transposing / bf16 casting / score-scaling done ONCE here in
    # XLA (free), never per grid step inside the kernel.
    scale = 1.0 / math.sqrt(Dh)
    w_qkv = jnp.concatenate([wq * scale, wk, wv], axis=0).T.astype(jnp.bfloat16)  # (E, 3E)
    b_qkv = jnp.concatenate([bq * scale, bk, bv], axis=1)                         # (1, 3E)
    wo_t = wo.T.astype(jnp.bfloat16)                                              # (E, E)
    vecs = jnp.concatenate([bo, gamma, beta], axis=0)                             # (3, E)

    if block_b is None:
        block_b = _pick_block_b(B, S, E)
    block_b = max(1, min(block_b, B))
    grid_b = pl.cdiv(B, block_b)
    kv_block = _pick_kv_block(S)

    kernel = functools.partial(_encoder_kernel, nhead=nhead, eps=eps,
                               kv_block=kv_block)

    # Explicit VMEM budget: bf16 weights single-buffered + double-buffered
    # f32 x/out blocks + rough live in-kernel activations, with 2x headroom.
    weight_bytes = 8 * E * E * 2 + 6 * E * 4
    io_bytes = 2 * 2 * block_b * S * E * 4
    act_bytes = block_b * S * 48 * E
    vmem_limit = int(min(100 << 20,
                         max(32 << 20, 2 * (weight_bytes + io_bytes + act_bytes))))

    # TODO(synk): for very large E (3E*E*2 B near the VMEM budget) add a grid
    # axis over the QKV/out-proj output dim (or stream weight panels from
    # pl.ANY HBM refs) instead of holding W_qkv whole in VMEM.
    # TODO(synk): once S is large, add a 'parallel' grid axis over the query
    # dim as well (smaller resident working set, finer work units for v7x).
    # TODO(synk): for E < 128 the lane dim under-fills vregs and stores are
    # masked; pad/pack the feature dim to a multiple of 128 in production.
    # TODO(synk): on v5e consider bf16 x/out blocks (keep f32 accumulation,
    # residual and LN in-kernel) to halve HBM bytes if accuracy allows.
    def _build(weight_pipeline_mode):
        wkw = ({} if weight_pipeline_mode is None
               else {"pipeline_mode": weight_pipeline_mode})
        return pl.pallas_call(
            kernel,
            out_shape=jax.ShapeDtypeStruct((B, S, E), jnp.float32),
            grid=(grid_b,),
            in_specs=[
                pl.BlockSpec((block_b, S, E), lambda b: (b, 0, 0)),   # x
                pl.BlockSpec((E, 3 * E), lambda b: (0, 0), **wkw),    # fused W_qkv^T (bf16)
                pl.BlockSpec((1, 3 * E), lambda b: (0, 0), **wkw),    # fused b_qkv
                pl.BlockSpec((E, E), lambda b: (0, 0), **wkw),        # W_o^T (bf16)
                pl.BlockSpec((3, E), lambda b: (0, 0), **wkw),        # [bo; gamma; beta]
            ],
            out_specs=pl.BlockSpec((block_b, S, E), lambda b: (b, 0, 0)),
            scratch_shapes=[pltpu.VMEM((block_b * S, E), jnp.float32)],
            compiler_params=pltpu.CompilerParams(
                dimension_semantics=("parallel",),
                vmem_limit_bytes=vmem_limit),
        )

    args = (x, w_qkv, b_qkv, wo_t, vecs)
    try:
        # Grid-invariant weights: single-buffered (no pointless double-buffer
        # of constant-index inputs; frees ~16*E^2 B of VMEM, matters on v7x).
        return _build(pl.Buffered(1))(*args)
    except Exception:
        # TODO(synk): drop this fallback once pl.Buffered(1) on constant-index
        # specs is confirmed on the deployment jax/libtpu version.
        return _build(None)(*args)


def init_params(key, d_model):
    """Deterministic synthetic parameters matching nn.MultiheadAttention + LayerNorm shapes."""
    k1, k2, k3 = jax.random.split(key, 3)
    # in_proj_weight: (3E, E), xavier_uniform-like
    limit_in = (6.0 / (3 * d_model + d_model)) ** 0.5
    in_proj_w = jax.random.uniform(k1, (3 * d_model, d_model), jnp.float32,
                                   -limit_in, limit_in)
    wq = in_proj_w[:d_model]
    wk = in_proj_w[d_model:2 * d_model]
    wv = in_proj_w[2 * d_model:]
    # in_proj_bias: zeros in PyTorch; use small deterministic values instead of all-zero
    in_proj_b = 0.01 * jax.random.normal(k2, (3 * d_model,), jnp.float32)
    bq = in_proj_b[:d_model].reshape(1, d_model)
    bk = in_proj_b[d_model:2 * d_model].reshape(1, d_model)
    bv = in_proj_b[2 * d_model:].reshape(1, d_model)
    # out_proj: (E, E) weight, (E,) bias
    limit_out = (6.0 / (d_model + d_model)) ** 0.5
    wo = jax.random.uniform(k3, (d_model, d_model), jnp.float32, -limit_out, limit_out)
    bo = jnp.zeros((1, d_model), jnp.float32)
    # LayerNorm affine params
    gamma = jnp.ones((1, d_model), jnp.float32)
    beta = jnp.zeros((1, d_model), jnp.float32)
    return (wq, wk, wv, bq, bk, bv, wo, bo, gamma, beta)


def reference_forward(x, params, *, nhead, eps=1e-5):
    """Pure-JAX f32 reference of the PyTorch forward (eval mode)."""
    wq, wk, wv, bq, bk, bv, wo, bo, gamma, beta = params
    B, S, E = x.shape
    Dh = E // nhead
    q = x @ wq.T + bq[0]
    k = x @ wk.T + bk[0]
    v = x @ wv.T + bv[0]
    q = q.reshape(B, S, nhead, Dh).transpose(0, 2, 1, 3)
    k = k.reshape(B, S, nhead, Dh).transpose(0, 2, 1, 3)
    v = v.reshape(B, S, nhead, Dh).transpose(0, 2, 1, 3)
    s = jnp.einsum("bhqd,bhkd->bhqk", q, k) / (Dh ** 0.5)
    p = jax.nn.softmax(s, axis=-1)
    attn = jnp.einsum("bhqk,bhkd->bhqd", p, v).transpose(0, 2, 1, 3).reshape(B, S, E)
    src2 = attn @ wo.T + bo[0]
    y = x + src2
    mean = jnp.mean(y, axis=-1, keepdims=True)
    var = jnp.mean((y - mean) ** 2, axis=-1, keepdims=True)
    return (y - mean) / jnp.sqrt(var + eps) * gamma[0] + beta[0]


if __name__ == "__main__":
    B, S, E, H = 4, 8, 32, 4
    key = jax.random.PRNGKey(0)
    kx, kp = jax.random.split(key)
    x = jax.random.normal(kx, (B, S, E), jnp.float32)
    params = init_params(kp, E)

    out = transformer_encoder_simplified(x, params, nhead=H)
    out = jax.block_until_ready(out)

    ref = reference_forward(x, params, nhead=H)
    assert out.shape == (B, S, E)
    # bf16 MXU operands but exact softmax normalizer (no approx reciprocal)
    # => tolerance tightened to ~1e-2 per review.
    assert jnp.allclose(out, ref, atol=2e-2, rtol=2e-2), "mismatch vs reference"
    print("KERNEL_OK")
</pallas_src>

<mosaic_0001>
module attributes {stable_mosaic.version = 11 : i64} {
  func.func @_encoder_kernel(%arg0: i32, %arg1: memref<4x8x32xf32, #tpu.memory_space<vmem>>, %arg2: memref<32x96xbf16, #tpu.memory_space<vmem>>, %arg3: memref<1x96xf32, #tpu.memory_space<vmem>>, %arg4: memref<32x32xbf16, #tpu.memory_space<vmem>>, %arg5: memref<3x32xf32, #tpu.memory_space<vmem>>, %arg6: memref<4x8x32xf32, #tpu.memory_space<vmem>>, %arg7: memref<32x32xf32, #tpu.memory_space<vmem>>) attributes {dimension_semantics = [#tpu.dimension_semantics<parallel>], iteration_bounds = array<i64: 1>, scalar_prefetch = 0 : i64, scratch_operands = 1 : i64, tpu.core_type = #tpu.core_type<tc>, window_params = [{transform_indices = @transform_0, window_bounds = array<i64: 4, 8, 32>}, {pipeline_mode = #tpu.pipeline_mode<synchronous>, transform_indices = @transform_1, window_bounds = array<i64: 32, 96>}, {pipeline_mode = #tpu.pipeline_mode<synchronous>, transform_indices = @transform_2, window_bounds = array<i64: 1, 96>}, {pipeline_mode = #tpu.pipeline_mode<synchronous>, transform_indices = @transform_3, window_bounds = array<i64: 32, 32>}, {pipeline_mode = #tpu.pipeline_mode<synchronous>, transform_indices = @transform_4, window_bounds = array<i64: 3, 32>}, {transform_indices = @transform_5, window_bounds = array<i64: 4, 8, 32>}]} {
    %c0 = arith.constant 0 : index
    %c0_0 = arith.constant 0 : index
    %c0_1 = arith.constant 0 : index
    %0 = vector.load %arg1[%c0, %c0_0, %c0_1] : memref<4x8x32xf32, #tpu.memory_space<vmem>>, vector<4x8x32xf32>
    %1 = vector.shape_cast %0 : vector<4x8x32xf32> to vector<32x32xf32>
    %2 = arith.truncf %1 : vector<32x32xf32> to vector<32x32xbf16>
    %c0_2 = arith.constant 0 : index
    %c0_3 = arith.constant 0 : index
    %3 = vector.load %arg2[%c0_2, %c0_3] : memref<32x96xbf16, #tpu.memory_space<vmem>>, vector<32x96xbf16>
    %cst = arith.constant dense<0.000000e+00> : vector<32x96xf32>
    %4 = tpu.matmul %2, %3, %cst {dimension_numbers = #tpu.dot_dimension_numbers<[1], [0], [0], [1], [0, 0, 1, 1], [], []>} : vector<32x32xbf16>, vector<32x96xbf16>, vector<32x96xf32> -> vector<32x96xf32>
    %c0_4 = arith.constant 0 : index
    %c0_5 = arith.constant 0 : index
    %5 = vector.load %arg3[%c0_4, %c0_5] : memref<1x96xf32, #tpu.memory_space<vmem>>, vector<1x96xf32>
    %6 = vector.broadcast %5 : vector<1x96xf32> to vector<32x96xf32>
    %7 = arith.addf %4, %6 : vector<32x96xf32>
    %8 = vector.shape_cast %7 : vector<32x96xf32> to vector<4x8x96xf32>
    %9 = vector.extract_strided_slice %8 {offsets = [0, 0, 0], sizes = [4, 8, 8], strides = [1, 1, 1]} : vector<4x8x96xf32> to vector<4x8x8xf32>
    %10 = arith.truncf %9 : vector<4x8x8xf32> to vector<4x8x8xbf16>
    %11 = vector.extract_strided_slice %8 {offsets = [0, 0, 32], sizes = [4, 8, 8], strides = [1, 1, 1]} : vector<4x8x96xf32> to vector<4x8x8xf32>
    %12 = arith.truncf %11 : vector<4x8x8xf32> to vector<4x8x8xbf16>
    %13 = vector.extract_strided_slice %8 {offsets = [0, 0, 64], sizes = [4, 8, 8], strides = [1, 1, 1]} : vector<4x8x96xf32> to vector<4x8x8xf32>
    %14 = arith.truncf %13 : vector<4x8x8xf32> to vector<4x8x8xbf16>
    "tpu.trace_start"() <{level = 10 : i32, message = "bqd,bkd->bqk"}> : () -> ()
    %cst_6 = arith.constant dense<0.000000e+00> : vector<4x8x8xf32>
    %15 = tpu.matmul %10, %12, %cst_6 {dimension_numbers = #tpu.dot_dimension_numbers<[2], [2], [1], [1], [0, 0, 0, 1, 1, 1], [0], [0]>} : vector<4x8x8xbf16>, vector<4x8x8xbf16>, vector<4x8x8xf32> -> vector<4x8x8xf32>
    "tpu.trace_stop"() : () -> ()
    %cst_7 = arith.constant dense<0xFF800000> : vector<4x8xf32>
    %16 = vector.multi_reduction <maximumf>, %15, %cst_7 [2] : vector<4x8x8xf32> to vector<4x8xf32>
    %17 = vector.shape_cast %16 : vector<4x8xf32> to vector<4x8x1xf32>
    %18 = vector.broadcast %17 : vector<4x8x1xf32> to vector<4x8x8xf32>
    %19 = arith.subf %15, %18 : vector<4x8x8xf32>
    %20 = math.exp %19 : vector<4x8x8xf32>
    %cst_8 = arith.constant dense<0.000000e+00> : vector<4x8xf32>
    %21 = vector.multi_reduction <add>, %20, %cst_8 [2] : vector<4x8x8xf32> to vector<4x8xf32>
    %22 = vector.shape_cast %21 : vector<4x8xf32> to vector<4x8x1xf32>
    %23 = arith.truncf %20 : vector<4x8x8xf32> to vector<4x8x8xbf16>
    "tpu.trace_start"() <{level = 10 : i32, message = "bqk,bkd->bqd"}> : () -> ()
    %cst_9 = arith.constant dense<0.000000e+00> : vector<4x8x8xf32>
    %24 = tpu.matmul %23, %14, %cst_9 {dimension_numbers = #tpu.dot_dimension_numbers<[2], [1], [1], [2], [0, 0, 0, 1, 1, 2], [0], [0]>} : vector<4x8x8xbf16>, vector<4x8x8xbf16>, vector<4x8x8xf32> -> vector<4x8x8xf32>
    "tpu.trace_stop"() : () -> ()
    %25 = vector.broadcast %22 : vector<4x8x1xf32> to vector<4x8x8xf32>
    %26 = arith.divf %24, %25 : vector<4x8x8xf32>
    %27 = vector.shape_cast %26 : vector<4x8x8xf32> to vector<32x8xf32>
    %c0_10 = arith.constant 0 : index
    %c0_11 = arith.constant 0 : index
    %28 = vector.load %arg7[%c0_10, %c0_11] : memref<32x32xf32, #tpu.memory_space<vmem>>, vector<32x8xf32>
    tpu.vector_store %arg7[%c0_10, %c0_11], %27 {strides = array<i32>} : memref<32x32xf32, #tpu.memory_space<vmem>>, vector<32x8xf32>,
    %29 = vector.extract_strided_slice %8 {offsets = [0, 0, 8], sizes = [4, 8, 8], strides = [1, 1, 1]} : vector<4x8x96xf32> to vector<4x8x8xf32>
    %30 = arith.truncf %29 : vector<4x8x8xf32> to vector<4x8x8xbf16>
    %31 = vector.extract_strided_slice %8 {offsets = [0, 0, 40], sizes = [4, 8, 8], strides = [1, 1, 1]} : vector<4x8x96xf32> to vector<4x8x8xf32>
    %32 = arith.truncf %31 : vector<4x8x8xf32> to vector<4x8x8xbf16>
    %33 = vector.extract_strided_slice %8 {offsets = [0, 0, 72], sizes = [4, 8, 8], strides = [1, 1, 1]} : vector<4x8x96xf32> to vector<4x8x8xf32>
    %34 = arith.truncf %33 : vector<4x8x8xf32> to vector<4x8x8xbf16>
    "tpu.trace_start"() <{level = 10 : i32, message = "bqd,bkd->bqk"}> : () -> ()
    %cst_12 = arith.constant dense<0.000000e+00> : vector<4x8x8xf32>
    %35 = tpu.matmul %30, %32, %cst_12 {dimension_numbers = #tpu.dot_dimension_numbers<[2], [2], [1], [1], [0, 0, 0, 1, 1, 1], [0], [0]>} : vector<4x8x8xbf16>, vector<4x8x8xbf16>, vector<4x8x8xf32> -> vector<4x8x8xf32>
    "tpu.trace_stop"() : () -> ()
    %cst_13 = arith.constant dense<0xFF800000> : vector<4x8xf32>
    %36 = vector.multi_reduction <maximumf>, %35, %cst_13 [2] : vector<4x8x8xf32> to vector<4x8xf32>
    %37 = vector.shape_cast %36 : vector<4x8xf32> to vector<4x8x1xf32>
    %38 = vector.broadcast %37 : vector<4x8x1xf32> to vector<4x8x8xf32>
    %39 = arith.subf %35, %38 : vector<4x8x8xf32>
    %40 = math.exp %39 : vector<4x8x8xf32>
    %cst_14 = arith.constant dense<0.000000e+00> : vector<4x8xf32>
    %41 = vector.multi_reduction <add>, %40, %cst_14 [2] : vector<4x8x8xf32> to vector<4x8xf32>
    %42 = vector.shape_cast %41 : vector<4x8xf32> to vector<4x8x1xf32>
    %43 = arith.truncf %40 : vector<4x8x8xf32> to vector<4x8x8xbf16>
    "tpu.trace_start"() <{level = 10 : i32, message = "bqk,bkd->bqd"}> : () -> ()
    %cst_15 = arith.constant dense<0.000000e+00> : vector<4x8x8xf32>
    %44 = tpu.matmul %43, %34, %cst_15 {dimension_numbers = #tpu.dot_dimension_numbers<[2], [1], [1], [2], [0, 0, 0, 1, 1, 2], [0], [0]>} : vector<4x8x8xbf16>, vector<4x8x8xbf16>, vector<4x8x8xf32> -> vector<4x8x8xf32>
    "tpu.trace_stop"() : () -> ()
    %45 = vector.broadcast %42 : vector<4x8x1xf32> to vector<4x8x8xf32>
    %46 = arith.divf %44, %45 : vector<4x8x8xf32>
    %47 = vector.shape_cast %46 : vector<4x8x8xf32> to vector<32x8xf32>
    %c0_16 = arith.constant 0 : index
    %c8 = arith.constant 8 : index
    %48 = vector.load %arg7[%c0_16, %c8] : memref<32x32xf32, #tpu.memory_space<vmem>>, vector<32x8xf32>
    tpu.vector_store %arg7[%c0_16, %c8], %47 {strides = array<i32>} : memref<32x32xf32, #tpu.memory_space<vmem>>, vector<32x8xf32>,
    %49 = vector.extract_strided_slice %8 {offsets = [0, 0, 16], sizes = [4, 8, 8], strides = [1, 1, 1]} : vector<4x8x96xf32> to vector<4x8x8xf32>
    %50 = arith.truncf %49 : vector<4x8x8xf32> to vector<4x8x8xbf16>
    %51 = vector.extract_strided_slice %8 {offsets = [0, 0, 48], sizes = [4, 8, 8], strides = [1, 1, 1]} : vector<4x8x96xf32> to vector<4x8x8xf32>
    %52 = arith.truncf %51 : vector<4x8x8xf32> to vector<4x8x8xbf16>
    %53 = vector.extract_strided_slice %8 {offsets = [0, 0, 80], sizes = [4, 8, 8], strides = [1, 1, 1]} : vector<4x8x96xf32> to vector<4x8x8xf32>
    %54 = arith.truncf %53 : vector<4x8x8xf32> to vector<4x8x8xbf16>
    "tpu.trace_start"() <{level = 10 : i32, message = "bqd,bkd->bqk"}> : () -> ()
    %cst_17 = arith.constant dense<0.000000e+00> : vector<4x8x8xf32>
    %55 = tpu.matmul %50, %52, %cst_17 {dimension_numbers = #tpu.dot_dimension_numbers<[2], [2], [1], [1], [0, 0, 0, 1, 1, 1], [0], [0]>} : vector<4x8x8xbf16>, vector<4x8x8xbf16>, vector<4x8x8xf32> -> vector<4x8x8xf32>
    "tpu.trace_stop"() : () -> ()
    %cst_18 = arith.constant dense<0xFF800000> : vector<4x8xf32>
    %56 = vector.multi_reduction <maximumf>, %55, %cst_18 [2] : vector<4x8x8xf32> to vector<4x8xf32>
    %57 = vector.shape_cast %56 : vector<4x8xf32> to vector<4x8x1xf32>
    %58 = vector.broadcast %57 : vector<4x8x1xf32> to vector<4x8x8xf32>
    %59 = arith.subf %55, %58 : vector<4x8x8xf32>
    %60 = math.exp %59 : vector<4x8x8xf32>
    %cst_19 = arith.constant dense<0.000000e+00> : vector<4x8xf32>
    %61 = vector.multi_reduction <add>, %60, %cst_19 [2] : vector<4x8x8xf32> to vector<4x8xf32>
    %62 = vector.shape_cast %61 : vector<4x8xf32> to vector<4x8x1xf32>
    %63 = arith.truncf %60 : vector<4x8x8xf32> to vector<4x8x8xbf16>
    "tpu.trace_start"() <{level = 10 : i32, message = "bqk,bkd->bqd"}> : () -> ()
    %cst_20 = arith.constant dense<0.000000e+00> : vector<4x8x8xf32>
    %64 = tpu.matmul %63, %54, %cst_20 {dimension_numbers = #tpu.dot_dimension_numbers<[2], [1], [1], [2], [0, 0, 0, 1, 1, 2], [0], [0]>} : vector<4x8x8xbf16>, vector<4x8x8xbf16>, vector<4x8x8xf32> -> vector<4x8x8xf32>
    "tpu.trace_stop"() : () -> ()
    %65 = vector.broadcast %62 : vector<4x8x1xf32> to vector<4x8x8xf32>
    %66 = arith.divf %64, %65 : vector<4x8x8xf32>
    %67 = vector.shape_cast %66 : vector<4x8x8xf32> to vector<32x8xf32>
    %c0_21 = arith.constant 0 : index
    %c16 = arith.constant 16 : index
    %68 = vector.load %arg7[%c0_21, %c16] : memref<32x32xf32, #tpu.memory_space<vmem>>, vector<32x8xf32>
    tpu.vector_store %arg7[%c0_21, %c16], %67 {strides = array<i32>} : memref<32x32xf32, #tpu.memory_space<vmem>>, vector<32x8xf32>,
    %69 = vector.extract_strided_slice %8 {offsets = [0, 0, 24], sizes = [4, 8, 8], strides = [1, 1, 1]} : vector<4x8x96xf32> to vector<4x8x8xf32>
    %70 = arith.truncf %69 : vector<4x8x8xf32> to vector<4x8x8xbf16>
    %71 = vector.extract_strided_slice %8 {offsets = [0, 0, 56], sizes = [4, 8, 8], strides = [1, 1, 1]} : vector<4x8x96xf32> to vector<4x8x8xf32>
    %72 = arith.truncf %71 : vector<4x8x8xf32> to vector<4x8x8xbf16>
    %73 = vector.extract_strided_slice %8 {offsets = [0, 0, 88], sizes = [4, 8, 8], strides = [1, 1, 1]} : vector<4x8x96xf32> to vector<4x8x8xf32>
    %74 = arith.truncf %73 : vector<4x8x8xf32> to vector<4x8x8xbf16>
    "tpu.trace_start"() <{level = 10 : i32, message = "bqd,bkd->bqk"}> : () -> ()
    %cst_22 = arith.constant dense<0.000000e+00> : vector<4x8x8xf32>
    %75 = tpu.matmul %70, %72, %cst_22 {dimension_numbers = #tpu.dot_dimension_numbers<[2], [2], [1], [1], [0, 0, 0, 1, 1, 1], [0], [0]>} : vector<4x8x8xbf16>, vector<4x8x8xbf16>, vector<4x8x8xf32> -> vector<4x8x8xf32>
    "tpu.trace_stop"() : () -> ()
    %cst_23 = arith.constant dense<0xFF800000> : vector<4x8xf32>
    %76 = vector.multi_reduction <maximumf>, %75, %cst_23 [2] : vector<4x8x8xf32> to vector<4x8xf32>
    %77 = vector.shape_cast %76 : vector<4x8xf32> to vector<4x8x1xf32>
    %78 = vector.broadcast %77 : vector<4x8x1xf32> to vector<4x8x8xf32>
    %79 = arith.subf %75, %78 : vector<4x8x8xf32>
    %80 = math.exp %79 : vector<4x8x8xf32>
    %cst_24 = arith.constant dense<0.000000e+00> : vector<4x8xf32>
    %81 = vector.multi_reduction <add>, %80, %cst_24 [2] : vector<4x8x8xf32> to vector<4x8xf32>
    %82 = vector.shape_cast %81 : vector<4x8xf32> to vector<4x8x1xf32>
    %83 = arith.truncf %80 : vector<4x8x8xf32> to vector<4x8x8xbf16>
    "tpu.trace_start"() <{level = 10 : i32, message = "bqk,bkd->bqd"}> : () -> ()
    %cst_25 = arith.constant dense<0.000000e+00> : vector<4x8x8xf32>
    %84 = tpu.matmul %83, %74, %cst_25 {dimension_numbers = #tpu.dot_dimension_numbers<[2], [1], [1], [2], [0, 0, 0, 1, 1, 2], [0], [0]>} : vector<4x8x8xbf16>, vector<4x8x8xbf16>, vector<4x8x8xf32> -> vector<4x8x8xf32>
    "tpu.trace_stop"() : () -> ()
    %85 = vector.broadcast %82 : vector<4x8x1xf32> to vector<4x8x8xf32>
    %86 = arith.divf %84, %85 : vector<4x8x8xf32>
    %87 = vector.shape_cast %86 : vector<4x8x8xf32> to vector<32x8xf32>
    %c0_26 = arith.constant 0 : index
    %c24 = arith.constant 24 : index
    %88 = vector.load %arg7[%c0_26, %c24] : memref<32x32xf32, #tpu.memory_space<vmem>>, vector<32x8xf32>
    tpu.vector_store %arg7[%c0_26, %c24], %87 {strides = array<i32>} : memref<32x32xf32, #tpu.memory_space<vmem>>, vector<32x8xf32>,
    %c0_27 = arith.constant 0 : index
    %c0_28 = arith.constant 0 : index
    %89 = vector.load %arg7[%c0_27, %c0_28] : memref<32x32xf32, #tpu.memory_space<vmem>>, vector<32x32xf32>
    %90 = arith.truncf %89 : vector<32x32xf32> to vector<32x32xbf16>
    %c0_29 = arith.constant 0 : index
    %c0_30 = arith.constant 0 : index
    %91 = vector.load %arg4[%c0_29, %c0_30] : memref<32x32xbf16, #tpu.memory_space<vmem>>, vector<32x32xbf16>
    %cst_31 = arith.constant dense<0.000000e+00> : vector<32x32xf32>
    %92 = tpu.matmul %90, %91, %cst_31 {dimension_numbers = #tpu.dot_dimension_numbers<[1], [0], [0], [1], [0, 0, 1, 1], [], []>} : vector<32x32xbf16>, vector<32x32xbf16>, vector<32x32xf32> -> vector<32x32xf32>
    %c0_32 = arith.constant 0 : index
    %c0_33 = arith.constant 0 : index
    %93 = vector.load %arg5[%c0_32, %c0_33] : memref<3x32xf32, #tpu.memory_space<vmem>>, vector<1x32xf32>
    %94 = vector.broadcast %93 : vector<1x32xf32> to vector<32x32xf32>
    %95 = arith.addf %92, %94 : vector<32x32xf32>
    %96 = arith.addf %1, %95 : vector<32x32xf32>
    %cst_34 = arith.constant dense<0.000000e+00> : vector<32xf32>
    %97 = vector.multi_reduction <add>, %96, %cst_34 [1] : vector<32x32xf32> to vector<32xf32>
    %98 = vector.shape_cast %97 : vector<32xf32> to vector<32x1xf32>
    %cst_35 = arith.constant 3.125000e-02 : f32
    %99 = vector.broadcast %cst_35 : f32 to vector<32x1xf32>
    %100 = arith.mulf %98, %99 : vector<32x1xf32>
    %101 = arith.mulf %96, %96 : vector<32x32xf32>
    %cst_36 = arith.constant dense<0.000000e+00> : vector<32xf32>
    %102 = vector.multi_reduction <add>, %101, %cst_36 [1] : vector<32x32xf32> to vector<32xf32>
    %103 = vector.shape_cast %102 : vector<32xf32> to vector<32x1xf32>
    %cst_37 = arith.constant 3.125000e-02 : f32
    %104 = vector.broadcast %cst_37 : f32 to vector<32x1xf32>
    %105 = arith.mulf %103, %104 : vector<32x1xf32>
    %106 = arith.mulf %100, %100 : vector<32x1xf32>
    %107 = arith.subf %105, %106 : vector<32x1xf32>
    %108 = vector.broadcast %100 : vector<32x1xf32> to vector<32x32xf32>
    %109 = arith.subf %96, %108 : vector<32x32xf32>
    %cst_38 = arith.constant 9.99999974E-6 : f32
    %110 = vector.broadcast %cst_38 : f32 to vector<32x1xf32>
    %111 = arith.addf %107, %110 : vector<32x1xf32>
    %112 = math.rsqrt %111 : vector<32x1xf32>
    %113 = vector.broadcast %112 : vector<32x1xf32> to vector<32x32xf32>
    %114 = arith.mulf %109, %113 : vector<32x32xf32>
    %c1 = arith.constant 1 : index
    %c0_39 = arith.constant 0 : index
    %115 = vector.load %arg5[%c1, %c0_39] : memref<3x32xf32, #tpu.memory_space<vmem>>, vector<1x32xf32>
    %116 = vector.broadcast %115 : vector<1x32xf32> to vector<32x32xf32>
    %117 = arith.mulf %114, %116 : vector<32x32xf32>
    %c2 = arith.constant 2 : index
    %c0_40 = arith.constant 0 : index
    %118 = vector.load %arg5[%c2, %c0_40] : memref<3x32xf32, #tpu.memory_space<vmem>>, vector<1x32xf32>
    %119 = vector.broadcast %118 : vector<1x32xf32> to vector<32x32xf32>
    %120 = arith.addf %117, %119 : vector<32x32xf32>
    %121 = vector.shape_cast %120 : vector<32x32xf32> to vector<4x8x32xf32>
    %c0_41 = arith.constant 0 : index
    %c0_42 = arith.constant 0 : index
    %c0_43 = arith.constant 0 : index
    %122 = vector.load %arg6[%c0_41, %c0_42, %c0_43] : memref<4x8x32xf32, #tpu.memory_space<vmem>>, vector<4x8x32xf32>
    tpu.vector_store %arg6[%c0_41, %c0_42, %c0_43], %121 {strides = array<i32>} : memref<4x8x32xf32, #tpu.memory_space<vmem>>, vector<4x8x32xf32>,
    return
  }
  func.func @transform_0(%arg0: i32) -> (i32, i32, i32) {
    %c0_i32 = arith.constant 0 : i32
    %c0_i32_0 = arith.constant 0 : i32
    %c0_i32_1 = arith.constant 0 : i32
    return %arg0, %c0_i32, %c0_i32_0 : i32, i32, i32
  }
  func.func @transform_1(%arg0: i32) -> (i32, i32) {
    %c0_i32 = arith.constant 0 : i32
    %c0_i32_0 = arith.constant 0 : i32
    %c0_i32_1 = arith.constant 0 : i32
    return %c0_i32, %c0_i32_0 : i32, i32
  }
  func.func @transform_2(%arg0: i32) -> (i32, i32) {
    %c0_i32 = arith.constant 0 : i32
    %c0_i32_0 = arith.constant 0 : i32
    %c0_i32_1 = arith.constant 0 : i32
    return %c0_i32, %c0_i32_0 : i32, i32
  }
  func.func @transform_3(%arg0: i32) -> (i32, i32) {
    %c0_i32 = arith.constant 0 : i32
    %c0_i32_0 = arith.constant 0 : i32
    %c0_i32_1 = arith.constant 0 : i32
    return %c0_i32, %c0_i32_0 : i32, i32
  }
  func.func @transform_4(%arg0: i32) -> (i32, i32) {
    %c0_i32 = arith.constant 0 : i32
    %c0_i32_0 = arith.constant 0 : i32
    %c0_i32_1 = arith.constant 0 : i32
    return %c0_i32, %c0_i32_0 : i32, i32
  }
  func.func @transform_5(%arg0: i32) -> (i32, i32, i32) {
    %c0_i32 = arith.constant 0 : i32
    %c0_i32_0 = arith.constant 0 : i32
    %c0_i32_1 = arith.constant 0 : i32
    return %arg0, %c0_i32, %c0_i32_0 : i32, i32, i32
  }
}

module attributes {stable_mosaic.version = 11 : i64} {
  func.func @_encoder_kernel(%arg0: i32, %arg1: memref<4x8x32xf32, #tpu.memory_space<vmem>>, %arg2: memref<32x96xbf16, #tpu.memory_space<vmem>>, %arg3: memref<1x96xf32, #tpu.memory_space<vmem>>, %arg4: memref<32x32xbf16, #tpu.memory_space<vmem>>, %arg5: memref<3x32xf32, #tpu.memory_space<vmem>>, %arg6: memref<4x8x32xf32, #tpu.memory_space<vmem>>, %arg7: memref<32x32xf32, #tpu.memory_space<vmem>>) attributes {dimension_semantics = [#tpu.dimension_semantics<parallel>], iteration_bounds = array<i64: 1>, scalar_prefetch = 0 : i64, scratch_operands = 1 : i64, tpu.core_type = #tpu.core_type<tc>, window_params = [{transform_indices = @transform_0, window_bounds = array<i64: 4, 8, 32>}, {pipeline_mode = #tpu.pipeline_mode<synchronous>, transform_indices = @transform_1, window_bounds = array<i64: 32, 96>}, {pipeline_mode = #tpu.pipeline_mode<synchronous>, transform_indices = @transform_2, window_bounds = array<i64: 1, 96>}, {pipeline_mode = #tpu.pipeline_mode<synchronous>, transform_indices = @transform_3, window_bounds = array<i64: 32, 32>}, {pipeline_mode = #tpu.pipeline_mode<synchronous>, transform_indices = @transform_4, window_bounds = array<i64: 3, 32>}, {transform_indices = @transform_5, window_bounds = array<i64: 4, 8, 32>}]} {
    %c0 = arith.constant 0 : index
    %c0_0 = arith.constant 0 : index
    %c0_1 = arith.constant 0 : index
    %0 = vector.load %arg1[%c0, %c0_0, %c0_1] : memref<4x8x32xf32, #tpu.memory_space<vmem>>, vector<4x8x32xf32>
    %1 = vector.shape_cast %0 : vector<4x8x32xf32> to vector<32x32xf32>
    %2 = arith.truncf %1 : vector<32x32xf32> to vector<32x32xbf16>
    %c0_2 = arith.constant 0 : index
    %c0_3 = arith.constant 0 : index
    %3 = vector.load %arg2[%c0_2, %c0_3] : memref<32x96xbf16, #tpu.memory_space<vmem>>, vector<32x96xbf16>
    %cst = arith.constant dense<0.000000e+00> : vector<32x96xf32>
    %4 = tpu.matmul %2, %3, %cst {dimension_numbers = #tpu.dot_dimension_numbers<[1], [0], [0], [1], [0, 0, 1, 1], [], []>} : vector<32x32xbf16>, vector<32x96xbf16>, vector<32x96xf32> -> vector<32x96xf32>
    %c0_4 = arith.constant 0 : index
    %c0_5 = arith.constant 0 : index
    %5 = vector.load %arg3[%c0_4, %c0_5] : memref<1x96xf32, #tpu.memory_space<vmem>>, vector<1x96xf32>
    %6 = vector.broadcast %5 : vector<1x96xf32> to vector<32x96xf32>
    %7 = arith.addf %4, %6 : vector<32x96xf32>
    %8 = vector.shape_cast %7 : vector<32x96xf32> to vector<4x8x96xf32>
    %9 = vector.extract_strided_slice %8 {offsets = [0, 0, 0], sizes = [4, 8, 8], strides = [1, 1, 1]} : vector<4x8x96xf32> to vector<4x8x8xf32>
    %10 = arith.truncf %9 : vector<4x8x8xf32> to vector<4x8x8xbf16>
    %11 = vector.extract_strided_slice %8 {offsets = [0, 0, 32], sizes = [4, 8, 8], strides = [1, 1, 1]} : vector<4x8x96xf32> to vector<4x8x8xf32>
    %12 = arith.truncf %11 : vector<4x8x8xf32> to vector<4x8x8xbf16>
    %13 = vector.extract_strided_slice %8 {offsets = [0, 0, 64], sizes = [4, 8, 8], strides = [1, 1, 1]} : vector<4x8x96xf32> to vector<4x8x8xf32>
    %14 = arith.truncf %13 : vector<4x8x8xf32> to vector<4x8x8xbf16>
    "tpu.trace_start"() <{level = 10 : i32, message = "bqd,bkd->bqk"}> : () -> ()
    %cst_6 = arith.constant dense<0.000000e+00> : vector<4x8x8xf32>
    %15 = tpu.matmul %10, %12, %cst_6 {dimension_numbers = #tpu.dot_dimension_numbers<[2], [2], [1], [1], [0, 0, 0, 1, 1, 1], [0], [0]>} : vector<4x8x8xbf16>, vector<4x8x8xbf16>, vector<4x8x8xf32> -> vector<4x8x8xf32>
    "tpu.trace_stop"() : () -> ()
    %cst_7 = arith.constant dense<0xFF800000> : vector<4x8xf32>
    %16 = vector.multi_reduction <maximumf>, %15, %cst_7 [2] : vector<4x8x8xf32> to vector<4x8xf32>
    %17 = vector.shape_cast %16 : vector<4x8xf32> to vector<4x8x1xf32>
    %18 = vector.broadcast %17 : vector<4x8x1xf32> to vector<4x8x8xf32>
    %19 = arith.subf %15, %18 : vector<4x8x8xf32>
    %20 = math.exp %19 : vector<4x8x8xf32>
    %cst_8 = arith.constant dense<0.000000e+00> : vector<4x8xf32>
    %21 = vector.multi_reduction <add>, %20, %cst_8 [2] : vector<4x8x8xf32> to vector<4x8xf32>
    %22 = vector.shape_cast %21 : vector<4x8xf32> to vector<4x8x1xf32>
    %23 = arith.truncf %20 : vector<4x8x8xf32> to vector<4x8x8xbf16>
    "tpu.trace_start"() <{level = 10 : i32, message = "bqk,bkd->bqd"}> : () -> ()
    %cst_9 = arith.constant dense<0.000000e+00> : vector<4x8x8xf32>
    %24 = tpu.matmul %23, %14, %cst_9 {dimension_numbers = #tpu.dot_dimension_numbers<[2], [1], [1], [2], [0, 0, 0, 1, 1, 2], [0], [0]>} : vector<4x8x8xbf16>, vector<4x8x8xbf16>, vector<4x8x8xf32> -> vector<4x8x8xf32>
    "tpu.trace_stop"() : () -> ()
    %25 = vector.broadcast %22 : vector<4x8x1xf32> to vector<4x8x8xf32>
    %26 = arith.divf %24, %25 : vector<4x8x8xf32>
    %27 = vector.shape_cast %26 : vector<4x8x8xf32> to vector<32x8xf32>
    %c0_10 = arith.constant 0 : index
    %c0_11 = arith.constant 0 : index
    %28 = vector.load %arg7[%c0_10, %c0_11] : memref<32x32xf32, #tpu.memory_space<vmem>>, vector<32x8xf32>
    tpu.vector_store %arg7[%c0_10, %c0_11], %27 {strides = array<i32>} : memref<32x32xf32, #tpu.memory_space<vmem>>, vector<32x8xf32>,
    %29 = vector.extract_strided_slice %8 {offsets = [0, 0, 8], sizes = [4, 8, 8], strides = [1, 1, 1]} : vector<4x8x96xf32> to vector<4x8x8xf32>
    %30 = arith.truncf %29 : vector<4x8x8xf32> to vector<4x8x8xbf16>
    %31 = vector.extract_strided_slice %8 {offsets = [0, 0, 40], sizes = [4, 8, 8], strides = [1, 1, 1]} : vector<4x8x96xf32> to vector<4x8x8xf32>
    %32 = arith.truncf %31 : vector<4x8x8xf32> to vector<4x8x8xbf16>
    %33 = vector.extract_strided_slice %8 {offsets = [0, 0, 72], sizes = [4, 8, 8], strides = [1, 1, 1]} : vector<4x8x96xf32> to vector<4x8x8xf32>
    %34 = arith.truncf %33 : vector<4x8x8xf32> to vector<4x8x8xbf16>
    "tpu.trace_start"() <{level = 10 : i32, message = "bqd,bkd->bqk"}> : () -> ()
    %cst_12 = arith.constant dense<0.000000e+00> : vector<4x8x8xf32>
    %35 = tpu.matmul %30, %32, %cst_12 {dimension_numbers = #tpu.dot_dimension_numbers<[2], [2], [1], [1], [0, 0, 0, 1, 1, 1], [0], [0]>} : vector<4x8x8xbf16>, vector<4x8x8xbf16>, vector<4x8x8xf32> -> vector<4x8x8xf32>
    "tpu.trace_stop"() : () -> ()
    %cst_13 = arith.constant dense<0xFF800000> : vector<4x8xf32>
    %36 = vector.multi_reduction <maximumf>, %35, %cst_13 [2] : vector<4x8x8xf32> to vector<4x8xf32>
    %37 = vector.shape_cast %36 : vector<4x8xf32> to vector<4x8x1xf32>
    %38 = vector.broadcast %37 : vector<4x8x1xf32> to vector<4x8x8xf32>
    %39 = arith.subf %35, %38 : vector<4x8x8xf32>
    %40 = math.exp %39 : vector<4x8x8xf32>
    %cst_14 = arith.constant dense<0.000000e+00> : vector<4x8xf32>
    %41 = vector.multi_reduction <add>, %40, %cst_14 [2] : vector<4x8x8xf32> to vector<4x8xf32>
    %42 = vector.shape_cast %41 : vector<4x8xf32> to vector<4x8x1xf32>
    %43 = arith.truncf %40 : vector<4x8x8xf32> to vector<4x8x8xbf16>
    "tpu.trace_start"() <{level = 10 : i32, message = "bqk,bkd->bqd"}> : () -> ()
    %cst_15 = arith.constant dense<0.000000e+00> : vector<4x8x8xf32>
    %44 = tpu.matmul %43, %34, %cst_15 {dimension_numbers = #tpu.dot_dimension_numbers<[2], [1], [1], [2], [0, 0, 0, 1, 1, 2], [0], [0]>} : vector<4x8x8xbf16>, vector<4x8x8xbf16>, vector<4x8x8xf32> -> vector<4x8x8xf32>
    "tpu.trace_stop"() : () -> ()
    %45 = vector.broadcast %42 : vector<4x8x1xf32> to vector<4x8x8xf32>
    %46 = arith.divf %44, %45 : vector<4x8x8xf32>
    %47 = vector.shape_cast %46 : vector<4x8x8xf32> to vector<32x8xf32>
    %c0_16 = arith.constant 0 : index
    %c8 = arith.constant 8 : index
    %48 = vector.load %arg7[%c0_16, %c8] : memref<32x32xf32, #tpu.memory_space<vmem>>, vector<32x8xf32>
    tpu.vector_store %arg7[%c0_16, %c8], %47 {strides = array<i32>} : memref<32x32xf32, #tpu.memory_space<vmem>>, vector<32x8xf32>,
    %49 = vector.extract_strided_slice %8 {offsets = [0, 0, 16], sizes = [4, 8, 8], strides = [1, 1, 1]} : vector<4x8x96xf32> to vector<4x8x8xf32>
    %50 = arith.truncf %49 : vector<4x8x8xf32> to vector<4x8x8xbf16>
    %51 = vector.extract_strided_slice %8 {offsets = [0, 0, 48], sizes = [4, 8, 8], strides = [1, 1, 1]} : vector<4x8x96xf32> to vector<4x8x8xf32>
    %52 = arith.truncf %51 : vector<4x8x8xf32> to vector<4x8x8xbf16>
    %53 = vector.extract_strided_slice %8 {offsets = [0, 0, 80], sizes = [4, 8, 8], strides = [1, 1, 1]} : vector<4x8x96xf32> to vector<4x8x8xf32>
    %54 = arith.truncf %53 : vector<4x8x8xf32> to vector<4x8x8xbf16>
    "tpu.trace_start"() <{level = 10 : i32, message = "bqd,bkd->bqk"}> : () -> ()
    %cst_17 = arith.constant dense<0.000000e+00> : vector<4x8x8xf32>
    %55 = tpu.matmul %50, %52, %cst_17 {dimension_numbers = #tpu.dot_dimension_numbers<[2], [2], [1], [1], [0, 0, 0, 1, 1, 1], [0], [0]>} : vector<4x8x8xbf16>, vector<4x8x8xbf16>, vector<4x8x8xf32> -> vector<4x8x8xf32>
    "tpu.trace_stop"() : () -> ()
    %cst_18 = arith.constant dense<0xFF800000> : vector<4x8xf32>
    %56 = vector.multi_reduction <maximumf>, %55, %cst_18 [2] : vector<4x8x8xf32> to vector<4x8xf32>
    %57 = vector.shape_cast %56 : vector<4x8xf32> to vector<4x8x1xf32>
    %58 = vector.broadcast %57 : vector<4x8x1xf32> to vector<4x8x8xf32>
    %59 = arith.subf %55, %58 : vector<4x8x8xf32>
    %60 = math.exp %59 : vector<4x8x8xf32>
    %cst_19 = arith.constant dense<0.000000e+00> : vector<4x8xf32>
    %61 = vector.multi_reduction <add>, %60, %cst_19 [2] : vector<4x8x8xf32> to vector<4x8xf32>
    %62 = vector.shape_cast %61 : vector<4x8xf32> to vector<4x8x1xf32>
    %63 = arith.truncf %60 : vector<4x8x8xf32> to vector<4x8x8xbf16>
    "tpu.trace_start"() <{level = 10 : i32, message = "bqk,bkd->bqd"}> : () -> ()
    %cst_20 = arith.constant dense<0.000000e+00> : vector<4x8x8xf32>
    %64 = tpu.matmul %63, %54, %cst_20 {dimension_numbers = #tpu.dot_dimension_numbers<[2], [1], [1], [2], [0, 0, 0, 1, 1, 2], [0], [0]>} : vector<4x8x8xbf16>, vector<4x8x8xbf16>, vector<4x8x8xf32> -> vector<4x8x8xf32>
    "tpu.trace_stop"() : () -> ()
    %65 = vector.broadcast %62 : vector<4x8x1xf32> to vector<4x8x8xf32>
    %66 = arith.divf %64, %65 : vector<4x8x8xf32>
    %67 = vector.shape_cast %66 : vector<4x8x8xf32> to vector<32x8xf32>
    %c0_21 = arith.constant 0 : index
    %c16 = arith.constant 16 : index
    %68 = vector.load %arg7[%c0_21, %c16] : memref<32x32xf32, #tpu.memory_space<vmem>>, vector<32x8xf32>
    tpu.vector_store %arg7[%c0_21, %c16], %67 {strides = array<i32>} : memref<32x32xf32, #tpu.memory_space<vmem>>, vector<32x8xf32>,
    %69 = vector.extract_strided_slice %8 {offsets = [0, 0, 24], sizes = [4, 8, 8], strides = [1, 1, 1]} : vector<4x8x96xf32> to vector<4x8x8xf32>
    %70 = arith.truncf %69 : vector<4x8x8xf32> to vector<4x8x8xbf16>
    %71 = vector.extract_strided_slice %8 {offsets = [0, 0, 56], sizes = [4, 8, 8], strides = [1, 1, 1]} : vector<4x8x96xf32> to vector<4x8x8xf32>
    %72 = arith.truncf %71 : vector<4x8x8xf32> to vector<4x8x8xbf16>
    %73 = vector.extract_strided_slice %8 {offsets = [0, 0, 88], sizes = [4, 8, 8], strides = [1, 1, 1]} : vector<4x8x96xf32> to vector<4x8x8xf32>
    %74 = arith.truncf %73 : vector<4x8x8xf32> to vector<4x8x8xbf16>
    "tpu.trace_start"() <{level = 10 : i32, message = "bqd,bkd->bqk"}> : () -> ()
    %cst_22 = arith.constant dense<0.000000e+00> : vector<4x8x8xf32>
    %75 = tpu.matmul %70, %72, %cst_22 {dimension_numbers = #tpu.dot_dimension_numbers<[2], [2], [1], [1], [0, 0, 0, 1, 1, 1], [0], [0]>} : vector<4x8x8xbf16>, vector<4x8x8xbf16>, vector<4x8x8xf32> -> vector<4x8x8xf32>
    "tpu.trace_stop"() : () -> ()
    %cst_23 = arith.constant dense<0xFF800000> : vector<4x8xf32>
    %76 = vector.multi_reduction <maximumf>, %75, %cst_23 [2] : vector<4x8x8xf32> to vector<4x8xf32>
    %77 = vector.shape_cast %76 : vector<4x8xf32> to vector<4x8x1xf32>
    %78 = vector.broadcast %77 : vector<4x8x1xf32> to vector<4x8x8xf32>
    %79 = arith.subf %75, %78 : vector<4x8x8xf32>
    %80 = math.exp %79 : vector<4x8x8xf32>
    %cst_24 = arith.constant dense<0.000000e+00> : vector<4x8xf32>
    %81 = vector.multi_reduction <add>, %80, %cst_24 [2] : vector<4x8x8xf32> to vector<4x8xf32>
    %82 = vector.shape_cast %81 : vector<4x8xf32> to vector<4x8x1xf32>
    %83 = arith.truncf %80 : vector<4x8x8xf32> to vector<4x8x8xbf16>
    "tpu.trace_start"() <{level = 10 : i32, message = "bqk,bkd->bqd"}> : () -> ()
    %cst_25 = arith.constant dense<0.000000e+00> : vector<4x8x8xf32>
    %84 = tpu.matmul %83, %74, %cst_25 {dimension_numbers = #tpu.dot_dimension_numbers<[2], [1], [1], [2], [0, 0, 0, 1, 1, 2], [0], [0]>} : vector<4x8x8xbf16>, vector<4x8x8xbf16>, vector<4x8x8xf32> -> vector<4x8x8xf32>
    "tpu.trace_stop"() : () -> ()
    %85 = vector.broadcast %82 : vector<4x8x1xf32> to vector<4x8x8xf32>
    %86 = arith.divf %84, %85 : vector<4x8x8xf32>
    %87 = vector.shape_cast %86 : vector<4x8x8xf32> to vector<32x8xf32>
    %c0_26 = arith.constant 0 : index
    %c24 = arith.constant 24 : index
    %88 = vector.load %arg7[%c0_26, %c24] : memref<32x32xf32, #tpu.memory_space<vmem>>, vector<32x8xf32>
    tpu.vector_store %arg7[%c0_26, %c24], %87 {strides = array<i32>} : memref<32x32xf32, #tpu.memory_space<vmem>>, vector<32x8xf32>,
    %c0_27 = arith.constant 0 : index
    %c0_28 = arith.constant 0 : index
    %89 = vector.load %arg7[%c0_27, %c0_28] : memref<32x32xf32, #tpu.memory_space<vmem>>, vector<32x32xf32>
    %90 = arith.truncf %89 : vector<32x32xf32> to vector<32x32xbf16>
    %c0_29 = arith.constant 0 : index
    %c0_30 = arith.constant 0 : index
    %91 = vector.load %arg4[%c0_29, %c0_30] : memref<32x32xbf16, #tpu.memory_space<vmem>>, vector<32x32xbf16>
    %cst_31 = arith.constant dense<0.000000e+00> : vector<32x32xf32>
    %92 = tpu.matmul %90, %91, %cst_31 {dimension_numbers = #tpu.dot_dimension_numbers<[1], [0], [0], [1], [0, 0, 1, 1], [], []>} : vector<32x32xbf16>, vector<32x32xbf16>, vector<32x32xf32> -> vector<32x32xf32>
    %c0_32 = arith.constant 0 : index
    %c0_33 = arith.constant 0 : index
    %93 = vector.load %arg5[%c0_32, %c0_33] : memref<3x32xf32, #tpu.memory_space<vmem>>, vector<1x32xf32>
    %94 = vector.broadcast %93 : vector<1x32xf32> to vector<32x32xf32>
    %95 = arith.addf %92, %94 : vector<32x32xf32>
    %96 = arith.addf %1, %95 : vector<32x32xf32>
    %cst_34 = arith.constant dense<0.000000e+00> : vector<32xf32>
    %97 = vector.multi_reduction <add>, %96, %cst_34 [1] : vector<32x32xf32> to vector<32xf32>
    %98 = vector.shape_cast %97 : vector<32xf32> to vector<32x1xf32>
    %cst_35 = arith.constant 3.125000e-02 : f32
    %99 = vector.broadcast %cst_35 : f32 to vector<32x1xf32>
    %100 = arith.mulf %98, %99 : vector<32x1xf32>
    %101 = arith.mulf %96, %96 : vector<32x32xf32>
    %cst_36 = arith.constant dense<0.000000e+00> : vector<32xf32>
    %102 = vector.multi_reduction <add>, %101, %cst_36 [1] : vector<32x32xf32> to vector<32xf32>
    %103 = vector.shape_cast %102 : vector<32xf32> to vector<32x1xf32>
    %cst_37 = arith.constant 3.125000e-02 : f32
    %104 = vector.broadcast %cst_37 : f32 to vector<32x1xf32>
    %105 = arith.mulf %103, %104 : vector<32x1xf32>
    %106 = arith.mulf %100, %100 : vector<32x1xf32>
    %107 = arith.subf %105, %106 : vector<32x1xf32>
    %108 = vector.broadcast %100 : vector<32x1xf32> to vector<32x32xf32>
    %109 = arith.subf %96, %108 : vector<32x32xf32>
    %cst_38 = arith.constant 9.99999974E-6 : f32
    %110 = vector.broadcast %cst_38 : f32 to vector<32x1xf32>
    %111 = arith.addf %107, %110 : vector<32x1xf32>
    %112 = math.rsqrt %111 : vector<32x1xf32>
    %113 = vector.broadcast %112 : vector<32x1xf32> to vector<32x32xf32>
    %114 = arith.mulf %109, %113 : vector<32x32xf32>
    %c1 = arith.constant 1 : index
    %c0_39 = arith.constant 0 : index
    %115 = vector.load %arg5[%c1, %c0_39] : memref<3x32xf32, #tpu.memory_space<vmem>>, vector<1x32xf32>
    %116 = vector.broadcast %115 : vector<1x32xf32> to vector<32x32xf32>
    %117 = arith.mulf %114, %116 : vector<32x32xf32>
    %c2 = arith.constant 2 : index
    %c0_40 = arith.constant 0 : index
    %118 = vector.load %arg5[%c2, %c0_40] : memref<3x32xf32, #tpu.memory_space<vmem>>, vector<1x32xf32>
    %119 = vector.broadcast %118 : vector<1x32xf32> to vector<32x32xf32>
    %120 = arith.addf %117, %119 : vector<32x32xf32>
    %121 = vector.shape_cast %120 : vector<32x32xf32> to vector<4x8x32xf32>
    %c0_41 = arith.constant 0 : index
    %c0_42 = arith.constant 0 : index
    %c0_43 = arith.constant 0 : index
    %122 = vector.load %arg6[%c0_41, %c0_42, %c0_43] : memref<4x8x32xf32, #tpu.memory_space<vmem>>, vector<4x8x32xf32>
    tpu.vector_store %arg6[%c0_41, %c0_42, %c0_43], %121 {strides = array<i32>} : memref<4x8x32xf32, #tpu.memory_space<vmem>>, vector<4x8x32xf32>,
    return
  }
  func.func @transform_0(%arg0: i32) -> (i32, i32, i32) {
    %c0_i32 = arith.constant 0 : i32
    %c0_i32_0 = arith.constant 0 : i32
    %c0_i32_1 = arith.constant 0 : i32
    return %arg0, %c0_i32, %c0_i32_0 : i32, i32, i32
  }
  func.func @transform_1(%arg0: i32) -> (i32, i32) {
    %c0_i32 = arith.constant 0 : i32
    %c0_i32_0 = arith.constant 0 : i32
    %c0_i32_1 = arith.constant 0 : i32
    return %c0_i32, %c0_i32_0 : i32, i32
  }
  func.func @transform_2(%arg0: i32) -> (i32, i32) {
    %c0_i32 = arith.constant 0 : i32
    %c0_i32_0 = arith.constant 0 : i32
    %c0_i32_1 = arith.constant 0 : i32
    return %c0_i32, %c0_i32_0 : i32, i32
  }
  func.func @transform_3(%arg0: i32) -> (i32, i32) {
    %c0_i32 = arith.constant 0 : i32
    %c0_i32_0 = arith.constant 0 : i32
    %c0_i32_1 = arith.constant 0 : i32
    return %c0_i32, %c0_i32_0 : i32, i32
  }
  func.func @transform_4(%arg0: i32) -> (i32, i32) {
    %c0_i32 = arith.constant 0 : i32
    %c0_i32_0 = arith.constant 0 : i32
    %c0_i32_1 = arith.constant 0 : i32
    return %c0_i32, %c0_i32_0 : i32, i32
  }
  func.func @transform_5(%arg0: i32) -> (i32, i32, i32) {
    %c0_i32 = arith.constant 0 : i32
    %c0_i32_0 = arith.constant 0 : i32
    %c0_i32_1 = arith.constant 0 : i32
    return %arg0, %c0_i32, %c0_i32_0 : i32, i32, i32
  }
}

</mosaic_0001>

<bundles_post_ra>
// kernel: tpu_custom_call.1
= control target key start
LH: loop header
LB: loop body
LE: loop exit
PB: predicated region body
PF: predicated region fallthrough
CT: control target
= control target key end

     0   :  { %10 = vsyncpa [#allocation4], 0  ;;  %s3177_s0 = inlined_call_operand.hbm [shape: f32[4,8,32], index: 0, kind: input, shape index: {}]   ;;  %s3178_s1 = inlined_call_operand.hbm [shape: bf16[32,96], index: 1, kind: input, shape index: {}]   ;;  %s3179_s2 = inlined_call_operand.vmem [shape: f32[1,96], index: 2, kind: input, shape index: {}]   ;;  %s3180_s3 = inlined_call_operand.hbm [shape: bf16[32,32], index: 3, kind: input, shape index: {}]   ;;  %s3181_s4 = inlined_call_operand.vmem [shape: f32[3,32], index: 4, kind: input, shape index: {}]   ;;  %s3182_s5 = inlined_call_operand.hbm [shape: f32[4,8,32], index: 5, kind: output, shape index: {}]  }
   0x1   :  { %11 = vsyncpa [#allocation7], 0 }
   0x2   :  { %12 = vsyncpa [#allocation5], 0  ;;  %s2675_s18 = smov [#allocation6]  }
   0x3   :  { %s30_s19 = sshll.u32 %s2675_s18, 4  ;;  %s31_s19 = int_to_ptr.vmem [resolvable:$true] %s30_s19 }
   0x4   :  { %s2597_s20 = scalar_lea.vmem %s31_s19, 256  ;;  %p2602_p1 = scmp.lt.s32.totalorder %s31_s19, %s31_s19 }
   0x5   :  { %p2598_p0 = scmp.ne.s32.totalorder %s31_s19, %s2597_s20  ;;  %p2603_p2 = scmp.lt.s32.totalorder %s2597_s20, %s2597_s20 }
   0x7   :  { %p2604_p3 = por %p2603_p2, %p2602_p1 }
   0x9   :  { %p2605_p4 = pnand %p2604_p3, %p2598_p0 }
   0xb   :  { %2608 = shalt.err (!%p2605_p4)
}
   0xc   :  { %s2676_s21 = smov 64   ;;  %s2677_s22 = smov 4  }
   0xd   :  { %36 = dma.hbm_to_vmem [thread:$0]  %s3178_s1, 256, %s31_s19, [#allocation7], %s2676_s21, %s2676_s21, %s2677_s22  }
   0xe   :  { %s2678_s25 = smov [#allocation3]  }
   0xf   :  { %s18_s26 = sshll.u32 %s2678_s25, 4  ;;  %s19_s26 = int_to_ptr.vmem [resolvable:$true] %s18_s26 }
  0x10   :  { %s2617_s27 = scalar_lea.vmem %s19_s26, 512  ;;  %p2622_p6 = scmp.lt.s32.totalorder %s19_s26, %s19_s26 }
  0x11   :  { %p2618_p5 = scmp.ne.s32.totalorder %s19_s26, %s2617_s27  ;;  %p2623_p7 = scmp.lt.s32.totalorder %s2617_s27, %s2617_s27 }
  0x13   :  { %p2624_p8 = por %p2623_p7, %p2622_p6 }
  0x15   :  { %p2625_p9 = pnand %p2624_p8, %p2618_p5 }
  0x17   :  { %2628 = shalt.err (!%p2625_p9)
}
  0x18   :  { %s2679_s28 = smov 128   ;;  %s2680_s29 = smov 8  }
  0x19   :  { %24 = dma.hbm_to_vmem [thread:$0]  %s3177_s0, 512, %s19_s26, [#allocation4], %s2679_s28, %s2679_s28, %s2680_s29  }
  0x1a   :  { %s2681_s1 = smov [#allocation8]  }
  0x1b   :  { %s44_s7 = sshll.u32 %s2681_s1, 4  ;;  %s45_s7 = int_to_ptr.vmem [resolvable:$true] %s44_s7 }
  0x1c   :  { %s2637_s8 = scalar_lea.vmem %s45_s7, 256  ;;  %p2642_p11 = scmp.lt.s32.totalorder %s45_s7, %s45_s7 }
  0x1d   :  { %p2638_p10 = scmp.ne.s32.totalorder %s45_s7, %s2637_s8  ;;  %p2643_p12 = scmp.lt.s32.totalorder %s2637_s8, %s2637_s8 }
  0x1f   :  { %p2644_p13 = por %p2643_p12, %p2642_p11 }
  0x21   :  { %p2645_p0 = pnand %p2644_p13, %p2638_p10 }
  0x23   :  { %2648 = shalt.err (!%p2645_p0)
}
  0x24   :  { %50 = dma.hbm_to_vmem [thread:$0]  %s3180_s3, 256, %s45_s7, [#allocation7], %s2676_s21, %s2676_s21, %s2677_s22  }
  0x25   :  { %2669 = dma.done.wait [#allocation4], 512  }
  0x26   :  { %2670 = vsyncadd [#allocation4], 4294966784 }
  0x27   :  { %2671 = dma.done.wait [#allocation7], 512  }
  0x28   :  { %2672 = vsyncadd [#allocation7], 4294966784  ;;  %v2509_v0 = vld [vmem:[#allocation6 + $0x8] sm:$0xff]   ;;  %v2510_v1 = vld [vmem:[#allocation6] sm:$0xff]   ;;  %vm92_vm0 = vcmask 261120   ;;  %v2682_v8 = vmov 0.0  }
  0x29   :  { %2279 = vmatprep.subr.bf16.mxu0 %v2509_v0  ;;  %v63_v2 = vld [vmem:[#allocation3] sm:$0xff]  ;;  %v64_v3 = vld [vmem:[#allocation3 + $0x8] sm:$0xff]  ;;  %v65_v4 = vld [vmem:[#allocation3 + $0x10] sm:$0xff]  ;;  %2287 = vmatprep.subr.bf16.mxu1 %v2682_v8  ;;  %vm2683_vm1 = vmmov 0   ;;  %s2684_s11 = smov 96   ;;  %vm155_vm2 = vcmask 64512  }
  0x2a   :  { %2280 = vmatpush3.bf16.msra.mxu0 %v2509_v0  ;;  %v67_v5 = vpack.c.bf16 %v64_v3, %v63_v2  ;;  %v66_v6 = vld [vmem:[#allocation3 + $0x18] sm:$0xff]  ;;  %v2163_v9 = vld [vmem:[%s3179_s2] ss:$0 sm:$0xff]  ;;  %2289 = vmatprep.mubr.msk.bf16.mxu1 %vm2683_vm1, %v2682_v8  ;;  %vm394_vm3 = vcmask 1043456   ;;  %s2685_s2 = smov 88   ;;  %s2686_s12 = smov 120  }
  0x2b   :  { %2281 = vmatprep.subr.bf16.mxu0 %v2510_v1  ;;  %v68_v7 = vpack.c.bf16 %v66_v6, %v65_v4  ;;  %s2687_s13 = smov 56   ;;  %s2688_s14 = smov 80   ;;  %vm1050_vm4 = vcmask 130112   ;;  %vm1511_vm5 = vcmask 195712   ;;  %vm1972_vm6 = vcmask 261312  }
  0x2c   :  { %2283 = vmatprep.mubr.msk.bf16.mxu0 %vm92_vm0, %v67_v5  ;;  %s2689_s15 = smov 112   ;;  %s2690_s16 = smov 48  }
  0x2d   :  { %s2691_s17 = smov 72   ;;  %s2692_s18 = smov 104  }
  0x2e   :  { %2282 = vmatpush3.bf16.msra.mxu0 %v2510_v1  ;;  %s2693_s19 = smov 40   ;;  %s2694_s20 = smov 16  }
  0x2f   :  { %2293 = vmatprep.subr.bf16.mxu0 %v2682_v8 }
  0x31   :  { %2284 = vmatmul.mubr.msk.bf16.vlgmr.msra.gmra.mxu0 %vm92_vm0, %v68_v7 }
  0x32   :  { %2295 = vmatprep.mubr.msk.bf16.mxu0 %vm2683_vm1, %v2682_v8 }
  0xf1   :  { %v2285_v10 = vpop.f32.mrf.mxu0 }
  0xf2   :  { %v142_v11 = vadd.f32 %v2285_v10, %v2163_v9 }
  0xf3   :  { %v133_v12 = vpop.f32.mrf.mxu0 }
  0xf4   :  { %v2754_v13 = vpack.c.bf16 %v142_v11, %v142_v11  ;;  %v134_v14 = vadd.f32 %v2163_v9, %v133_v12 }
  0xf5   :  { %v2286_v15 = vpop.f32.mrf.mxu0 }
  0xf6   :  { %v2756_v16 = vpack.c.bf16 %v134_v14, %v134_v14  ;;  %v145_v17 = vadd.f32 %v2286_v15, %v2163_v9  ;;  %252 = vrot.lane.b32.xlu1 %v2754_v13, %s2684_s11 }
  0xf7   :  { %v136_v18 = vpop.f32.mrf.mxu0 }
  0xf8   :  { %v2759_v19 = vpack.c.bf16 %v145_v17, %v145_v17  ;;  %v137_v20 = vadd.f32 %v2163_v9, %v136_v18  ;;  %153 = vrot.lane.b32.xlu0 %v2756_v16, %s2684_s11 }
  0xfa   :  { %v2762_v21 = vpack.c.bf16 %v137_v20, %v137_v20  ;;  %301 = vrot.lane.b32.xlu1 %v2759_v19, %s2684_s11 }
  0xfc   :  { %203 = vrot.lane.b32.xlu0 %v2762_v21, %s2684_s11 }
  0xfe   :  { %389 = vrot.lane.b32.xlu1 %v2756_v16, %s2676_s21 }
 0x168   :  { %v253_v24 = vpop.permute.xlu1 %252 }
 0x169   :  { %v258_v28 = vsel %vm155_vm2, %v253_v24, 0 }
 0x16a   :  { %v154_v22 = vpop.permute.xlu0 %153 }
 0x16b   :  { %v160_v23 = vsel %vm155_vm2, %v154_v22, 0 }
 0x16c   :  { %2288 = vmatpush3.bf16.xpose.msra.mxu1 %v160_v23  ;;  %v302_v27 = vpop.permute.xlu1 %301 }
 0x16d   :  { %2299 = vmatprep.subr.bf16.mxu1 %v2682_v8  ;;  %v307_v29 = vsel %vm155_vm2, %v302_v27, 0 }
 0x16e   :  { %v204_v25 = vpop.permute.xlu0 %203 }
 0x16f   :  { %v209_v26 = vsel %vm155_vm2, %v204_v25, 0 }
 0x170   :  { %2294 = vmatpush3.bf16.xpose.msra.mxu0 %v209_v26  ;;  %v390_v30 = vpop.permute.xlu1 %389 }
 0x171   :  { %2305 = vmatprep.subr.bf16.mxu0 %v2682_v8  ;;  %v396_v31 = vsel %vm394_vm3, %v390_v30, 0 }
 0x173   :  { %2290 = vmatmul.mubr.msk.bf16.vlgmr.msra.gmra.mxu1 %vm155_vm2, %v2756_v16 }
 0x174   :  { %2300 = vmatpush3.bf16.xpose.msra.mxu1 %v258_v28  ;;  %2301 = vmatprep.mubr.msk.bf16.mxu1 %vm2683_vm1, %v2682_v8 }
 0x175   :  { %2311 = vmatprep.subr.bf16.mxu1 %v2682_v8 }
 0x177   :  { %2296 = vmatmul.mubr.msk.bf16.vlgmr.msra.gmra.mxu0 %vm155_vm2, %v2762_v21 }
 0x178   :  { %2306 = vmatpush3.bf16.xpose.msra.mxu0 %v307_v29  ;;  %2307 = vmatprep.mubr.msk.bf16.mxu0 %vm2683_vm1, %v2682_v8 }
 0x179   :  { %2317 = vmatprep.subr.bf16.mxu0 %v2682_v8 }
 0x17b   :  { %2302 = vmatmul.mubr.msk.bf16.vlgmr.msra.gmra.mxu1 %vm155_vm2, %v2754_v13 }
 0x17c   :  { %2312 = vmatpush3.bf16.msra.mxu1 %v396_v31  ;;  %2313 = vmatprep.mubr.msk.bf16.mxu1 %vm2683_vm1, %v2682_v8 }
 0x17d   :  { %2323 = vmatprep.subr.bf16.mxu1 %v2682_v8 }
 0x17f   :  { %2308 = vmatmul.mubr.msk.bf16.vlgmr.msra.gmra.mxu0 %vm155_vm2, %v2759_v19 }
 0x180   :  { %2319 = vmatprep.mubr.msk.bf16.mxu0 %vm2683_vm1, %v2682_v8 }
 0x233   :  { %v196_v32 = vpop.f32.mrf.mxu1 }
 0x234   :  { %v349_v33 = vsel %vm155_vm2, %v196_v32, -inf }
 0x235   :  { %350 = vmax.xlane.f32.xlu0 %v349_v33  ;;  %v2291_v34 = vpop.f32.mrf.mxu1 }
 0x237   :  { %v199_v35 = vpop.f32.mrf.mxu1  ;;  %v245_v36 = vpop.f32.mrf.mxu0 }
 0x238   :  { %v352_v37 = vsel %vm155_vm2, %v245_v36, -inf }
 0x239   :  { %v2292_v38 = vpop.f32.mrf.mxu1  ;;  %353 = vmax.xlane.f32.xlu1 %v352_v37  ;;  %v2297_v39 = vpop.f32.mrf.mxu0 }
 0x23b   :  { %v248_v40 = vpop.f32.mrf.mxu0  ;;  %v294_v41 = vpop.f32.mrf.mxu1 }
 0x23c   :  { %v355_v42 = vsel %vm155_vm2, %v294_v41, -inf }
 0x23d   :  { %356 = vmax.xlane.f32.xlu0 %v355_v42  ;;  %v2298_v43 = vpop.f32.mrf.mxu0  ;;  %v2303_v44 = vpop.f32.mrf.mxu1 }
 0x23f   :  { %v297_v45 = vpop.f32.mrf.mxu1  ;;  %v343_v46 = vpop.f32.mrf.mxu0 }
 0x240   :  { %v358_v47 = vsel %vm155_vm2, %v343_v46, -inf }
 0x241   :  { %v2304_v48 = vpop.f32.mrf.mxu1  ;;  %359 = vmax.xlane.f32.xlu0 %v358_v47  ;;  %v2309_v49 = vpop.f32.mrf.mxu0 }
 0x243   :  { %v346_v50 = vpop.f32.mrf.mxu0 }
 0x245   :  { %v2310_v51 = vpop.f32.mrf.mxu0 }
 0x24a   :  { %486 = vrot.lane.b32.xlu1 %v2754_v13, %s2676_s21 }
 0x24e   :  { %534 = vrot.lane.b32.xlu1 %v2759_v19, %s2676_s21 }
 0x252   :  { %646 = vrot.lane.b32.xlu1 %v2762_v21, %s2685_s2 }
 0x256   :  { %644 = vrot.lane.b32.xlu1 %v2762_v21, %s2686_s12 }
 0x257   :  { %438 = vrot.lane.b32.xlu0 %v2762_v21, %s2676_s21  ;;  %s2695_s21 = smov 24  }
 0x25a   :  { %746 = vrot.lane.b32.xlu1 %v2759_v19, %s2685_s2 }
 0x25b   :  { %596 = vrot.lane.b32.xlu0 %v2756_v16, %s2685_s2 }
 0x25e   :  { %744 = vrot.lane.b32.xlu1 %v2759_v19, %s2686_s12 }
 0x25f   :  { %594 = vrot.lane.b32.xlu0 %v2756_v16, %s2686_s12 }
 0x262   :  { %834 = vrot.lane.b32.xlu1 %v2756_v16, %s2687_s13 }
 0x263   :  { %696 = vrot.lane.b32.xlu0 %v2754_v13, %s2685_s2 }
 0x267   :  { %694 = vrot.lane.b32.xlu0 %v2754_v13, %s2686_s12 }
 0x2be   :  { %v351_v52 = vpop.xlane.xlu0 %350 }
 0x2bf   :  { %v361_v53 = vsub.f32 %v196_v32, %v351_v52 }
 0x2c1   :  { %v365_v54 = vmul.f32 1.442695, %v361_v53 }
 0x2c2   :  { %v354_v55 = vpop.xlane.xlu1 %353 }
 0x2c3   :  { %2513 = vpow2.f32 %v365_v54  ;;  %v362_v56 = vsub.f32 %v245_v36, %v354_v55 }
 0x2c5   :  { %v367_v57 = vmul.f32 1.442695, %v362_v56 }
 0x2c6   :  { %v487_v58 = vpop.permute.xlu1 %486  ;;  %v357_v59 = vpop.xlane.xlu0 %356 }
 0x2c7   :  { %2515 = vpow2.f32 %v367_v57  ;;  %v363_v60 = vsub.f32 %v294_v41, %v357_v59  ;;  %v492_v7 = vsel %vm394_vm3, %v487_v58, 0 }
 0x2c9   :  { %v369_v61 = vmul.f32 1.442695, %v363_v60 }
 0x2ca   :  { %v535_v62 = vpop.permute.xlu1 %534  ;;  %v360_v63 = vpop.xlane.xlu0 %359 }
 0x2cb   :  { %2517 = vpow2.f32 %v369_v61  ;;  %v364_v0 = vsub.f32 %v343_v46, %v360_v63  ;;  %v540_v14 = vsel %vm394_vm3, %v535_v62, 0 }
 0x2cd   :  { %v371_v1 = vmul.f32 1.442695, %v364_v0 }
 0x2ce   :  { %v439_v2 = vpop.permute.xlu0 %438  ;;  %v647_v5 = vpop.permute.xlu1 %646 }
 0x2cf   :  { %2519 = vpow2.f32 %v371_v1  ;;  %v444_v3 = vsel %vm394_vm3, %v439_v2, 0  ;;  %v652_v25 = vsel %vm155_vm2, %v647_v5, 0 }
 0x2d0   :  { %v2815_v4 = vpop.eup %2513  ;;  %2318 = vmatpush3.bf16.msra.mxu0 %v444_v3 }
 0x2d1   :  { %v385_v6 = vpack.c.bf16 %v2815_v4, %v2815_v4  ;;  %2329 = vmatprep.subr.bf16.mxu0 %v2682_v8 }
 0x2d2   :  { %v597_v10 = vpop.permute.xlu0 %596  ;;  %v645_v12 = vpop.permute.xlu1 %644 }
 0x2d3   :  { %2314 = vmatmul.mubr.msk.bf16.vlgmr.msra.gmra.mxu1 %vm155_vm2, %v385_v6  ;;  %v602_v20 = vsel %vm155_vm2, %v597_v10, 0 }
 0x2d4   :  { %v2822_v9 = vpop.eup %2515  ;;  %2324 = vmatpush3.bf16.msra.mxu1 %v492_v7  ;;  %2325 = vmatprep.mubr.msk.bf16.mxu1 %vm2683_vm1, %v2682_v8 }
 0x2d5   :  { %v386_v11 = vpack.c.bf16 %v2822_v9, %v2822_v9  ;;  %2335 = vmatprep.subr.bf16.mxu1 %v2682_v8 }
 0x2d6   :  { %v595_v18 = vpop.permute.xlu0 %594  ;;  %v747_v23 = vpop.permute.xlu1 %746 }
 0x2d7   :  { %2320 = vmatmul.mubr.msk.bf16.vlgmr.msra.gmra.mxu0 %vm155_vm2, %v386_v11  ;;  %v752_v29 = vsel %vm155_vm2, %v747_v23, 0 }
 0x2d8   :  { %v2831_v15 = vpop.eup %2517  ;;  %2330 = vmatpush3.bf16.msra.mxu0 %v540_v14  ;;  %2331 = vmatprep.mubr.msk.bf16.mxu0 %vm2683_vm1, %v2682_v8 }
 0x2d9   :  { %v387_v17 = vpack.c.bf16 %v2831_v15, %v2831_v15  ;;  %2341 = vmatprep.subr.bf16.mxu0 %v2682_v8 }
 0x2da   :  { %v697_v26 = vpop.permute.xlu0 %696  ;;  %v745_v27 = vpop.permute.xlu1 %744 }
 0x2db   :  { %2326 = vmatmul.mubr.msk.bf16.vlgmr.msra.gmra.mxu1 %vm155_vm2, %v387_v17  ;;  %v702_v28 = vsel %vm155_vm2, %v697_v26, 0 }
 0x2dc   :  { %v2840_v22 = vpop.eup %2519  ;;  %2336 = vmatpush3.bf16.xpose.msra.mxu1 %v602_v20  ;;  %2337 = vmatprep.mubr.msk.bf16.mxu1 %vm2683_vm1, %v2682_v8 }
 0x2dd   :  { %v388_v24 = vpack.c.bf16 %v2840_v22, %v2840_v22  ;;  %2347 = vmatprep.subr.bf16.mxu1 %v2682_v8 }
 0x2de   :  { %v835_v30 = vpop.permute.xlu1 %834  ;;  %v695_v31 = vpop.permute.xlu0 %694 }
 0x2df   :  { %2332 = vmatmul.mubr.msk.bf16.vlgmr.msra.gmra.mxu0 %vm155_vm2, %v388_v24  ;;  %v840_v32 = vsel %vm394_vm3, %v835_v30, 0 }
 0x2e0   :  { %2342 = vmatpush3.bf16.xpose.msra.mxu0 %v652_v25  ;;  %2343 = vmatprep.mubr.msk.bf16.mxu0 %vm2683_vm1, %v2682_v8 }
 0x2e1   :  { %2353 = vmatprep.subr.bf16.mxu0 %v2682_v8 }
 0x2e3   :  { %2338 = vmatmul.mubr.msk.bf16.vlgmr.msra.gmra.mxu1 %vm155_vm2, %v595_v18 }
 0x2e4   :  { %2348 = vmatpush3.bf16.xpose.msra.mxu1 %v702_v28  ;;  %2349 = vmatprep.mubr.msk.bf16.mxu1 %vm2683_vm1, %v2682_v8 }
 0x2e5   :  { %2359 = vmatprep.subr.bf16.mxu1 %v2682_v8 }
 0x2e7   :  { %2344 = vmatmul.mubr.msk.bf16.vlgmr.msra.gmra.mxu0 %vm155_vm2, %v645_v12 }
 0x2e8   :  { %2354 = vmatpush3.bf16.xpose.msra.mxu0 %v752_v29  ;;  %2355 = vmatprep.mubr.msk.bf16.mxu0 %vm2683_vm1, %v2682_v8 }
 0x2e9   :  { %2365 = vmatprep.subr.bf16.mxu0 %v2682_v8 }
 0x2eb   :  { %2350 = vmatmul.mubr.msk.bf16.vlgmr.msra.gmra.mxu1 %vm155_vm2, %v695_v31 }
 0x2ec   :  { %2360 = vmatpush3.bf16.msra.mxu1 %v840_v32  ;;  %2361 = vmatprep.mubr.msk.bf16.mxu1 %vm2683_vm1, %v2682_v8 }
 0x2ed   :  { %2371 = vmatprep.subr.bf16.mxu1 %v2682_v8 }
 0x2ef   :  { %2356 = vmatmul.mubr.msk.bf16.vlgmr.msra.gmra.mxu0 %vm155_vm2, %v745_v27 }
 0x2f0   :  { %2367 = vmatprep.mubr.msk.bf16.mxu0 %vm2683_vm1, %v2682_v8 }
 0x393   :  { %v2870_v33 = vpop.f32.mrf.mxu1 }
 0x395   :  { %v2315_v34 = vpop.f32.mrf.mxu1 }
 0x397   :  { %v435_v35 = vpop.f32.mrf.mxu1  ;;  %v2872_v36 = vpop.f32.mrf.mxu0 }
 0x399   :  { %v2316_v37 = vpop.f32.mrf.mxu1  ;;  %v2321_v38 = vpop.f32.mrf.mxu0 }
 0x39b   :  { %v483_v39 = vpop.f32.mrf.mxu0  ;;  %v2874_v40 = vpop.f32.mrf.mxu1 }
 0x39d   :  { %v2322_v41 = vpop.f32.mrf.mxu0  ;;  %v2327_v42 = vpop.f32.mrf.mxu1 }
 0x39f   :  { %v531_v43 = vpop.f32.mrf.mxu1  ;;  %v2876_v44 = vpop.f32.mrf.mxu0 }
 0x3a1   :  { %v2328_v45 = vpop.f32.mrf.mxu1  ;;  %v2333_v46 = vpop.f32.mrf.mxu0 }
 0x3a3   :  { %v579_v47 = vpop.f32.mrf.mxu0  ;;  %v638_v48 = vpop.f32.mrf.mxu1 }
 0x3a4   :  { %v794_v49 = vsel %vm155_vm2, %v638_v48, -inf }
 0x3a5   :  { %v2334_v50 = vpop.f32.mrf.mxu0  ;;  %795 = vmax.xlane.f32.xlu0 %v794_v49  ;;  %v2339_v51 = vpop.f32.mrf.mxu1 }
 0x3a7   :  { %v641_v52 = vpop.f32.mrf.mxu1  ;;  %v688_v53 = vpop.f32.mrf.mxu0 }
 0x3a8   :  { %v797_v54 = vsel %vm155_vm2, %v688_v53, -inf }
 0x3a9   :  { %798 = vmax.xlane.f32.xlu1 %v797_v54  ;;  %v2340_v55 = vpop.f32.mrf.mxu1  ;;  %v2345_v56 = vpop.f32.mrf.mxu0 }
 0x3ab   :  { %v691_v57 = vpop.f32.mrf.mxu0  ;;  %v738_v58 = vpop.f32.mrf.mxu1 }
 0x3ac   :  { %v800_v59 = vsel %vm155_vm2, %v738_v58, -inf }
 0x3ad   :  { %v2346_v60 = vpop.f32.mrf.mxu0  ;;  %801 = vmax.xlane.f32.xlu0 %v800_v59  ;;  %v2351_v61 = vpop.f32.mrf.mxu1 }
 0x3af   :  { %v741_v62 = vpop.f32.mrf.mxu1  ;;  %v788_v63 = vpop.f32.mrf.mxu0 }
 0x3b0   :  { %v803_v0 = vsel %vm155_vm2, %v788_v63, -inf }
 0x3b1   :  { %v2357_v1 = vpop.f32.mrf.mxu0  ;;  %804 = vmax.xlane.f32.xlu0 %v803_v0  ;;  %v2352_v2 = vpop.f32.mrf.mxu1 }
 0x3b3   :  { %v791_v3 = vpop.f32.mrf.mxu0 }
 0x3b5   :  { %v2358_v5 = vpop.f32.mrf.mxu0 }
 0x3ba   :  { %930 = vrot.lane.b32.xlu1 %v2754_v13, %s2687_s13 }
 0x3be   :  { %978 = vrot.lane.b32.xlu1 %v2759_v19, %s2687_s13 }
 0x3c2   :  { %1107 = vrot.lane.b32.xlu1 %v2762_v21, %s2688_s14 }
 0x3c6   :  { %1105 = vrot.lane.b32.xlu1 %v2762_v21, %s2689_s15 }
 0x3c7   :  { %882 = vrot.lane.b32.xlu0 %v2762_v21, %s2687_s13 }
 0x3ca   :  { %1207 = vrot.lane.b32.xlu1 %v2759_v19, %s2688_s14 }
 0x3cb   :  { %1057 = vrot.lane.b32.xlu0 %v2756_v16, %s2688_s14 }
 0x3ce   :  { %1205 = vrot.lane.b32.xlu1 %v2759_v19, %s2689_s15 }
 0x3cf   :  { %1055 = vrot.lane.b32.xlu0 %v2756_v16, %s2689_s15 }
 0x3d2   :  { %1295 = vrot.lane.b32.xlu1 %v2756_v16, %s2690_s16 }
 0x3d3   :  { %1157 = vrot.lane.b32.xlu0 %v2754_v13, %s2688_s14 }
 0x3d7   :  { %1155 = vrot.lane.b32.xlu0 %v2754_v13, %s2689_s15 }
 0x42e   :  { %v796_v6 = vpop.xlane.xlu0 %795 }
 0x42f   :  { %v806_v7 = vsub.f32 %v638_v48, %v796_v6 }
 0x431   :  { %v810_v10 = vmul.f32 1.442695, %v806_v7 }
 0x432   :  { %v799_v11 = vpop.xlane.xlu1 %798 }
 0x433   :  { %2521 = vpow2.f32 %v810_v10  ;;  %v807_v12 = vsub.f32 %v688_v53, %v799_v11 }
 0x435   :  { %v812_v14 = vmul.f32 1.442695, %v807_v12 }
 0x436   :  { %v931_v17 = vpop.permute.xlu1 %930  ;;  %v802_v18 = vpop.xlane.xlu0 %801 }
 0x437   :  { %2523 = vpow2.f32 %v812_v14  ;;  %v808_v20 = vsub.f32 %v738_v58, %v802_v18  ;;  %v936_v34 = vsel %vm394_vm3, %v931_v17, 0 }
 0x439   :  { %v814_v23 = vmul.f32 1.442695, %v808_v20 }
 0x43a   :  { %v979_v24 = vpop.permute.xlu1 %978  ;;  %v805_v25 = vpop.xlane.xlu0 %804 }
 0x43b   :  { %2525 = vpow2.f32 %v814_v23  ;;  %v809_v26 = vsub.f32 %v788_v63, %v805_v25  ;;  %v984_v41 = vsel %vm394_vm3, %v979_v24, 0 }
 0x43d   :  { %v816_v27 = vmul.f32 1.442695, %v809_v26 }
 0x43e   :  { %v883_v28 = vpop.permute.xlu0 %882  ;;  %v1108_v31 = vpop.permute.xlu1 %1107 }
 0x43f   :  { %2527 = vpow2.f32 %v816_v27  ;;  %v888_v29 = vsel %vm394_vm3, %v883_v28, 0  ;;  %v1113_v50 = vsel %vm155_vm2, %v1108_v31, 0 }
 0x440   :  { %v2899_v30 = vpop.eup %2521  ;;  %2366 = vmatpush3.bf16.msra.mxu0 %v888_v29 }
 0x441   :  { %v830_v32 = vpack.c.bf16 %v2899_v30, %v2899_v30  ;;  %2377 = vmatprep.subr.bf16.mxu0 %v2682_v8 }
 0x442   :  { %v1058_v37 = vpop.permute.xlu0 %1057  ;;  %v1106_v39 = vpop.permute.xlu1 %1105 }
 0x443   :  { %2362 = vmatmul.mubr.msk.bf16.vlgmr.msra.gmra.mxu1 %vm155_vm2, %v830_v32  ;;  %v1063_v46 = vsel %vm155_vm2, %v1058_v37, 0 }
 0x444   :  { %v2906_v35 = vpop.eup %2523  ;;  %2372 = vmatpush3.bf16.msra.mxu1 %v936_v34  ;;  %2373 = vmatprep.mubr.msk.bf16.mxu1 %vm2683_vm1, %v2682_v8 }
 0x445   :  { %v831_v38 = vpack.c.bf16 %v2906_v35, %v2906_v35  ;;  %2383 = vmatprep.subr.bf16.mxu1 %v2682_v8 }
 0x446   :  { %v1056_v45 = vpop.permute.xlu0 %1055  ;;  %v1208_v48 = vpop.permute.xlu1 %1207 }
 0x447   :  { %2368 = vmatmul.mubr.msk.bf16.vlgmr.msra.gmra.mxu0 %vm155_vm2, %v831_v38  ;;  %v1213_v54 = vsel %vm155_vm2, %v1208_v48, 0 }
 0x448   :  { %v2915_v42 = vpop.eup %2525  ;;  %2378 = vmatpush3.bf16.msra.mxu0 %v984_v41  ;;  %2379 = vmatprep.mubr.msk.bf16.mxu0 %vm2683_vm1, %v2682_v8 }
 0x449   :  { %v832_v43 = vpack.c.bf16 %v2915_v42, %v2915_v42  ;;  %2389 = vmatprep.subr.bf16.mxu0 %v2682_v8 }
 0x44a   :  { %v1158_v51 = vpop.permute.xlu0 %1157  ;;  %v1206_v52 = vpop.permute.xlu1 %1205 }
 0x44b   :  { %2374 = vmatmul.mubr.msk.bf16.vlgmr.msra.gmra.mxu1 %vm155_vm2, %v832_v43  ;;  %v1163_v53 = vsel %vm155_vm2, %v1158_v51, 0 }
 0x44c   :  { %v2924_v47 = vpop.eup %2527  ;;  %2384 = vmatpush3.bf16.xpose.msra.mxu1 %v1063_v46  ;;  %2385 = vmatprep.mubr.msk.bf16.mxu1 %vm2683_vm1, %v2682_v8 }
 0x44d   :  { %v833_v49 = vpack.c.bf16 %v2924_v47, %v2924_v47  ;;  %2395 = vmatprep.subr.bf16.mxu1 %v2682_v8 }
 0x44e   :  { %v1296_v55 = vpop.permute.xlu1 %1295  ;;  %v1156_v56 = vpop.permute.xlu0 %1155 }
 0x44f   :  { %2380 = vmatmul.mubr.msk.bf16.vlgmr.msra.gmra.mxu0 %vm155_vm2, %v833_v49  ;;  %v1301_v57 = vsel %vm394_vm3, %v1296_v55, 0 }
 0x450   :  { %2390 = vmatpush3.bf16.xpose.msra.mxu0 %v1113_v50  ;;  %2391 = vmatprep.mubr.msk.bf16.mxu0 %vm2683_vm1, %v2682_v8 }
 0x451   :  { %2401 = vmatprep.subr.bf16.mxu0 %v2682_v8 }
 0x453   :  { %2386 = vmatmul.mubr.msk.bf16.vlgmr.msra.gmra.mxu1 %vm155_vm2, %v1056_v45 }
 0x454   :  { %2396 = vmatpush3.bf16.xpose.msra.mxu1 %v1163_v53  ;;  %2397 = vmatprep.mubr.msk.bf16.mxu1 %vm2683_vm1, %v2682_v8 }
 0x455   :  { %2407 = vmatprep.subr.bf16.mxu1 %v2682_v8 }
 0x457   :  { %2392 = vmatmul.mubr.msk.bf16.vlgmr.msra.gmra.mxu0 %vm155_vm2, %v1106_v39 }
 0x458   :  { %2402 = vmatpush3.bf16.xpose.msra.mxu0 %v1213_v54  ;;  %2403 = vmatprep.mubr.msk.bf16.mxu0 %vm2683_vm1, %v2682_v8 }
 0x459   :  { %2413 = vmatprep.subr.bf16.mxu0 %v2682_v8 }
 0x45b   :  { %2398 = vmatmul.mubr.msk.bf16.vlgmr.msra.gmra.mxu1 %vm155_vm2, %v1156_v56 }
 0x45c   :  { %2408 = vmatpush3.bf16.msra.mxu1 %v1301_v57  ;;  %2409 = vmatprep.mubr.msk.bf16.mxu1 %vm2683_vm1, %v2682_v8 }
 0x45d   :  { %2419 = vmatprep.subr.bf16.mxu1 %v2682_v8 }
 0x45f   :  { %2404 = vmatmul.mubr.msk.bf16.vlgmr.msra.gmra.mxu0 %vm155_vm2, %v1206_v52 }
 0x460   :  { %2415 = vmatprep.mubr.msk.bf16.mxu0 %vm2683_vm1, %v2682_v8 }
 0x503   :  { %v2954_v58 = vpop.f32.mrf.mxu1 }
 0x505   :  { %v2363_v59 = vpop.f32.mrf.mxu1 }
 0x507   :  { %v879_v60 = vpop.f32.mrf.mxu1  ;;  %v2956_v61 = vpop.f32.mrf.mxu0 }
 0x509   :  { %v2364_v62 = vpop.f32.mrf.mxu1  ;;  %v2369_v63 = vpop.f32.mrf.mxu0 }
 0x50b   :  { %v927_v0 = vpop.f32.mrf.mxu0  ;;  %v2958_v1 = vpop.f32.mrf.mxu1 }
 0x50d   :  { %v2370_v2 = vpop.f32.mrf.mxu0  ;;  %v2375_v3 = vpop.f32.mrf.mxu1 }
 0x50f   :  { %v975_v5 = vpop.f32.mrf.mxu1  ;;  %v2960_v6 = vpop.f32.mrf.mxu0 }
 0x511   :  { %v2376_v7 = vpop.f32.mrf.mxu1  ;;  %v2381_v10 = vpop.f32.mrf.mxu0 }
 0x513   :  { %v1023_v11 = vpop.f32.mrf.mxu0  ;;  %v1099_v12 = vpop.f32.mrf.mxu1 }
 0x514   :  { %v1255_v14 = vsel %vm155_vm2, %v1099_v12, -inf }
 0x515   :  { %v2382_v17 = vpop.f32.mrf.mxu0  ;;  %1256 = vmax.xlane.f32.xlu0 %v1255_v14  ;;  %v2387_v18 = vpop.f32.mrf.mxu1 }
 0x517   :  { %v1102_v20 = vpop.f32.mrf.mxu1  ;;  %v1149_v23 = vpop.f32.mrf.mxu0 }
 0x518   :  { %v1258_v24 = vsel %vm155_vm2, %v1149_v23, -inf }
 0x519   :  { %1259 = vmax.xlane.f32.xlu1 %v1258_v24  ;;  %v2388_v25 = vpop.f32.mrf.mxu1  ;;  %v2393_v26 = vpop.f32.mrf.mxu0 }
 0x51b   :  { %v1152_v27 = vpop.f32.mrf.mxu0  ;;  %v1199_v28 = vpop.f32.mrf.mxu1 }
 0x51c   :  { %v1261_v29 = vsel %vm155_vm2, %v1199_v28, -inf }
 0x51d   :  { %v2394_v31 = vpop.f32.mrf.mxu0  ;;  %1262 = vmax.xlane.f32.xlu0 %v1261_v29  ;;  %v2399_v32 = vpop.f32.mrf.mxu1 }
 0x51f   :  { %v1202_v34 = vpop.f32.mrf.mxu1  ;;  %v1249_v37 = vpop.f32.mrf.mxu0 }
 0x520   :  { %v1264_v38 = vsel %vm155_vm2, %v1249_v37, -inf }
 0x521   :  { %v2405_v39 = vpop.f32.mrf.mxu0  ;;  %1265 = vmax.xlane.f32.xlu0 %v1264_v38  ;;  %v2400_v41 = vpop.f32.mrf.mxu1 }
 0x523   :  { %v1252_v43 = vpop.f32.mrf.mxu0 }
 0x525   :  { %v2406_v45 = vpop.f32.mrf.mxu0 }
 0x52a   :  { %1391 = vrot.lane.b32.xlu1 %v2754_v13, %s2690_s16 }
 0x52e   :  { %1439 = vrot.lane.b32.xlu1 %v2759_v19, %s2690_s16 }
 0x532   :  { %1568 = vrot.lane.b32.xlu1 %v2762_v21, %s2691_s17 }
 0x536   :  { %1566 = vrot.lane.b32.xlu1 %v2762_v21, %s2692_s18 }
 0x537   :  { %1343 = vrot.lane.b32.xlu0 %v2762_v21, %s2690_s16 }
 0x53a   :  { %1668 = vrot.lane.b32.xlu1 %v2759_v19, %s2691_s17 }
 0x53b   :  { %1518 = vrot.lane.b32.xlu0 %v2756_v16, %s2691_s17 }
 0x53e   :  { %1666 = vrot.lane.b32.xlu1 %v2759_v19, %s2692_s18 }
 0x53f   :  { %1516 = vrot.lane.b32.xlu0 %v2756_v16, %s2692_s18 }
 0x542   :  { %1756 = vrot.lane.b32.xlu1 %v2756_v16, %s2693_s19 }
 0x543   :  { %1618 = vrot.lane.b32.xlu0 %v2754_v13, %s2691_s17 }
 0x547   :  { %1616 = vrot.lane.b32.xlu0 %v2754_v13, %s2692_s18 }
 0x59e   :  { %v1257_v46 = vpop.xlane.xlu0 %1256 }
 0x59f   :  { %v1267_v48 = vsub.f32 %v1099_v12, %v1257_v46 }
 0x5a1   :  { %v1271_v49 = vmul.f32 1.442695, %v1267_v48 }
 0x5a2   :  { %v1260_v50 = vpop.xlane.xlu1 %1259 }
 0x5a3   :  { %2529 = vpow2.f32 %v1271_v49  ;;  %v1268_v51 = vsub.f32 %v1149_v23, %v1260_v50 }
 0x5a5   :  { %v1273_v52 = vmul.f32 1.442695, %v1268_v51 }
 0x5a6   :  { %v1392_v53 = vpop.permute.xlu1 %1391  ;;  %v1263_v54 = vpop.xlane.xlu0 %1262 }
 0x5a7   :  { %2531 = vpow2.f32 %v1273_v52  ;;  %v1269_v55 = vsub.f32 %v1199_v28, %v1263_v54  ;;  %v1397_v5 = vsel %vm394_vm3, %v1392_v53, 0 }
 0x5a9   :  { %v1275_v56 = vmul.f32 1.442695, %v1269_v55 }
 0x5aa   :  { %v1440_v57 = vpop.permute.xlu1 %1439  ;;  %v1266_v59 = vpop.xlane.xlu0 %1265 }
 0x5ab   :  { %2533 = vpow2.f32 %v1275_v56  ;;  %v1270_v16 = vsub.f32 %v1249_v37, %v1266_v59  ;;  %v1445_v14 = vsel %vm394_vm3, %v1440_v57, 0 }
 0x5ad   :  { %v1277_v60 = vmul.f32 1.442695, %v1270_v16 }
 0x5ae   :  { %v1344_v62 = vpop.permute.xlu0 %1343  ;;  %v1569_v2 = vpop.permute.xlu1 %1568 }
 0x5af   :  { %2535 = vpow2.f32 %v1277_v60  ;;  %v1349_v63 = vsel %vm394_vm3, %v1344_v62, 0  ;;  %v1574_v27 = vsel %vm155_vm2, %v1569_v2, 0 }
 0x5b0   :  { %v2983_v0 = vpop.eup %2529  ;;  %2414 = vmatpush3.bf16.msra.mxu0 %v1349_v63 }
 0x5b1   :  { %v1291_v3 = vpack.c.bf16 %v2983_v0, %v2983_v0  ;;  %2425 = vmatprep.subr.bf16.mxu0 %v2682_v8 }
 0x5b2   :  { %v1519_v10 = vpop.permute.xlu0 %1518  ;;  %v1567_v12 = vpop.permute.xlu1 %1566 }
 0x5b3   :  { %2410 = vmatmul.mubr.msk.bf16.vlgmr.msra.gmra.mxu1 %vm155_vm2, %v1291_v3  ;;  %v1524_v23 = vsel %vm155_vm2, %v1519_v10, 0 }
 0x5b4   :  { %v2990_v7 = vpop.eup %2531  ;;  %2420 = vmatpush3.bf16.msra.mxu1 %v1397_v5  ;;  %2421 = vmatprep.mubr.msk.bf16.mxu1 %vm2683_vm1, %v2682_v8 }
 0x5b5   :  { %v1292_v11 = vpack.c.bf16 %v2990_v7, %v2990_v7  ;;  %2431 = vmatprep.subr.bf16.mxu1 %v2682_v8 }
 0x5b6   :  { %v1517_v20 = vpop.permute.xlu0 %1516  ;;  %v1669_v25 = vpop.permute.xlu1 %1668 }
 0x5b7   :  { %2416 = vmatmul.mubr.msk.bf16.vlgmr.msra.gmra.mxu0 %vm155_vm2, %v1292_v11  ;;  %v1674_v32 = vsel %vm155_vm2, %v1669_v25, 0 }
 0x5b8   :  { %v2999_v17 = vpop.eup %2533  ;;  %2426 = vmatpush3.bf16.msra.mxu0 %v1445_v14  ;;  %2427 = vmatprep.mubr.msk.bf16.mxu0 %vm2683_vm1, %v2682_v8 }
 0x5b9   :  { %v1293_v18 = vpack.c.bf16 %v2999_v17, %v2999_v17  ;;  %2437 = vmatprep.subr.bf16.mxu0 %v2682_v8 }
 0x5ba   :  { %v1619_v28 = vpop.permute.xlu0 %1618  ;;  %v1667_v29 = vpop.permute.xlu1 %1666 }
 0x5bb   :  { %2422 = vmatmul.mubr.msk.bf16.vlgmr.msra.gmra.mxu1 %vm155_vm2, %v1293_v18  ;;  %v1624_v31 = vsel %vm155_vm2, %v1619_v28, 0 }
 0x5bc   :  { %v3008_v24 = vpop.eup %2535  ;;  %2432 = vmatpush3.bf16.xpose.msra.mxu1 %v1524_v23  ;;  %2433 = vmatprep.mubr.msk.bf16.mxu1 %vm2683_vm1, %v2682_v8 }
 0x5bd   :  { %v1294_v26 = vpack.c.bf16 %v3008_v24, %v3008_v24  ;;  %2443 = vmatprep.subr.bf16.mxu1 %v2682_v8 }
 0x5be   :  { %v1757_v34 = vpop.permute.xlu1 %1756  ;;  %v1617_v37 = vpop.permute.xlu0 %1616 }
 0x5bf   :  { %2428 = vmatmul.mubr.msk.bf16.vlgmr.msra.gmra.mxu0 %vm155_vm2, %v1294_v26  ;;  %v1762_v38 = vsel %vm394_vm3, %v1757_v34, 0  ;;  %v1279_v34 = vsel %vm155_vm2, %v2983_v0, 0.0 }
 0x5c0   :  { %2438 = vmatpush3.bf16.xpose.msra.mxu0 %v1574_v27  ;;  %2439 = vmatprep.mubr.msk.bf16.mxu0 %vm2683_vm1, %v2682_v8 }
 0x5c1   :  { %2449 = vmatprep.subr.bf16.mxu0 %v2682_v8 }
 0x5c3   :  { %2434 = vmatmul.mubr.msk.bf16.vlgmr.msra.gmra.mxu1 %vm155_vm2, %v1517_v20 }
 0x5c4   :  { %2444 = vmatpush3.bf16.xpose.msra.mxu1 %v1624_v31  ;;  %2445 = vmatprep.mubr.msk.bf16.mxu1 %vm2683_vm1, %v2682_v8 }
 0x5c5   :  { %2455 = vmatprep.subr.bf16.mxu1 %v2682_v8 }
 0x5c7   :  { %2440 = vmatmul.mubr.msk.bf16.vlgmr.msra.gmra.mxu0 %vm155_vm2, %v1567_v12 }
 0x5c8   :  { %2450 = vmatpush3.bf16.xpose.msra.mxu0 %v1674_v32  ;;  %2451 = vmatprep.mubr.msk.bf16.mxu0 %vm2683_vm1, %v2682_v8  ;;  %v821_v32 = vsel %vm155_vm2, %v2906_v35, 0.0  ;;  %v1282_v35 = vsel %vm155_vm2, %v2990_v7, 0.0 }
 0x5c9   :  { %2461 = vmatprep.subr.bf16.mxu0 %v2682_v8 }
 0x5cb   :  { %2446 = vmatmul.mubr.msk.bf16.vlgmr.msra.gmra.mxu1 %vm155_vm2, %v1617_v37  ;;  %v818_v37 = vsel %vm155_vm2, %v2899_v30, 0.0  ;;  %v1288_v30 = vsel %vm155_vm2, %v3008_v24, 0.0 }
 0x5cc   :  { %2456 = vmatpush3.bf16.msra.mxu1 %v1762_v38  ;;  %2457 = vmatprep.mubr.msk.bf16.mxu1 %vm2683_vm1, %v2682_v8 }
 0x5cd   :  { %2467 = vmatprep.subr.bf16.mxu1 %v2682_v8 }
 0x5cf   :  { %2452 = vmatmul.mubr.msk.bf16.vlgmr.msra.gmra.mxu0 %vm155_vm2, %v1667_v29 }
 0x5d0   :  { %2463 = vmatprep.mubr.msk.bf16.mxu0 %vm2683_vm1, %v2682_v8 }
 0x673   :  { %v3038_v39 = vpop.f32.mrf.mxu1 }
 0x675   :  { %v2411_v41 = vpop.f32.mrf.mxu1 }
 0x677   :  { %v1340_v43 = vpop.f32.mrf.mxu1  ;;  %v3040_v45 = vpop.f32.mrf.mxu0 }
 0x679   :  { %v2412_v46 = vpop.f32.mrf.mxu1  ;;  %v2417_v48 = vpop.f32.mrf.mxu0 }
 0x67b   :  { %v1388_v49 = vpop.f32.mrf.mxu0  ;;  %v3042_v50 = vpop.f32.mrf.mxu1 }
 0x67d   :  { %v2418_v51 = vpop.f32.mrf.mxu0  ;;  %v2423_v52 = vpop.f32.mrf.mxu1 }
 0x67f   :  { %v1436_v53 = vpop.f32.mrf.mxu1  ;;  %v3044_v54 = vpop.f32.mrf.mxu0 }
 0x681   :  { %v2424_v55 = vpop.f32.mrf.mxu1  ;;  %v2429_v56 = vpop.f32.mrf.mxu0 }
 0x683   :  { %v1484_v57 = vpop.f32.mrf.mxu0  ;;  %v1560_v59 = vpop.f32.mrf.mxu1 }
 0x684   :  { %v1716_v16 = vsel %vm155_vm2, %v1560_v59, -inf }
 0x685   :  { %v2430_v60 = vpop.f32.mrf.mxu0  ;;  %1717 = vmax.xlane.f32.xlu0 %v1716_v16  ;;  %v2435_v62 = vpop.f32.mrf.mxu1 }
 0x687   :  { %v1563_v63 = vpop.f32.mrf.mxu1  ;;  %v1610_v2 = vpop.f32.mrf.mxu0 }
 0x688   :  { %v1719_v3 = vsel %vm155_vm2, %v1610_v2, -inf }
 0x689   :  { %1720 = vmax.xlane.f32.xlu1 %v1719_v3  ;;  %v2436_v5 = vpop.f32.mrf.mxu1  ;;  %v2441_v10 = vpop.f32.mrf.mxu0 }
 0x68b   :  { %v1613_v11 = vpop.f32.mrf.mxu0  ;;  %v1660_v12 = vpop.f32.mrf.mxu1 }
 0x68c   :  { %v1722_v14 = vsel %vm155_vm2, %v1660_v12, -inf }
 0x68d   :  { %v2442_v18 = vpop.f32.mrf.mxu0  ;;  %1723 = vmax.xlane.f32.xlu0 %v1722_v14  ;;  %v2447_v20 = vpop.f32.mrf.mxu1 }
 0x68e   :  { %v376_v20 = vsel %vm155_vm2, %v2822_v9, 0.0 }
 0x68f   :  { %v1663_v23 = vpop.f32.mrf.mxu1  ;;  %v1710_v25 = vpop.f32.mrf.mxu0 }
 0x690   :  { %v1725_v26 = vsel %vm155_vm2, %v1710_v25, -inf  ;;  %v382_v23 = vsel %vm155_vm2, %v2840_v22, 0.0 }
 0x691   :  { %v2453_v27 = vpop.f32.mrf.mxu0  ;;  %1726 = vmax.xlane.f32.xlu0 %v1725_v26  ;;  %v2448_v28 = vpop.f32.mrf.mxu1 }
 0x693   :  { %v1713_v29 = vpop.f32.mrf.mxu0 }
 0x695   :  { %v2454_v31 = vpop.f32.mrf.mxu0 }
 0x69a   :  { %1852 = vrot.lane.b32.xlu1 %v2754_v13, %s2693_s19  ;;  %v1285_v13 = vsel %vm155_vm2, %v2999_v17, 0.0 }
 0x69e   :  { %1900 = vrot.lane.b32.xlu1 %v2759_v19, %s2693_s19  ;;  %v824_v19 = vsel %vm155_vm2, %v2915_v42, 0.0 }
 0x6a7   :  { %1804 = vrot.lane.b32.xlu0 %v2762_v21, %s2693_s19  ;;  %v827_v21 = vsel %vm155_vm2, %v2924_v47, 0.0 }
 0x6c2   :  { %822 = vadd.xlane.f32.xlu1 %v821_v32 }
 0x6c6   :  { %1280 = vadd.xlane.f32.xlu1 %v1279_v34  ;;  %819 = vadd.xlane.f32.xlu0 %v818_v37 }
 0x6ca   :  { %1286 = vadd.xlane.f32.xlu1 %v1285_v13  ;;  %825 = vadd.xlane.f32.xlu0 %v824_v19 }
 0x6ce   :  { %828 = vadd.xlane.f32.xlu0 %v827_v21 }
 0x6d2   :  { %1283 = vadd.xlane.f32.xlu0 %v1282_v35 }
 0x6d6   :  { %1289 = vadd.xlane.f32.xlu0 %v1288_v30 }
 0x70e   :  { %v1718_v0 = vpop.xlane.xlu0 %1717 }
 0x70f   :  { %v1728_v38 = vsub.f32 %v1560_v59, %v1718_v0 }
 0x711   :  { %v1732_v17 = vmul.f32 1.442695, %v1728_v38 }
 0x712   :  { %v1721_v41 = vpop.xlane.xlu1 %1720 }
 0x713   :  { %2537 = vpow2.f32 %v1732_v17  ;;  %v1729_v42 = vsub.f32 %v1610_v2, %v1721_v41 }
 0x715   :  { %v1734_v43 = vmul.f32 1.442695, %v1729_v42 }
 0x716   :  { %v1724_v46 = vpop.xlane.xlu0 %1723  ;;  %v1853_v52 = vpop.permute.xlu1 %1852 }
 0x717   :  { %2539 = vpow2.f32 %v1734_v43  ;;  %v1730_v48 = vsub.f32 %v1660_v12, %v1724_v46  ;;  %v1858_v59 = vsel %vm394_vm3, %v1853_v52, 0  ;;  %v373_v12 = vsel %vm155_vm2, %v2815_v4, 0.0 }
 0x719   :  { %v1736_v47 = vmul.f32 1.442695, %v1730_v48 }
 0x71a   :  { %v1727_v49 = vpop.xlane.xlu0 %1726  ;;  %v1901_v60 = vpop.permute.xlu1 %1900 }
 0x71b   :  { %2541 = vpow2.f32 %v1736_v47  ;;  %v1731_v51 = vsub.f32 %v1710_v25, %v1727_v49  ;;  %v1906_v2 = vsel %vm394_vm3, %v1901_v60, 0 }
 0x71d   :  { %v1738_v7 = vmul.f32 1.442695, %v1731_v51 }
 0x71e   :  { %v1805_v53 = vpop.permute.xlu0 %1804 }
 0x71f   :  { %2543 = vpow2.f32 %v1738_v7  ;;  %v1810_v24 = vsel %vm394_vm3, %v1805_v53, 0 }
 0x720   :  { %v2538_v55 = vpop.eup %2537  ;;  %2462 = vmatpush3.bf16.msra.mxu0 %v1810_v24 }
 0x721   :  { %v1740_v56 = vsel %vm155_vm2, %v2538_v55, 0.0  ;;  %v1752_v57 = vpack.c.bf16 %v2538_v55, %v2538_v55  ;;  %2473 = vmatprep.subr.bf16.mxu0 %v2682_v8 }
 0x722   :  { %1741 = vadd.xlane.f32.xlu1 %v1740_v56 }
 0x723   :  { %2458 = vmatmul.mubr.msk.bf16.vlgmr.msra.gmra.mxu1 %vm155_vm2, %v1752_v57 }
 0x724   :  { %v2540_v16 = vpop.eup %2539  ;;  %2468 = vmatpush3.bf16.msra.mxu1 %v1858_v59  ;;  %2469 = vmatprep.mubr.msk.bf16.mxu1 %vm2683_vm1, %v2682_v8 }
 0x725   :  { %v1743_v62 = vsel %vm155_vm2, %v2540_v16, 0.0  ;;  %v1753_v63 = vpack.c.bf16 %v2540_v16, %v2540_v16 }
 0x726   :  { %1744 = vadd.xlane.f32.xlu0 %v1743_v62 }
 0x727   :  { %2464 = vmatmul.mubr.msk.bf16.vlgmr.msra.gmra.mxu0 %vm155_vm2, %v1753_v63  ;;  %v2511_v63 = vld [vmem:[#allocation8 + $0x8] sm:$0xff]  }
 0x728   :  { %v2542_v3 = vpop.eup %2541  ;;  %2474 = vmatpush3.bf16.msra.mxu0 %v1906_v2  ;;  %2475 = vmatprep.mubr.msk.bf16.mxu0 %vm2683_vm1, %v2682_v8  ;;  %v379_v8 = vsel %vm155_vm2, %v2831_v15, 0.0 }
 0x729   :  { %v1746_v5 = vsel %vm155_vm2, %v2542_v3, 0.0  ;;  %v1754_v10 = vpack.c.bf16 %v2542_v3, %v2542_v3  ;;  %2479 = vmatprep.subr.bf16.mxu1 %v2511_v63 }
 0x72a   :  { %1747 = vadd.xlane.f32.xlu1 %v1746_v5 }
 0x72b   :  { %2470 = vmatmul.mubr.msk.bf16.vlgmr.msra.gmra.mxu1 %vm155_vm2, %v1754_v10  ;;  %v2512_v10 = vld [vmem:[#allocation8] sm:$0xff]  }
 0x72c   :  { %v2544_v11 = vpop.eup %2543  ;;  %2480 = vmatpush3.bf16.msra.mxu1 %v2511_v63 }
 0x72d   :  { %v1749_v14 = vsel %vm155_vm2, %v2544_v11, 0.0  ;;  %v1755_v18 = vpack.c.bf16 %v2544_v11, %v2544_v11  ;;  %2481 = vmatprep.subr.bf16.mxu1 %v2512_v10 }
 0x72e   :  { %374 = vadd.xlane.f32.xlu1 %v373_v12  ;;  %1750 = vadd.xlane.f32.xlu0 %v1749_v14 }
 0x72f   :  { %2476 = vmatmul.mubr.msk.bf16.vlgmr.msra.gmra.mxu0 %vm155_vm2, %v1755_v18 }
 0x730   :  { %2482 = vmatpush3.bf16.msra.mxu1 %v2512_v10 }
 0x732   :  { %380 = vadd.xlane.f32.xlu1 %v379_v8  ;;  %377 = vadd.xlane.f32.xlu0 %v376_v20 }
 0x736   :  { %383 = vadd.xlane.f32.xlu0 %v382_v23 }
 0x74b   :  { %v823_v4 = vpop.xlane.xlu1 %822 }
 0x74c   :  { %2545 = vrcp.f32 %v823_v4 }
 0x74f   :  { %v1281_v25 = vpop.xlane.xlu1 %1280  ;;  %v820_v26 = vpop.xlane.xlu0 %819 }
 0x750   :  { %2547 = vrcp.f32 %v1281_v25 }
 0x751   :  { %2549 = vrcp.f32 %v820_v26 }
 0x753   :  { %v1287_v27 = vpop.xlane.xlu1 %1286  ;;  %v826_v28 = vpop.xlane.xlu0 %825 }
 0x754   :  { %2551 = vrcp.f32 %v1287_v27 }
 0x755   :  { %2553 = vrcp.f32 %v826_v28 }
 0x757   :  { %v829_v15 = vpop.xlane.xlu0 %828 }
 0x758   :  { %2555 = vrcp.f32 %v829_v15 }
 0x759   :  { %v2546_v29 = vpop.eup %2545 }
 0x75a   :  { %v1029_v9 = vmul.f32 %v2546_v29, %v2956_v61 }
 0x75b   :  { %v1284_v31 = vpop.xlane.xlu0 %1283 }
 0x75c   :  { %2557 = vrcp.f32 %v1284_v31  ;;  %1040 = vrot.lane.b32.xlu0 %v1029_v9, %s2680_s29 }
 0x75d   :  { %v2548_v22 = vpop.eup %2547 }
 0x75e   :  { %v2550_v32 = vpop.eup %2549  ;;  %v1488_v34 = vmul.f32 %v2548_v22, %v3038_v39 }
 0x75f   :  { %v1290_v37 = vpop.xlane.xlu0 %1289  ;;  %v1027_v13 = vmul.f32 %v2550_v32, %v2954_v58 }
 0x760   :  { %2559 = vrcp.f32 %v1290_v37  ;;  %1499 = vrot.lane.b32.xlu0 %v1488_v34, %s2694_s20 }
 0x761   :  { %v2552_v19 = vpop.eup %2551  ;;  %1038 = vrot.lane.b32.xlu1 %v1027_v13, %s2680_s29 }
 0x762   :  { %v2554_v21 = vpop.eup %2553  ;;  %v1492_v61 = vmul.f32 %v2552_v19, %v3042_v50 }
 0x763   :  { %v1031_v35 = vmul.f32 %v2554_v21, %v2958_v1 }
 0x764   :  { %1503 = vrot.lane.b32.xlu0 %v1492_v61, %s2694_s20 }
 0x765   :  { %v2556_v30 = vpop.eup %2555  ;;  %1042 = vrot.lane.b32.xlu1 %v1031_v35, %s2680_s29 }
 0x766   :  { %v1033_v39 = vmul.f32 %v2556_v30, %v2960_v6 }
 0x769   :  { %v2558_v0 = vpop.eup %2557  ;;  %1044 = vrot.lane.b32.xlu1 %v1033_v39, %s2680_s29 }
 0x76a   :  { %v1490_v58 = vmul.f32 %v2558_v0, %v3040_v45  ;;  %v2200_v0 = vld [vmem:[%s3181_s4] ss:$0 sm:$0xff] }
 0x76d   :  { %v2560_v38 = vpop.eup %2559  ;;  %1501 = vrot.lane.b32.xlu1 %v1490_v58, %s2694_s20 }
 0x76e   :  { %v1494_v17 = vmul.f32 %v2560_v38, %v3044_v54 }
 0x771   :  { %1505 = vrot.lane.b32.xlu1 %v1494_v17, %s2694_s20 }
 0x7ab   :  { %v1742_v41 = vpop.xlane.xlu1 %1741 }
 0x7af   :  { %v1745_v50 = vpop.xlane.xlu0 %1744 }
 0x7b3   :  { %v1748_v42 = vpop.xlane.xlu1 %1747 }
 0x7b7   :  { %v375_v1 = vpop.xlane.xlu1 %374  ;;  %v1751_v43 = vpop.xlane.xlu0 %1750 }
 0x7b8   :  { %2561 = vrcp.f32 %v375_v1 }
 0x7bb   :  { %v381_v46 = vpop.xlane.xlu1 %380  ;;  %v378_v48 = vpop.xlane.xlu0 %377 }
 0x7bc   :  { %2563 = vrcp.f32 %v381_v46 }
 0x7bd   :  { %2565 = vrcp.f32 %v378_v48 }
 0x7bf   :  { %v384_v6 = vpop.xlane.xlu0 %383 }
 0x7c0   :  { %2567 = vrcp.f32 %v384_v6 }
 0x7c1   :  { %2569 = vrcp.f32 %v1742_v41  ;;  %v2585_v41 = vld [vmem:[#allocation3 + $0x10] sm:$0xff] }
 0x7c2   :  { %2571 = vrcp.f32 %v1745_v50 }
 0x7c3   :  { %2573 = vrcp.f32 %v1748_v42 }
 0x7c4   :  { %2575 = vrcp.f32 %v1751_v43  ;;  %v2586_v43 = vld [vmem:[#allocation3] sm:$0xff] }
 0x7c5   :  { %v2562_v47 = vpop.eup %2561 }
 0x7c6   :  { %v583_v45 = vmul.f32 %v2562_v47, %v2870_v33 }
 0x7c8   :  { %590 = vst.msk [vmem:[#allocation2] sm:$0xff] %vm155_vm2, %v583_v45 }
 0x7c9   :  { %v2564_v49 = vpop.eup %2563 }
 0x7ca   :  { %v2566_v54 = vpop.eup %2565  ;;  %v587_v51 = vmul.f32 %v2564_v49, %v2874_v40 }
 0x7cb   :  { %v585_v7 = vmul.f32 %v2566_v54, %v2872_v36  ;;  %v2587_v54 = vld [vmem:[#allocation3 + $0x18] sm:$0xff] }
 0x7cc   :  { %592 = vst.msk [vmem:[#allocation2 + $0x10] sm:$0xff] %vm155_vm2, %v587_v51 }
 0x7cd   :  { %v2568_v52 = vpop.eup %2567  ;;  %591 = vst.msk [vmem:[#allocation2 + $0x8] sm:$0xff] %vm155_vm2, %v585_v7  ;;  %v2588_v7 = vld [vmem:[#allocation3 + $0x8] sm:$0xff] }
 0x7ce   :  { %v1041_v53 = vpop.permute.xlu0 %1040  ;;  %v589_v24 = vmul.f32 %v2568_v52, %v2876_v44  ;;  %v2570_v57 = vpop.eup %2569 }
 0x7cf   :  { %1052 = vst.msk [vmem:[#allocation2 + $0x8] sm:$0xff] %vm1050_vm4, %v1041_v53  ;;  %v2572_v2 = vpop.eup %2571 }
 0x7d0   :  { %593 = vst.msk [vmem:[#allocation2 + $0x18] sm:$0xff] %vm155_vm2, %v589_v24  ;;  %v2574_v18 = vpop.eup %2573 }
 0x7d1   :  { %v2576_v26 = vpop.eup %2575 }
 0x7d2   :  { %v1500_v33 = vpop.permute.xlu0 %1499 }
 0x7d3   :  { %v1039_v55 = vpop.permute.xlu1 %1038 }
 0x7d4   :  { %1051 = vst.msk [vmem:[#allocation2] sm:$0xff] %vm1050_vm4, %v1039_v55 }
 0x7d5   :  { %1512 = vst.msk [vmem:[#allocation2] sm:$0xff] %vm1511_vm5, %v1500_v33 }
 0x7d6   :  { %v1504_v36 = vpop.permute.xlu0 %1503 }
 0x7d7   :  { %v1043_v40 = vpop.permute.xlu1 %1042 }
 0x7d8   :  { %1053 = vst.msk [vmem:[#allocation2 + $0x10] sm:$0xff] %vm1050_vm4, %v1043_v40 }
 0x7d9   :  { %1514 = vst.msk [vmem:[#allocation2 + $0x10] sm:$0xff] %vm1511_vm5, %v1504_v36 }
 0x7db   :  { %v1045_v44 = vpop.permute.xlu1 %1044 }
 0x7dc   :  { %1054 = vst.msk [vmem:[#allocation2 + $0x18] sm:$0xff] %vm1050_vm4, %v1045_v44 }
 0x7df   :  { %v1502_v56 = vpop.permute.xlu1 %1501 }
 0x7e0   :  { %1513 = vst.msk [vmem:[#allocation2 + $0x8] sm:$0xff] %vm1511_vm5, %v1502_v56 }
 0x7e3   :  { %v1506_v59 = vpop.permute.xlu1 %1505  ;;  %v1798_v16 = vpop.f32.mrf.mxu1 }
 0x7e4   :  { %1515 = vst.msk [vmem:[#allocation2 + $0x18] sm:$0xff] %vm1511_vm5, %v1506_v59  ;;  %v1949_v60 = vmul.f32 %v2570_v57, %v1798_v16 }
 0x7e5   :  { %v2459_v62 = vpop.f32.mrf.mxu1 }
 0x7e6   :  { %1960 = vrot.lane.b32.xlu0 %v1949_v60, %s2695_s21 }
 0x7e7   :  { %v1801_v3 = vpop.f32.mrf.mxu1  ;;  %v1846_v5 = vpop.f32.mrf.mxu0 }
 0x7e8   :  { %v1951_v11 = vmul.f32 %v2572_v2, %v1846_v5 }
 0x7e9   :  { %v2460_v12 = vpop.f32.mrf.mxu1  ;;  %v2465_v14 = vpop.f32.mrf.mxu0 }
 0x7ea   :  { %1962 = vrot.lane.b32.xlu1 %v1951_v11, %s2695_s21 }
 0x7eb   :  { %v1849_v8 = vpop.f32.mrf.mxu0  ;;  %v1894_v20 = vpop.f32.mrf.mxu1 }
 0x7ec   :  { %v1953_v23 = vmul.f32 %v2574_v18, %v1894_v20 }
 0x7ed   :  { %v2466_v4 = vpop.f32.mrf.mxu0  ;;  %v2471_v25 = vpop.f32.mrf.mxu1 }
 0x7ee   :  { %1964 = vrot.lane.b32.xlu0 %v1953_v23, %s2695_s21 }
 0x7ef   :  { %v1897_v27 = vpop.f32.mrf.mxu1  ;;  %v1942_v28 = vpop.f32.mrf.mxu0 }
 0x7f0   :  { %v1955_v15 = vmul.f32 %v2576_v26, %v1942_v28 }
 0x7f1   :  { %v2472_v29 = vpop.f32.mrf.mxu1  ;;  %v2477_v9 = vpop.f32.mrf.mxu0 }
 0x7f2   :  { %1966 = vrot.lane.b32.xlu1 %v1955_v15, %s2695_s21 }
 0x7f3   :  { %v1945_v31 = vpop.f32.mrf.mxu0 }
 0x7f5   :  { %v2478_v22 = vpop.f32.mrf.mxu0 }
 0x858   :  { %v1961_v32 = vpop.permute.xlu0 %1960 }
 0x859   :  { %1973 = vst.msk [vmem:[#allocation2] sm:$0xff] %vm1972_vm6, %v1961_v32 }
 0x85c   :  { %v1963_v34 = vpop.permute.xlu1 %1962 }
 0x85d   :  { %1974 = vst.msk [vmem:[#allocation2 + $0x8] sm:$0xff] %vm1972_vm6, %v1963_v34 }
 0x860   :  { %v1965_v37 = vpop.permute.xlu0 %1964  ;;  %v1977_v19 = vld [vmem:[#allocation2] sm:$0xff] }
 0x861   :  { %1975 = vst.msk [vmem:[#allocation2 + $0x10] sm:$0xff] %vm1972_vm6, %v1965_v37 }
 0x864   :  { %v1967_v13 = vpop.permute.xlu1 %1966  ;;  %v1978_v21 = vld [vmem:[#allocation2 + $0x8] sm:$0xff] }
 0x865   :  { %1976 = vst.msk [vmem:[#allocation2 + $0x18] sm:$0xff] %vm1972_vm6, %v1967_v13  ;;  %v1981_v61 = vpack.c.bf16 %v1978_v21, %v1977_v19  ;;  %v2205_v21 = vld [vmem:[%s3181_s4 + $0x1] ss:$0 sm:$0xff] }
 0x867   :  { %2483 = vmatprep.mubr.msk.bf16.mxu1 %vm92_vm0, %v1981_v61 }
 0x868   :  { %v1979_v35 = vld [vmem:[#allocation2 + $0x10] sm:$0xff] }
 0x86c   :  { %v1980_v30 = vld [vmem:[#allocation2 + $0x18] sm:$0xff] }
 0x86d   :  { %v1982_v39 = vpack.c.bf16 %v1980_v30, %v1979_v35  ;;  %v2206_v35 = vld [vmem:[%s3181_s4 + $0x2] ss:$0 sm:$0xff]  ;;  %s2696_s4 = smov [#allocation9]  }
 0x86e   :  { %s2150_s30 = sshll.u32 %s2696_s4, 4  ;;  %s2151_s30 = int_to_ptr.vmem [resolvable:$true] %s2150_s30 }
 0x86f   :  { %2484 = vmatmul.mubr.msk.bf16.vlgmr.msra.gmra.mxu1 %vm92_vm0, %v1982_v39  ;;  %s2649_s6 = scalar_lea.vmem %s2151_s30, 512  ;;  %p2654_p2 = scmp.lt.s32.totalorder %s2151_s30, %s2151_s30 }
 0x870   :  { %p2650_p1 = scmp.ne.s32.totalorder %s2151_s30, %s2649_s6  ;;  %p2655_p3 = scmp.lt.s32.totalorder %s2649_s6, %s2649_s6 }
 0x872   :  { %p2656_p4 = por %p2655_p3, %p2654_p2 }
 0x874   :  { %p2657_p5 = pnand %p2656_p4, %p2650_p1 }
 0x92f   :  { %v2485_v58 = vpop.f32.mrf.mxu1 }
 0x930   :  { %v2053_v38 = vadd.f32 %v2485_v58, %v2200_v0 }
 0x931   :  { %v2044_v17 = vpop.f32.mrf.mxu1 }
 0x932   :  { %v3129_v50 = vadd.f32 %v2585_v41, %v2053_v38  ;;  %v2045_v42 = vadd.f32 %v2200_v0, %v2044_v17 }
 0x933   :  { %v2486_v1 = vpop.f32.mrf.mxu1 }
 0x934   :  { %v3131_v46 = vadd.f32 %v2586_v43, %v2045_v42  ;;  %v2056_v48 = vadd.f32 %v2486_v1, %v2200_v0  ;;  %v2069_v6 = vsel %vm92_vm0, %v3129_v50, 0.0  ;;  %v2081_v36 = vmul.f32 %v3129_v50, %v3129_v50 }
 0x935   :  { %2070 = vadd.xlane.f32.xlu0 %v2069_v6  ;;  %v2047_v47 = vpop.f32.mrf.mxu1 }
 0x936   :  { %v2048_v45 = vadd.f32 %v2200_v0, %v2047_v47  ;;  %v2079_v49 = vmul.f32 %v3131_v46, %v3131_v46  ;;  %v3137_v51 = vadd.f32 %v2587_v54, %v2056_v48  ;;  %v2063_v24 = vsel %vm92_vm0, %v3131_v46, 0.0 }
 0x937   :  { %v2089_v44 = vsel %vm92_vm0, %v2081_v36, 0.0 }
 0x938   :  { %v3139_v52 = vadd.f32 %v2588_v7, %v2048_v45  ;;  %v2083_v53 = vsel %vm92_vm0, %v2079_v49, 0.0  ;;  %v2072_v55 = vsel %vm92_vm0, %v3137_v51, 0.0  ;;  %v2082_v57 = vmul.f32 %v3137_v51, %v3137_v51 }
 0x939   :  { %2084 = vadd.xlane.f32.xlu1 %v2083_v53  ;;  %2064 = vadd.xlane.f32.xlu0 %v2063_v24 }
 0x93a   :  { %v2066_v33 = vsel %vm92_vm0, %v3139_v52, 0.0  ;;  %v2080_v40 = vmul.f32 %v3139_v52, %v3139_v52  ;;  %v2092_v59 = vsel %vm92_vm0, %v2082_v57, 0.0 }
 0x93c   :  { %v2086_v56 = vsel %vm92_vm0, %v2080_v40, 0.0 }
 0x93d   :  { %2067 = vadd.xlane.f32.xlu1 %v2066_v33  ;;  %2073 = vadd.xlane.f32.xlu0 %v2072_v55 }
 0x941   :  { %2090 = vadd.xlane.f32.xlu1 %v2089_v44  ;;  %2087 = vadd.xlane.f32.xlu0 %v2086_v56 }
 0x945   :  { %2093 = vadd.xlane.f32.xlu0 %v2092_v59 }
 0x9be   :  { %v2071_v16 = vpop.xlane.xlu0 %2070 }
 0x9bf   :  { %v2077_v5 = vmul.f32 0.03125, %v2071_v16 }
 0x9c1   :  { %v2101_v8 = vmul.f32 %v2077_v5, %v2077_v5  ;;  %v2109_v39 = vsub.f32 %v3129_v50, %v2077_v5 }
 0x9c2   :  { %v2085_v60 = vpop.xlane.xlu1 %2084  ;;  %v2065_v62 = vpop.xlane.xlu0 %2064 }
 0x9c3   :  { %v2075_v63 = vmul.f32 0.03125, %v2065_v62  ;;  %v2095_v2 = vmul.f32 0.03125, %v2085_v60 }
 0x9c5   :  { %v2099_v3 = vmul.f32 %v2075_v63, %v2075_v63  ;;  %v2107_v13 = vsub.f32 %v3131_v46, %v2075_v63 }
 0x9c6   :  { %v2068_v10 = vpop.xlane.xlu1 %2067  ;;  %v2074_v11 = vpop.xlane.xlu0 %2073 }
 0x9c7   :  { %v2103_v12 = vsub.f32 %v2095_v2, %v2099_v3  ;;  %v2076_v14 = vmul.f32 0.03125, %v2068_v10  ;;  %v2078_v20 = vmul.f32 0.03125, %v2074_v11 }
 0x9c9   :  { %v2111_v18 = vadd.f32 1e-05, %v2103_v12  ;;  %v2100_v25 = vmul.f32 %v2076_v14, %v2076_v14  ;;  %v2102_v9 = vmul.f32 %v2078_v20, %v2078_v20  ;;  %v2108_v38 = vsub.f32 %v3139_v52, %v2076_v14 }
 0x9ca   :  { %v2091_v23 = vpop.xlane.xlu1 %2090  ;;  %v2088_v4 = vpop.xlane.xlu0 %2087  ;;  %v2110_v1 = vsub.f32 %v3137_v51, %v2078_v20 }
 0x9cb   :  { %2577 = vrsqrt.f32 %v2111_v18  ;;  %v2097_v26 = vmul.f32 0.03125, %v2091_v23  ;;  %v2096_v27 = vmul.f32 0.03125, %v2088_v4 }
 0x9cd   :  { %v2105_v28 = vsub.f32 %v2097_v26, %v2101_v8  ;;  %v2104_v15 = vsub.f32 %v2096_v27, %v2100_v25 }
 0x9ce   :  { %v2094_v29 = vpop.xlane.xlu0 %2093 }
 0x9cf   :  { %v2113_v31 = vadd.f32 1e-05, %v2105_v28  ;;  %v2112_v22 = vadd.f32 1e-05, %v2104_v15  ;;  %v2098_v32 = vmul.f32 0.03125, %v2094_v29 }
 0x9d1   :  { %2579 = vrsqrt.f32 %v2113_v31  ;;  %v2106_v34 = vsub.f32 %v2098_v32, %v2102_v9 }
 0x9d2   :  { %2581 = vrsqrt.f32 %v2112_v22 }
 0x9d3   :  { %v2114_v37 = vadd.f32 1e-05, %v2106_v34 }
 0x9d5   :  { %2583 = vrsqrt.f32 %v2114_v37 }
 0x9d8   :  { %v2578_v19 = vpop.eup %2577 }
 0x9d9   :  { %v2119_v61 = vmul.f32 %v2578_v19, %v2107_v13 }
 0x9db   :  { %v2128_v30 = vmul.f32 %v2205_v21, %v2119_v61 }
 0x9dd   :  { %v2137_v0 = vadd.f32 %v2206_v35, %v2128_v30 }
 0x9de   :  { %v2580_v58 = vpop.eup %2579 }
 0x9df   :  { %v2582_v17 = vpop.eup %2581  ;;  %2141 = vst.msk [vmem:[#allocation9] sm:$0xff] %vm92_vm0, %v2137_v0  ;;  %v2121_v41 = vmul.f32 %v2580_v58, %v2109_v39 }
 0x9e0   :  { %v2120_v42 = vmul.f32 %v2582_v17, %v2108_v38 }
 0x9e1   :  { %v2130_v43 = vmul.f32 %v2205_v21, %v2121_v41 }
 0x9e2   :  { %v2584_v46 = vpop.eup %2583  ;;  %v2129_v48 = vmul.f32 %v2205_v21, %v2120_v42 }
 0x9e3   :  { %v2122_v6 = vmul.f32 %v2584_v46, %v2110_v1  ;;  %v2139_v47 = vadd.f32 %v2206_v35, %v2130_v43 }
 0x9e4   :  { %v2138_v45 = vadd.f32 %v2206_v35, %v2129_v48 }
 0x9e5   :  { %v2131_v50 = vmul.f32 %v2205_v21, %v2122_v6  ;;  %2143 = vst.msk [vmem:[#allocation9 + $0x10] sm:$0xff] %vm92_vm0, %v2139_v47 }
 0x9e6   :  { %2142 = vst.msk [vmem:[#allocation9 + $0x8] sm:$0xff] %vm92_vm0, %v2138_v45 }
 0x9e7   :  { %v2140_v49 = vadd.f32 %v2206_v35, %v2131_v50 }
 0x9e9   :  { %2144 = vst.msk [vmem:[#allocation9 + $0x18] sm:$0xff] %vm92_vm0, %v2140_v49 }
 0x9ea   :  { %2660 = shalt.err (!%p2657_p5)
}
 0x9eb   :  { %2156 = dma.vmem_to_hbm [thread:$0]  %s2151_s30, 512, %s3182_s5, [#allocation5], %s2679_s28, %s2679_s28, %s2680_s29  }
 0x9ec   :  { %2673 = dma.done.wait [#allocation5], 512  }
 0x9ed   :  { %2674 = vsyncadd [#allocation5], 4294966784 }
 0x9ee   :  { %2160 = vsyncpa [#allocation4], 1 }
 0x9ef   :  { %2161 = vsyncpa [#allocation7], 1 }
 0x9f0   :  { %2162 = vsyncpa [#allocation5], 1 }

// kernel: tpu_custom_call.1
= control target key start
LH: loop header
LB: loop body
LE: loop exit
PB: predicated region body
PF: predicated region fallthrough
CT: control target
= control target key end

     0   :  { %10 = vsyncpa [#allocation4], 0  ;;  %s3177_s0 = inlined_call_operand.hbm [shape: f32[4,8,32], index: 0, kind: input, shape index: {}]   ;;  %s3178_s1 = inlined_call_operand.hbm [shape: bf16[32,96], index: 1, kind: input, shape index: {}]   ;;  %s3179_s2 = inlined_call_operand.vmem [shape: f32[1,96], index: 2, kind: input, shape index: {}]   ;;  %s3180_s3 = inlined_call_operand.hbm [shape: bf16[32,32], index: 3, kind: input, shape index: {}]   ;;  %s3181_s4 = inlined_call_operand.vmem [shape: f32[3,32], index: 4, kind: input, shape index: {}]   ;;  %s3182_s5 = inlined_call_operand.hbm [shape: f32[4,8,32], index: 5, kind: output, shape index: {}]  }
   0x1   :  { %11 = vsyncpa [#allocation7], 0 }
   0x2   :  { %12 = vsyncpa [#allocation5], 0  ;;  %s2675_s18 = smov [#allocation6]  }
   0x3   :  { %s30_s19 = sshll.u32 %s2675_s18, 4  ;;  %s31_s19 = int_to_ptr.vmem [resolvable:$true] %s30_s19 }
   0x4   :  { %s2597_s20 = scalar_lea.vmem %s31_s19, 256  ;;  %p2602_p1 = scmp.lt.s32.totalorder %s31_s19, %s31_s19 }
   0x5   :  { %p2598_p0 = scmp.ne.s32.totalorder %s31_s19, %s2597_s20  ;;  %p2603_p2 = scmp.lt.s32.totalorder %s2597_s20, %s2597_s20 }
   0x7   :  { %p2604_p3 = por %p2603_p2, %p2602_p1 }
   0x9   :  { %p2605_p4 = pnand %p2604_p3, %p2598_p0 }
   0xb   :  { %2608 = shalt.err (!%p2605_p4)
}
   0xc   :  { %s2676_s21 = smov 64   ;;  %s2677_s22 = smov 4  }
   0xd   :  { %36 = dma.hbm_to_vmem [thread:$0]  %s3178_s1, 256, %s31_s19, [#allocation7], %s2676_s21, %s2676_s21, %s2677_s22  }
   0xe   :  { %s2678_s25 = smov [#allocation3]  }
   0xf   :  { %s18_s26 = sshll.u32 %s2678_s25, 4  ;;  %s19_s26 = int_to_ptr.vmem [resolvable:$true] %s18_s26 }
  0x10   :  { %s2617_s27 = scalar_lea.vmem %s19_s26, 512  ;;  %p2622_p6 = scmp.lt.s32.totalorder %s19_s26, %s19_s26 }
  0x11   :  { %p2618_p5 = scmp.ne.s32.totalorder %s19_s26, %s2617_s27  ;;  %p2623_p7 = scmp.lt.s32.totalorder %s2617_s27, %s2617_s27 }
  0x13   :  { %p2624_p8 = por %p2623_p7, %p2622_p6 }
  0x15   :  { %p2625_p9 = pnand %p2624_p8, %p2618_p5 }
  0x17   :  { %2628 = shalt.err (!%p2625_p9)
}
  0x18   :  { %s2679_s28 = smov 128   ;;  %s2680_s29 = smov 8  }
  0x19   :  { %24 = dma.hbm_to_vmem [thread:$0]  %s3177_s0, 512, %s19_s26, [#allocation4], %s2679_s28, %s2679_s28, %s2680_s29  }
  0x1a   :  { %s2681_s1 = smov [#allocation8]  }
  0x1b   :  { %s44_s7 = sshll.u32 %s2681_s1, 4  ;;  %s45_s7 = int_to_ptr.vmem [resolvable:$true] %s44_s7 }
  0x1c   :  { %s2637_s8 = scalar_lea.vmem %s45_s7, 256  ;;  %p2642_p11 = scmp.lt.s32.totalorder %s45_s7, %s45_s7 }
  0x1d   :  { %p2638_p10 = scmp.ne.s32.totalorder %s45_s7, %s2637_s8  ;;  %p2643_p12 = scmp.lt.s32.totalorder %s2637_s8, %s2637_s8 }
  0x1f   :  { %p2644_p13 = por %p2643_p12, %p2642_p11 }
  0x21   :  { %p2645_p0 = pnand %p2644_p13, %p2638_p10 }
  0x23   :  { %2648 = shalt.err (!%p2645_p0)
}
  0x24   :  { %50 = dma.hbm_to_vmem [thread:$0]  %s3180_s3, 256, %s45_s7, [#allocation7], %s2676_s21, %s2676_s21, %s2677_s22  }
  0x25   :  { %2669 = dma.done.wait [#allocation4], 512  }
  0x26   :  { %2670 = vsyncadd [#allocation4], 4294966784 }
  0x27   :  { %2671 = dma.done.wait [#allocation7], 512  }
  0x28   :  { %2672 = vsyncadd [#allocation7], 4294966784  ;;  %v2509_v0 = vld [vmem:[#allocation6 + $0x8] sm:$0xff]   ;;  %v2510_v1 = vld [vmem:[#allocation6] sm:$0xff]   ;;  %vm92_vm0 = vcmask 261120   ;;  %v2682_v8 = vmov 0.0  }
  0x29   :  { %2279 = vmatprep.subr.bf16.mxu0 %v2509_v0  ;;  %v63_v2 = vld [vmem:[#allocation3] sm:$0xff]  ;;  %v64_v3 = vld [vmem:[#allocation3 + $0x8] sm:$0xff]  ;;  %v65_v4 = vld [vmem:[#allocation3 + $0x10] sm:$0xff]  ;;  %2287 = vmatprep.subr.bf16.mxu1 %v2682_v8  ;;  %vm2683_vm1 = vmmov 0   ;;  %s2684_s11 = smov 96   ;;  %vm155_vm2 = vcmask 64512  }
  0x2a   :  { %2280 = vmatpush3.bf16.msra.mxu0 %v2509_v0  ;;  %v67_v5 = vpack.c.bf16 %v64_v3, %v63_v2  ;;  %v66_v6 = vld [vmem:[#allocation3 + $0x18] sm:$0xff]  ;;  %v2163_v9 = vld [vmem:[%s3179_s2] ss:$0 sm:$0xff]  ;;  %2289 = vmatprep.mubr.msk.bf16.mxu1 %vm2683_vm1, %v2682_v8  ;;  %vm394_vm3 = vcmask 1043456   ;;  %s2685_s2 = smov 88   ;;  %s2686_s12 = smov 120  }
  0x2b   :  { %2281 = vmatprep.subr.bf16.mxu0 %v2510_v1  ;;  %v68_v7 = vpack.c.bf16 %v66_v6, %v65_v4  ;;  %s2687_s13 = smov 56   ;;  %s2688_s14 = smov 80   ;;  %vm1050_vm4 = vcmask 130112   ;;  %vm1511_vm5 = vcmask 195712   ;;  %vm1972_vm6 = vcmask 261312  }
  0x2c   :  { %2283 = vmatprep.mubr.msk.bf16.mxu0 %vm92_vm0, %v67_v5  ;;  %s2689_s15 = smov 112   ;;  %s2690_s16 = smov 48  }
  0x2d   :  { %s2691_s17 = smov 72   ;;  %s2692_s18 = smov 104  }
  0x2e   :  { %2282 = vmatpush3.bf16.msra.mxu0 %v2510_v1  ;;  %s2693_s19 = smov 40   ;;  %s2694_s20 = smov 16  }
  0x2f   :  { %2293 = vmatprep.subr.bf16.mxu0 %v2682_v8 }
  0x31   :  { %2284 = vmatmul.mubr.msk.bf16.vlgmr.msra.gmra.mxu0 %vm92_vm0, %v68_v7 }
  0x32   :  { %2295 = vmatprep.mubr.msk.bf16.mxu0 %vm2683_vm1, %v2682_v8 }
  0xf1   :  { %v2285_v10 = vpop.f32.mrf.mxu0 }
  0xf2   :  { %v142_v11 = vadd.f32 %v2285_v10, %v2163_v9 }
  0xf3   :  { %v133_v12 = vpop.f32.mrf.mxu0 }
  0xf4   :  { %v2754_v13 = vpack.c.bf16 %v142_v11, %v142_v11  ;;  %v134_v14 = vadd.f32 %v2163_v9, %v133_v12 }
  0xf5   :  { %v2286_v15 = vpop.f32.mrf.mxu0 }
  0xf6   :  { %v2756_v16 = vpack.c.bf16 %v134_v14, %v134_v14  ;;  %v145_v17 = vadd.f32 %v2286_v15, %v2163_v9  ;;  %252 = vrot.lane.b32.xlu1 %v2754_v13, %s2684_s11 }
  0xf7   :  { %v136_v18 = vpop.f32.mrf.mxu0 }
  0xf8   :  { %v2759_v19 = vpack.c.bf16 %v145_v17, %v145_v17  ;;  %v137_v20 = vadd.f32 %v2163_v9, %v136_v18  ;;  %153 = vrot.lane.b32.xlu0 %v2756_v16, %s2684_s11 }
  0xfa   :  { %v2762_v21 = vpack.c.bf16 %v137_v20, %v137_v20  ;;  %301 = vrot.lane.b32.xlu1 %v2759_v19, %s2684_s11 }
  0xfc   :  { %203 = vrot.lane.b32.xlu0 %v2762_v21, %s2684_s11 }
  0xfe   :  { %389 = vrot.lane.b32.xlu1 %v2756_v16, %s2676_s21 }
 0x168   :  { %v253_v24 = vpop.permute.xlu1 %252 }
 0x169   :  { %v258_v28 = vsel %vm155_vm2, %v253_v24, 0 }
 0x16a   :  { %v154_v22 = vpop.permute.xlu0 %153 }
 0x16b   :  { %v160_v23 = vsel %vm155_vm2, %v154_v22, 0 }
 0x16c   :  { %2288 = vmatpush3.bf16.xpose.msra.mxu1 %v160_v23  ;;  %v302_v27 = vpop.permute.xlu1 %301 }
 0x16d   :  { %2299 = vmatprep.subr.bf16.mxu1 %v2682_v8  ;;  %v307_v29 = vsel %vm155_vm2, %v302_v27, 0 }
 0x16e   :  { %v204_v25 = vpop.permute.xlu0 %203 }
 0x16f   :  { %v209_v26 = vsel %vm155_vm2, %v204_v25, 0 }
 0x170   :  { %2294 = vmatpush3.bf16.xpose.msra.mxu0 %v209_v26  ;;  %v390_v30 = vpop.permute.xlu1 %389 }
 0x171   :  { %2305 = vmatprep.subr.bf16.mxu0 %v2682_v8  ;;  %v396_v31 = vsel %vm394_vm3, %v390_v30, 0 }
 0x173   :  { %2290 = vmatmul.mubr.msk.bf16.vlgmr.msra.gmra.mxu1 %vm155_vm2, %v2756_v16 }
 0x174   :  { %2300 = vmatpush3.bf16.xpose.msra.mxu1 %v258_v28  ;;  %2301 = vmatprep.mubr.msk.bf16.mxu1 %vm2683_vm1, %v2682_v8 }
 0x175   :  { %2311 = vmatprep.subr.bf16.mxu1 %v2682_v8 }
 0x177   :  { %2296 = vmatmul.mubr.msk.bf16.vlgmr.msra.gmra.mxu0 %vm155_vm2, %v2762_v21 }
 0x178   :  { %2306 = vmatpush3.bf16.xpose.msra.mxu0 %v307_v29  ;;  %2307 = vmatprep.mubr.msk.bf16.mxu0 %vm2683_vm1, %v2682_v8 }
 0x179   :  { %2317 = vmatprep.subr.bf16.mxu0 %v2682_v8 }
 0x17b   :  { %2302 = vmatmul.mubr.msk.bf16.vlgmr.msra.gmra.mxu1 %vm155_vm2, %v2754_v13 }
 0x17c   :  { %2312 = vmatpush3.bf16.msra.mxu1 %v396_v31  ;;  %2313 = vmatprep.mubr.msk.bf16.mxu1 %vm2683_vm1, %v2682_v8 }
 0x17d   :  { %2323 = vmatprep.subr.bf16.mxu1 %v2682_v8 }
 0x17f   :  { %2308 = vmatmul.mubr.msk.bf16.vlgmr.msra.gmra.mxu0 %vm155_vm2, %v2759_v19 }
 0x180   :  { %2319 = vmatprep.mubr.msk.bf16.mxu0 %vm2683_vm1, %v2682_v8 }
 0x233   :  { %v196_v32 = vpop.f32.mrf.mxu1 }
 0x234   :  { %v349_v33 = vsel %vm155_vm2, %v196_v32, -inf }
 0x235   :  { %350 = vmax.xlane.f32.xlu0 %v349_v33  ;;  %v2291_v34 = vpop.f32.mrf.mxu1 }
 0x237   :  { %v199_v35 = vpop.f32.mrf.mxu1  ;;  %v245_v36 = vpop.f32.mrf.mxu0 }
 0x238   :  { %v352_v37 = vsel %vm155_vm2, %v245_v36, -inf }
 0x239   :  { %v2292_v38 = vpop.f32.mrf.mxu1  ;;  %353 = vmax.xlane.f32.xlu1 %v352_v37  ;;  %v2297_v39 = vpop.f32.mrf.mxu0 }
 0x23b   :  { %v248_v40 = vpop.f32.mrf.mxu0  ;;  %v294_v41 = vpop.f32.mrf.mxu1 }
 0x23c   :  { %v355_v42 = vsel %vm155_vm2, %v294_v41, -inf }
 0x23d   :  { %356 = vmax.xlane.f32.xlu0 %v355_v42  ;;  %v2298_v43 = vpop.f32.mrf.mxu0  ;;  %v2303_v44 = vpop.f32.mrf.mxu1 }
 0x23f   :  { %v297_v45 = vpop.f32.mrf.mxu1  ;;  %v343_v46 = vpop.f32.mrf.mxu0 }
 0x240   :  { %v358_v47 = vsel %vm155_vm2, %v343_v46, -inf }
 0x241   :  { %v2304_v48 = vpop.f32.mrf.mxu1  ;;  %359 = vmax.xlane.f32.xlu0 %v358_v47  ;;  %v2309_v49 = vpop.f32.mrf.mxu0 }
 0x243   :  { %v346_v50 = vpop.f32.mrf.mxu0 }
 0x245   :  { %v2310_v51 = vpop.f32.mrf.mxu0 }
 0x24a   :  { %486 = vrot.lane.b32.xlu1 %v2754_v13, %s2676_s21 }
 0x24e   :  { %534 = vrot.lane.b32.xlu1 %v2759_v19, %s2676_s21 }
 0x252   :  { %646 = vrot.lane.b32.xlu1 %v2762_v21, %s2685_s2 }
 0x256   :  { %644 = vrot.lane.b32.xlu1 %v2762_v21, %s2686_s12 }
 0x257   :  { %438 = vrot.lane.b32.xlu0 %v2762_v21, %s2676_s21  ;;  %s2695_s21 = smov 24  }
 0x25a   :  { %746 = vrot.lane.b32.xlu1 %v2759_v19, %s2685_s2 }
 0x25b   :  { %596 = vrot.lane.b32.xlu0 %v2756_v16, %s2685_s2 }
 0x25e   :  { %744 = vrot.lane.b32.xlu1 %v2759_v19, %s2686_s12 }
 0x25f   :  { %594 = vrot.lane.b32.xlu0 %v2756_v16, %s2686_s12 }
 0x262   :  { %834 = vrot.lane.b32.xlu1 %v2756_v16, %s2687_s13 }
 0x263   :  { %696 = vrot.lane.b32.xlu0 %v2754_v13, %s2685_s2 }
 0x267   :  { %694 = vrot.lane.b32.xlu0 %v2754_v13, %s2686_s12 }
 0x2be   :  { %v351_v52 = vpop.xlane.xlu0 %350 }
 0x2bf   :  { %v361_v53 = vsub.f32 %v196_v32, %v351_v52 }
 0x2c1   :  { %v365_v54 = vmul.f32 1.442695, %v361_v53 }
 0x2c2   :  { %v354_v55 = vpop.xlane.xlu1 %353 }
 0x2c3   :  { %2513 = vpow2.f32 %v365_v54  ;;  %v362_v56 = vsub.f32 %v245_v36, %v354_v55 }
 0x2c5   :  { %v367_v57 = vmul.f32 1.442695, %v362_v56 }
 0x2c6   :  { %v487_v58 = vpop.permute.xlu1 %486  ;;  %v357_v59 = vpop.xlane.xlu0 %356 }
 0x2c7   :  { %2515 = vpow2.f32 %v367_v57  ;;  %v363_v60 = vsub.f32 %v294_v41, %v357_v59  ;;  %v492_v7 = vsel %vm394_vm3, %v487_v58, 0 }
 0x2c9   :  { %v369_v61 = vmul.f32 1.442695, %v363_v60 }
 0x2ca   :  { %v535_v62 = vpop.permute.xlu1 %534  ;;  %v360_v63 = vpop.xlane.xlu0 %359 }
 0x2cb   :  { %2517 = vpow2.f32 %v369_v61  ;;  %v364_v0 = vsub.f32 %v343_v46, %v360_v63  ;;  %v540_v14 = vsel %vm394_vm3, %v535_v62, 0 }
 0x2cd   :  { %v371_v1 = vmul.f32 1.442695, %v364_v0 }
 0x2ce   :  { %v439_v2 = vpop.permute.xlu0 %438  ;;  %v647_v5 = vpop.permute.xlu1 %646 }
 0x2cf   :  { %2519 = vpow2.f32 %v371_v1  ;;  %v444_v3 = vsel %vm394_vm3, %v439_v2, 0  ;;  %v652_v25 = vsel %vm155_vm2, %v647_v5, 0 }
 0x2d0   :  { %v2815_v4 = vpop.eup %2513  ;;  %2318 = vmatpush3.bf16.msra.mxu0 %v444_v3 }
 0x2d1   :  { %v385_v6 = vpack.c.bf16 %v2815_v4, %v2815_v4  ;;  %2329 = vmatprep.subr.bf16.mxu0 %v2682_v8 }
 0x2d2   :  { %v597_v10 = vpop.permute.xlu0 %596  ;;  %v645_v12 = vpop.permute.xlu1 %644 }
 0x2d3   :  { %2314 = vmatmul.mubr.msk.bf16.vlgmr.msra.gmra.mxu1 %vm155_vm2, %v385_v6  ;;  %v602_v20 = vsel %vm155_vm2, %v597_v10, 0 }
 0x2d4   :  { %v2822_v9 = vpop.eup %2515  ;;  %2324 = vmatpush3.bf16.msra.mxu1 %v492_v7  ;;  %2325 = vmatprep.mubr.msk.bf16.mxu1 %vm2683_vm1, %v2682_v8 }
 0x2d5   :  { %v386_v11 = vpack.c.bf16 %v2822_v9, %v2822_v9  ;;  %2335 = vmatprep.subr.bf16.mxu1 %v2682_v8 }
 0x2d6   :  { %v595_v18 = vpop.permute.xlu0 %594  ;;  %v747_v23 = vpop.permute.xlu1 %746 }
 0x2d7   :  { %2320 = vmatmul.mubr.msk.bf16.vlgmr.msra.gmra.mxu0 %vm155_vm2, %v386_v11  ;;  %v752_v29 = vsel %vm155_vm2, %v747_v23, 0 }
 0x2d8   :  { %v2831_v15 = vpop.eup %2517  ;;  %2330 = vmatpush3.bf16.msra.mxu0 %v540_v14  ;;  %2331 = vmatprep.mubr.msk.bf16.mxu0 %vm2683_vm1, %v2682_v8 }
 0x2d9   :  { %v387_v17 = vpack.c.bf16 %v2831_v15, %v2831_v15  ;;  %2341 = vmatprep.subr.bf16.mxu0 %v2682_v8 }
 0x2da   :  { %v697_v26 = vpop.permute.xlu0 %696  ;;  %v745_v27 = vpop.permute.xlu1 %744 }
 0x2db   :  { %2326 = vmatmul.mubr.msk.bf16.vlgmr.msra.gmra.mxu1 %vm155_vm2, %v387_v17  ;;  %v702_v28 = vsel %vm155_vm2, %v697_v26, 0 }
 0x2dc   :  { %v2840_v22 = vpop.eup %2519  ;;  %2336 = vmatpush3.bf16.xpose.msra.mxu1 %v602_v20  ;;  %2337 = vmatprep.mubr.msk.bf16.mxu1 %vm2683_vm1, %v2682_v8 }
 0x2dd   :  { %v388_v24 = vpack.c.bf16 %v2840_v22, %v2840_v22  ;;  %2347 = vmatprep.subr.bf16.mxu1 %v2682_v8 }
 0x2de   :  { %v835_v30 = vpop.permute.xlu1 %834  ;;  %v695_v31 = vpop.permute.xlu0 %694 }
 0x2df   :  { %2332 = vmatmul.mubr.msk.bf16.vlgmr.msra.gmra.mxu0 %vm155_vm2, %v388_v24  ;;  %v840_v32 = vsel %vm394_vm3, %v835_v30, 0 }
 0x2e0   :  { %2342 = vmatpush3.bf16.xpose.msra.mxu0 %v652_v25  ;;  %2343 = vmatprep.mubr.msk.bf16.mxu0 %vm2683_vm1, %v2682_v8 }
 0x2e1   :  { %2353 = vmatprep.subr.bf16.mxu0 %v2682_v8 }
 0x2e3   :  { %2338 = vmatmul.mubr.msk.bf16.vlgmr.msra.gmra.mxu1 %vm155_vm2, %v595_v18 }
 0x2e4   :  { %2348 = vmatpush3.bf16.xpose.msra.mxu1 %v702_v28  ;;  %2349 = vmatprep.mubr.msk.bf16.mxu1 %vm2683_vm1, %v2682_v8 }
 0x2e5   :  { %2359 = vmatprep.subr.bf16.mxu1 %v2682_v8 }
 0x2e7   :  { %2344 = vmatmul.mubr.msk.bf16.vlgmr.msra.gmra.mxu0 %vm155_vm2, %v645_v12 }
 0x2e8   :  { %2354 = vmatpush3.bf16.xpose.msra.mxu0 %v752_v29  ;;  %2355 = vmatprep.mubr.msk.bf16.mxu0 %vm2683_vm1, %v2682_v8 }
 0x2e9   :  { %2365 = vmatprep.subr.bf16.mxu0 %v2682_v8 }
 0x2eb   :  { %2350 = vmatmul.mubr.msk.bf16.vlgmr.msra.gmra.mxu1 %vm155_vm2, %v695_v31 }
 0x2ec   :  { %2360 = vmatpush3.bf16.msra.mxu1 %v840_v32  ;;  %2361 = vmatprep.mubr.msk.bf16.mxu1 %vm2683_vm1, %v2682_v8 }
 0x2ed   :  { %2371 = vmatprep.subr.bf16.mxu1 %v2682_v8 }
 0x2ef   :  { %2356 = vmatmul.mubr.msk.bf16.vlgmr.msra.gmra.mxu0 %vm155_vm2, %v745_v27 }
 0x2f0   :  { %2367 = vmatprep.mubr.msk.bf16.mxu0 %vm2683_vm1, %v2682_v8 }
 0x393   :  { %v2870_v33 = vpop.f32.mrf.mxu1 }
 0x395   :  { %v2315_v34 = vpop.f32.mrf.mxu1 }
 0x397   :  { %v435_v35 = vpop.f32.mrf.mxu1  ;;  %v2872_v36 = vpop.f32.mrf.mxu0 }
 0x399   :  { %v2316_v37 = vpop.f32.mrf.mxu1  ;;  %v2321_v38 = vpop.f32.mrf.mxu0 }
 0x39b   :  { %v483_v39 = vpop.f32.mrf.mxu0  ;;  %v2874_v40 = vpop.f32.mrf.mxu1 }
 0x39d   :  { %v2322_v41 = vpop.f32.mrf.mxu0  ;;  %v2327_v42 = vpop.f32.mrf.mxu1 }
 0x39f   :  { %v531_v43 = vpop.f32.mrf.mxu1  ;;  %v2876_v44 = vpop.f32.mrf.mxu0 }
 0x3a1   :  { %v2328_v45 = vpop.f32.mrf.mxu1  ;;  %v2333_v46 = vpop.f32.mrf.mxu0 }
 0x3a3   :  { %v579_v47 = vpop.f32.mrf.mxu0  ;;  %v638_v48 = vpop.f32.mrf.mxu1 }
 0x3a4   :  { %v794_v49 = vsel %vm155_vm2, %v638_v48, -inf }
 0x3a5   :  { %v2334_v50 = vpop.f32.mrf.mxu0  ;;  %795 = vmax.xlane.f32.xlu0 %v794_v49  ;;  %v2339_v51 = vpop.f32.mrf.mxu1 }
 0x3a7   :  { %v641_v52 = vpop.f32.mrf.mxu1  ;;  %v688_v53 = vpop.f32.mrf.mxu0 }
 0x3a8   :  { %v797_v54 = vsel %vm155_vm2, %v688_v53, -inf }
 0x3a9   :  { %798 = vmax.xlane.f32.xlu1 %v797_v54  ;;  %v2340_v55 = vpop.f32.mrf.mxu1  ;;  %v2345_v56 = vpop.f32.mrf.mxu0 }
 0x3ab   :  { %v691_v57 = vpop.f32.mrf.mxu0  ;;  %v738_v58 = vpop.f32.mrf.mxu1 }
 0x3ac   :  { %v800_v59 = vsel %vm155_vm2, %v738_v58, -inf }
 0x3ad   :  { %v2346_v60 = vpop.f32.mrf.mxu0  ;;  %801 = vmax.xlane.f32.xlu0 %v800_v59  ;;  %v2351_v61 = vpop.f32.mrf.mxu1 }
 0x3af   :  { %v741_v62 = vpop.f32.mrf.mxu1  ;;  %v788_v63 = vpop.f32.mrf.mxu0 }
 0x3b0   :  { %v803_v0 = vsel %vm155_vm2, %v788_v63, -inf }
 0x3b1   :  { %v2357_v1 = vpop.f32.mrf.mxu0  ;;  %804 = vmax.xlane.f32.xlu0 %v803_v0  ;;  %v2352_v2 = vpop.f32.mrf.mxu1 }
 0x3b3   :  { %v791_v3 = vpop.f32.mrf.mxu0 }
 0x3b5   :  { %v2358_v5 = vpop.f32.mrf.mxu0 }
 0x3ba   :  { %930 = vrot.lane.b32.xlu1 %v2754_v13, %s2687_s13 }
 0x3be   :  { %978 = vrot.lane.b32.xlu1 %v2759_v19, %s2687_s13 }
 0x3c2   :  { %1107 = vrot.lane.b32.xlu1 %v2762_v21, %s2688_s14 }
 0x3c6   :  { %1105 = vrot.lane.b32.xlu1 %v2762_v21, %s2689_s15 }
 0x3c7   :  { %882 = vrot.lane.b32.xlu0 %v2762_v21, %s2687_s13 }
 0x3ca   :  { %1207 = vrot.lane.b32.xlu1 %v2759_v19, %s2688_s14 }
 0x3cb   :  { %1057 = vrot.lane.b32.xlu0 %v2756_v16, %s2688_s14 }
 0x3ce   :  { %1205 = vrot.lane.b32.xlu1 %v2759_v19, %s2689_s15 }
 0x3cf   :  { %1055 = vrot.lane.b32.xlu0 %v2756_v16, %s2689_s15 }
 0x3d2   :  { %1295 = vrot.lane.b32.xlu1 %v2756_v16, %s2690_s16 }
 0x3d3   :  { %1157 = vrot.lane.b32.xlu0 %v2754_v13, %s2688_s14 }
 0x3d7   :  { %1155 = vrot.lane.b32.xlu0 %v2754_v13, %s2689_s15 }
 0x42e   :  { %v796_v6 = vpop.xlane.xlu0 %795 }
 0x42f   :  { %v806_v7 = vsub.f32 %v638_v48, %v796_v6 }
 0x431   :  { %v810_v10 = vmul.f32 1.442695, %v806_v7 }
 0x432   :  { %v799_v11 = vpop.xlane.xlu1 %798 }
 0x433   :  { %2521 = vpow2.f32 %v810_v10  ;;  %v807_v12 = vsub.f32 %v688_v53, %v799_v11 }
 0x435   :  { %v812_v14 = vmul.f32 1.442695, %v807_v12 }
 0x436   :  { %v931_v17 = vpop.permute.xlu1 %930  ;;  %v802_v18 = vpop.xlane.xlu0 %801 }
 0x437   :  { %2523 = vpow2.f32 %v812_v14  ;;  %v808_v20 = vsub.f32 %v738_v58, %v802_v18  ;;  %v936_v34 = vsel %vm394_vm3, %v931_v17, 0 }
 0x439   :  { %v814_v23 = vmul.f32 1.442695, %v808_v20 }
 0x43a   :  { %v979_v24 = vpop.permute.xlu1 %978  ;;  %v805_v25 = vpop.xlane.xlu0 %804 }
 0x43b   :  { %2525 = vpow2.f32 %v814_v23  ;;  %v809_v26 = vsub.f32 %v788_v63, %v805_v25  ;;  %v984_v41 = vsel %vm394_vm3, %v979_v24, 0 }
 0x43d   :  { %v816_v27 = vmul.f32 1.442695, %v809_v26 }
 0x43e   :  { %v883_v28 = vpop.permute.xlu0 %882  ;;  %v1108_v31 = vpop.permute.xlu1 %1107 }
 0x43f   :  { %2527 = vpow2.f32 %v816_v27  ;;  %v888_v29 = vsel %vm394_vm3, %v883_v28, 0  ;;  %v1113_v50 = vsel %vm155_vm2, %v1108_v31, 0 }
 0x440   :  { %v2899_v30 = vpop.eup %2521  ;;  %2366 = vmatpush3.bf16.msra.mxu0 %v888_v29 }
 0x441   :  { %v830_v32 = vpack.c.bf16 %v2899_v30, %v2899_v30  ;;  %2377 = vmatprep.subr.bf16.mxu0 %v2682_v8 }
 0x442   :  { %v1058_v37 = vpop.permute.xlu0 %1057  ;;  %v1106_v39 = vpop.permute.xlu1 %1105 }
 0x443   :  { %2362 = vmatmul.mubr.msk.bf16.vlgmr.msra.gmra.mxu1 %vm155_vm2, %v830_v32  ;;  %v1063_v46 = vsel %vm155_vm2, %v1058_v37, 0 }
 0x444   :  { %v2906_v35 = vpop.eup %2523  ;;  %2372 = vmatpush3.bf16.msra.mxu1 %v936_v34  ;;  %2373 = vmatprep.mubr.msk.bf16.mxu1 %vm2683_vm1, %v2682_v8 }
 0x445   :  { %v831_v38 = vpack.c.bf16 %v2906_v35, %v2906_v35  ;;  %2383 = vmatprep.subr.bf16.mxu1 %v2682_v8 }
 0x446   :  { %v1056_v45 = vpop.permute.xlu0 %1055  ;;  %v1208_v48 = vpop.permute.xlu1 %1207 }
 0x447   :  { %2368 = vmatmul.mubr.msk.bf16.vlgmr.msra.gmra.mxu0 %vm155_vm2, %v831_v38  ;;  %v1213_v54 = vsel %vm155_vm2, %v1208_v48, 0 }
 0x448   :  { %v2915_v42 = vpop.eup %2525  ;;  %2378 = vmatpush3.bf16.msra.mxu0 %v984_v41  ;;  %2379 = vmatprep.mubr.msk.bf16.mxu0 %vm2683_vm1, %v2682_v8 }
 0x449   :  { %v832_v43 = vpack.c.bf16 %v2915_v42, %v2915_v42  ;;  %2389 = vmatprep.subr.bf16.mxu0 %v2682_v8 }
 0x44a   :  { %v1158_v51 = vpop.permute.xlu0 %1157  ;;  %v1206_v52 = vpop.permute.xlu1 %1205 }
 0x44b   :  { %2374 = vmatmul.mubr.msk.bf16.vlgmr.msra.gmra.mxu1 %vm155_vm2, %v832_v43  ;;  %v1163_v53 = vsel %vm155_vm2, %v1158_v51, 0 }
 0x44c   :  { %v2924_v47 = vpop.eup %2527  ;;  %2384 = vmatpush3.bf16.xpose.msra.mxu1 %v1063_v46  ;;  %2385 = vmatprep.mubr.msk.bf16.mxu1 %vm2683_vm1, %v2682_v8 }
 0x44d   :  { %v833_v49 = vpack.c.bf16 %v2924_v47, %v2924_v47  ;;  %2395 = vmatprep.subr.bf16.mxu1 %v2682_v8 }
 0x44e   :  { %v1296_v55 = vpop.permute.xlu1 %1295  ;;  %v1156_v56 = vpop.permute.xlu0 %1155 }
 0x44f   :  { %2380 = vmatmul.mubr.msk.bf16.vlgmr.msra.gmra.mxu0 %vm155_vm2, %v833_v49  ;;  %v1301_v57 = vsel %vm394_vm3, %v1296_v55, 0 }
 0x450   :  { %2390 = vmatpush3.bf16.xpose.msra.mxu0 %v1113_v50  ;;  %2391 = vmatprep.mubr.msk.bf16.mxu0 %vm2683_vm1, %v2682_v8 }
 0x451   :  { %2401 = vmatprep.subr.bf16.mxu0 %v2682_v8 }
 0x453   :  { %2386 = vmatmul.mubr.msk.bf16.vlgmr.msra.gmra.mxu1 %vm155_vm2, %v1056_v45 }
 0x454   :  { %2396 = vmatpush3.bf16.xpose.msra.mxu1 %v1163_v53  ;;  %2397 = vmatprep.mubr.msk.bf16.mxu1 %vm2683_vm1, %v2682_v8 }
 0x455   :  { %2407 = vmatprep.subr.bf16.mxu1 %v2682_v8 }
 0x457   :  { %2392 = vmatmul.mubr.msk.bf16.vlgmr.msra.gmra.mxu0 %vm155_vm2, %v1106_v39 }
 0x458   :  { %2402 = vmatpush3.bf16.xpose.msra.mxu0 %v1213_v54  ;;  %2403 = vmatprep.mubr.msk.bf16.mxu0 %vm2683_vm1, %v2682_v8 }
 0x459   :  { %2413 = vmatprep.subr.bf16.mxu0 %v2682_v8 }
 0x45b   :  { %2398 = vmatmul.mubr.msk.bf16.vlgmr.msra.gmra.mxu1 %vm155_vm2, %v1156_v56 }
 0x45c   :  { %2408 = vmatpush3.bf16.msra.mxu1 %v1301_v57  ;;  %2409 = vmatprep.mubr.msk.bf16.mxu1 %vm2683_vm1, %v2682_v8 }
 0x45d   :  { %2419 = vmatprep.subr.bf16.mxu1 %v2682_v8 }
 0x45f   :  { %2404 = vmatmul.mubr.msk.bf16.vlgmr.msra.gmra.mxu0 %vm155_vm2, %v1206_v52 }
 0x460   :  { %2415 = vmatprep.mubr.msk.bf16.mxu0 %vm2683_vm1, %v2682_v8 }
 0x503   :  { %v2954_v58 = vpop.f32.mrf.mxu1 }
 0x505   :  { %v2363_v59 = vpop.f32.mrf.mxu1 }
 0x507   :  { %v879_v60 = vpop.f32.mrf.mxu1  ;;  %v2956_v61 = vpop.f32.mrf.mxu0 }
 0x509   :  { %v2364_v62 = vpop.f32.mrf.mxu1  ;;  %v2369_v63 = vpop.f32.mrf.mxu0 }
 0x50b   :  { %v927_v0 = vpop.f32.mrf.mxu0  ;;  %v2958_v1 = vpop.f32.mrf.mxu1 }
 0x50d   :  { %v2370_v2 = vpop.f32.mrf.mxu0  ;;  %v2375_v3 = vpop.f32.mrf.mxu1 }
 0x50f   :  { %v975_v5 = vpop.f32.mrf.mxu1  ;;  %v2960_v6 = vpop.f32.mrf.mxu0 }
 0x511   :  { %v2376_v7 = vpop.f32.mrf.mxu1  ;;  %v2381_v10 = vpop.f32.mrf.mxu0 }
 0x513   :  { %v1023_v11 = vpop.f32.mrf.mxu0  ;;  %v1099_v12 = vpop.f32.mrf.mxu1 }
 0x514   :  { %v1255_v14 = vsel %vm155_vm2, %v1099_v12, -inf }
 0x515   :  { %v2382_v17 = vpop.f32.mrf.mxu0  ;;  %1256 = vmax.xlane.f32.xlu0 %v1255_v14  ;;  %v2387_v18 = vpop.f32.mrf.mxu1 }
 0x517   :  { %v1102_v20 = vpop.f32.mrf.mxu1  ;;  %v1149_v23 = vpop.f32.mrf.mxu0 }
 0x518   :  { %v1258_v24 = vsel %vm155_vm2, %v1149_v23, -inf }
 0x519   :  { %1259 = vmax.xlane.f32.xlu1 %v1258_v24  ;;  %v2388_v25 = vpop.f32.mrf.mxu1  ;;  %v2393_v26 = vpop.f32.mrf.mxu0 }
 0x51b   :  { %v1152_v27 = vpop.f32.mrf.mxu0  ;;  %v1199_v28 = vpop.f32.mrf.mxu1 }
 0x51c   :  { %v1261_v29 = vsel %vm155_vm2, %v1199_v28, -inf }
 0x51d   :  { %v2394_v31 = vpop.f32.mrf.mxu0  ;;  %1262 = vmax.xlane.f32.xlu0 %v1261_v29  ;;  %v2399_v32 = vpop.f32.mrf.mxu1 }
 0x51f   :  { %v1202_v34 = vpop.f32.mrf.mxu1  ;;  %v1249_v37 = vpop.f32.mrf.mxu0 }
 0x520   :  { %v1264_v38 = vsel %vm155_vm2, %v1249_v37, -inf }
 0x521   :  { %v2405_v39 = vpop.f32.mrf.mxu0  ;;  %1265 = vmax.xlane.f32.xlu0 %v1264_v38  ;;  %v2400_v41 = vpop.f32.mrf.mxu1 }
 0x523   :  { %v1252_v43 = vpop.f32.mrf.mxu0 }
 0x525   :  { %v2406_v45 = vpop.f32.mrf.mxu0 }
 0x52a   :  { %1391 = vrot.lane.b32.xlu1 %v2754_v13, %s2690_s16 }
 0x52e   :  { %1439 = vrot.lane.b32.xlu1 %v2759_v19, %s2690_s16 }
 0x532   :  { %1568 = vrot.lane.b32.xlu1 %v2762_v21, %s2691_s17 }
 0x536   :  { %1566 = vrot.lane.b32.xlu1 %v2762_v21, %s2692_s18 }
 0x537   :  { %1343 = vrot.lane.b32.xlu0 %v2762_v21, %s2690_s16 }
 0x53a   :  { %1668 = vrot.lane.b32.xlu1 %v2759_v19, %s2691_s17 }
 0x53b   :  { %1518 = vrot.lane.b32.xlu0 %v2756_v16, %s2691_s17 }
 0x53e   :  { %1666 = vrot.lane.b32.xlu1 %v2759_v19, %s2692_s18 }
 0x53f   :  { %1516 = vrot.lane.b32.xlu0 %v2756_v16, %s2692_s18 }
 0x542   :  { %1756 = vrot.lane.b32.xlu1 %v2756_v16, %s2693_s19 }
 0x543   :  { %1618 = vrot.lane.b32.xlu0 %v2754_v13, %s2691_s17 }
 0x547   :  { %1616 = vrot.lane.b32.xlu0 %v2754_v13, %s2692_s18 }
 0x59e   :  { %v1257_v46 = vpop.xlane.xlu0 %1256 }
 0x59f   :  { %v1267_v48 = vsub.f32 %v1099_v12, %v1257_v46 }
 0x5a1   :  { %v1271_v49 = vmul.f32 1.442695, %v1267_v48 }
 0x5a2   :  { %v1260_v50 = vpop.xlane.xlu1 %1259 }
 0x5a3   :  { %2529 = vpow2.f32 %v1271_v49  ;;  %v1268_v51 = vsub.f32 %v1149_v23, %v1260_v50 }
 0x5a5   :  { %v1273_v52 = vmul.f32 1.442695, %v1268_v51 }
 0x5a6   :  { %v1392_v53 = vpop.permute.xlu1 %1391  ;;  %v1263_v54 = vpop.xlane.xlu0 %1262 }
 0x5a7   :  { %2531 = vpow2.f32 %v1273_v52  ;;  %v1269_v55 = vsub.f32 %v1199_v28, %v1263_v54  ;;  %v1397_v5 = vsel %vm394_vm3, %v1392_v53, 0 }
 0x5a9   :  { %v1275_v56 = vmul.f32 1.442695, %v1269_v55 }
 0x5aa   :  { %v1440_v57 = vpop.permute.xlu1 %1439  ;;  %v1266_v59 = vpop.xlane.xlu0 %1265 }
 0x5ab   :  { %2533 = vpow2.f32 %v1275_v56  ;;  %v1270_v16 = vsub.f32 %v1249_v37, %v1266_v59  ;;  %v1445_v14 = vsel %vm394_vm3, %v1440_v57, 0 }
 0x5ad   :  { %v1277_v60 = vmul.f32 1.442695, %v1270_v16 }
 0x5ae   :  { %v1344_v62 = vpop.permute.xlu0 %1343  ;;  %v1569_v2 = vpop.permute.xlu1 %1568 }
 0x5af   :  { %2535 = vpow2.f32 %v1277_v60  ;;  %v1349_v63 = vsel %vm394_vm3, %v1344_v62, 0  ;;  %v1574_v27 = vsel %vm155_vm2, %v1569_v2, 0 }
 0x5b0   :  { %v2983_v0 = vpop.eup %2529  ;;  %2414 = vmatpush3.bf16.msra.mxu0 %v1349_v63 }
 0x5b1   :  { %v1291_v3 = vpack.c.bf16 %v2983_v0, %v2983_v0  ;;  %2425 = vmatprep.subr.bf16.mxu0 %v2682_v8 }
 0x5b2   :  { %v1519_v10 = vpop.permute.xlu0 %1518  ;;  %v1567_v12 = vpop.permute.xlu1 %1566 }
 0x5b3   :  { %2410 = vmatmul.mubr.msk.bf16.vlgmr.msra.gmra.mxu1 %vm155_vm2, %v1291_v3  ;;  %v1524_v23 = vsel %vm155_vm2, %v1519_v10, 0 }
 0x5b4   :  { %v2990_v7 = vpop.eup %2531  ;;  %2420 = vmatpush3.bf16.msra.mxu1 %v1397_v5  ;;  %2421 = vmatprep.mubr.msk.bf16.mxu1 %vm2683_vm1, %v2682_v8 }
 0x5b5   :  { %v1292_v11 = vpack.c.bf16 %v2990_v7, %v2990_v7  ;;  %2431 = vmatprep.subr.bf16.mxu1 %v2682_v8 }
 0x5b6   :  { %v1517_v20 = vpop.permute.xlu0 %1516  ;;  %v1669_v25 = vpop.permute.xlu1 %1668 }
 0x5b7   :  { %2416 = vmatmul.mubr.msk.bf16.vlgmr.msra.gmra.mxu0 %vm155_vm2, %v1292_v11  ;;  %v1674_v32 = vsel %vm155_vm2, %v1669_v25, 0 }
 0x5b8   :  { %v2999_v17 = vpop.eup %2533  ;;  %2426 = vmatpush3.bf16.msra.mxu0 %v1445_v14  ;;  %2427 = vmatprep.mubr.msk.bf16.mxu0 %vm2683_vm1, %v2682_v8 }
 0x5b9   :  { %v1293_v18 = vpack.c.bf16 %v2999_v17, %v2999_v17  ;;  %2437 = vmatprep.subr.bf16.mxu0 %v2682_v8 }
 0x5ba   :  { %v1619_v28 = vpop.permute.xlu0 %1618  ;;  %v1667_v29 = vpop.permute.xlu1 %1666 }
 0x5bb   :  { %2422 = vmatmul.mubr.msk.bf16.vlgmr.msra.gmra.mxu1 %vm155_vm2, %v1293_v18  ;;  %v1624_v31 = vsel %vm155_vm2, %v1619_v28, 0 }
 0x5bc   :  { %v3008_v24 = vpop.eup %2535  ;;  %2432 = vmatpush3.bf16.xpose.msra.mxu1 %v1524_v23  ;;  %2433 = vmatprep.mubr.msk.bf16.mxu1 %vm2683_vm1, %v2682_v8 }
 0x5bd   :  { %v1294_v26 = vpack.c.bf16 %v3008_v24, %v3008_v24  ;;  %2443 = vmatprep.subr.bf16.mxu1 %v2682_v8 }
 0x5be   :  { %v1757_v34 = vpop.permute.xlu1 %1756  ;;  %v1617_v37 = vpop.permute.xlu0 %1616 }
 0x5bf   :  { %2428 = vmatmul.mubr.msk.bf16.vlgmr.msra.gmra.mxu0 %vm155_vm2, %v1294_v26  ;;  %v1762_v38 = vsel %vm394_vm3, %v1757_v34, 0  ;;  %v1279_v34 = vsel %vm155_vm2, %v2983_v0, 0.0 }
 0x5c0   :  { %2438 = vmatpush3.bf16.xpose.msra.mxu0 %v1574_v27  ;;  %2439 = vmatprep.mubr.msk.bf16.mxu0 %vm2683_vm1, %v2682_v8 }
 0x5c1   :  { %2449 = vmatprep.subr.bf16.mxu0 %v2682_v8 }
 0x5c3   :  { %2434 = vmatmul.mubr.msk.bf16.vlgmr.msra.gmra.mxu1 %vm155_vm2, %v1517_v20 }
 0x5c4   :  { %2444 = vmatpush3.bf16.xpose.msra.mxu1 %v1624_v31  ;;  %2445 = vmatprep.mubr.msk.bf16.mxu1 %vm2683_vm1, %v2682_v8 }
 0x5c5   :  { %2455 = vmatprep.subr.bf16.mxu1 %v2682_v8 }
 0x5c7   :  { %2440 = vmatmul.mubr.msk.bf16.vlgmr.msra.gmra.mxu0 %vm155_vm2, %v1567_v12 }
 0x5c8   :  { %2450 = vmatpush3.bf16.xpose.msra.mxu0 %v1674_v32  ;;  %2451 = vmatprep.mubr.msk.bf16.mxu0 %vm2683_vm1, %v2682_v8  ;;  %v821_v32 = vsel %vm155_vm2, %v2906_v35, 0.0  ;;  %v1282_v35 = vsel %vm155_vm2, %v2990_v7, 0.0 }
 0x5c9   :  { %2461 = vmatprep.subr.bf16.mxu0 %v2682_v8 }
 0x5cb   :  { %2446 = vmatmul.mubr.msk.bf16.vlgmr.msra.gmra.mxu1 %vm155_vm2, %v1617_v37  ;;  %v818_v37 = vsel %vm155_vm2, %v2899_v30, 0.0  ;;  %v1288_v30 = vsel %vm155_vm2, %v3008_v24, 0.0 }
 0x5cc   :  { %2456 = vmatpush3.bf16.msra.mxu1 %v1762_v38  ;;  %2457 = vmatprep.mubr.msk.bf16.mxu1 %vm2683_vm1, %v2682_v8 }
 0x5cd   :  { %2467 = vmatprep.subr.bf16.mxu1 %v2682_v8 }
 0x5cf   :  { %2452 = vmatmul.mubr.msk.bf16.vlgmr.msra.gmra.mxu0 %vm155_vm2, %v1667_v29 }
 0x5d0   :  { %2463 = vmatprep.mubr.msk.bf16.mxu0 %vm2683_vm1, %v2682_v8 }
 0x673   :  { %v3038_v39 = vpop.f32.mrf.mxu1 }
 0x675   :  { %v2411_v41 = vpop.f32.mrf.mxu1 }
 0x677   :  { %v1340_v43 = vpop.f32.mrf.mxu1  ;;  %v3040_v45 = vpop.f32.mrf.mxu0 }
 0x679   :  { %v2412_v46 = vpop.f32.mrf.mxu1  ;;  %v2417_v48 = vpop.f32.mrf.mxu0 }
 0x67b   :  { %v1388_v49 = vpop.f32.mrf.mxu0  ;;  %v3042_v50 = vpop.f32.mrf.mxu1 }
 0x67d   :  { %v2418_v51 = vpop.f32.mrf.mxu0  ;;  %v2423_v52 = vpop.f32.mrf.mxu1 }
 0x67f   :  { %v1436_v53 = vpop.f32.mrf.mxu1  ;;  %v3044_v54 = vpop.f32.mrf.mxu0 }
 0x681   :  { %v2424_v55 = vpop.f32.mrf.mxu1  ;;  %v2429_v56 = vpop.f32.mrf.mxu0 }
 0x683   :  { %v1484_v57 = vpop.f32.mrf.mxu0  ;;  %v1560_v59 = vpop.f32.mrf.mxu1 }
 0x684   :  { %v1716_v16 = vsel %vm155_vm2, %v1560_v59, -inf }
 0x685   :  { %v2430_v60 = vpop.f32.mrf.mxu0  ;;  %1717 = vmax.xlane.f32.xlu0 %v1716_v16  ;;  %v2435_v62 = vpop.f32.mrf.mxu1 }
 0x687   :  { %v1563_v63 = vpop.f32.mrf.mxu1  ;;  %v1610_v2 = vpop.f32.mrf.mxu0 }
 0x688   :  { %v1719_v3 = vsel %vm155_vm2, %v1610_v2, -inf }
 0x689   :  { %1720 = vmax.xlane.f32.xlu1 %v1719_v3  ;;  %v2436_v5 = vpop.f32.mrf.mxu1  ;;  %v2441_v10 = vpop.f32.mrf.mxu0 }
 0x68b   :  { %v1613_v11 = vpop.f32.mrf.mxu0  ;;  %v1660_v12 = vpop.f32.mrf.mxu1 }
 0x68c   :  { %v1722_v14 = vsel %vm155_vm2, %v1660_v12, -inf }
 0x68d   :  { %v2442_v18 = vpop.f32.mrf.mxu0  ;;  %1723 = vmax.xlane.f32.xlu0 %v1722_v14  ;;  %v2447_v20 = vpop.f32.mrf.mxu1 }
 0x68e   :  { %v376_v20 = vsel %vm155_vm2, %v2822_v9, 0.0 }
 0x68f   :  { %v1663_v23 = vpop.f32.mrf.mxu1  ;;  %v1710_v25 = vpop.f32.mrf.mxu0 }
 0x690   :  { %v1725_v26 = vsel %vm155_vm2, %v1710_v25, -inf  ;;  %v382_v23 = vsel %vm155_vm2, %v2840_v22, 0.0 }
 0x691   :  { %v2453_v27 = vpop.f32.mrf.mxu0  ;;  %1726 = vmax.xlane.f32.xlu0 %v1725_v26  ;;  %v2448_v28 = vpop.f32.mrf.mxu1 }
 0x693   :  { %v1713_v29 = vpop.f32.mrf.mxu0 }
 0x695   :  { %v2454_v31 = vpop.f32.mrf.mxu0 }
 0x69a   :  { %1852 = vrot.lane.b32.xlu1 %v2754_v13, %s2693_s19  ;;  %v1285_v13 = vsel %vm155_vm2, %v2999_v17, 0.0 }
 0x69e   :  { %1900 = vrot.lane.b32.xlu1 %v2759_v19, %s2693_s19  ;;  %v824_v19 = vsel %vm155_vm2, %v2915_v42, 0.0 }
 0x6a7   :  { %1804 = vrot.lane.b32.xlu0 %v2762_v21, %s2693_s19  ;;  %v827_v21 = vsel %vm155_vm2, %v2924_v47, 0.0 }
 0x6c2   :  { %822 = vadd.xlane.f32.xlu1 %v821_v32 }
 0x6c6   :  { %1280 = vadd.xlane.f32.xlu1 %v1279_v34  ;;  %819 = vadd.xlane.f32.xlu0 %v818_v37 }
 0x6ca   :  { %1286 = vadd.xlane.f32.xlu1 %v1285_v13  ;;  %825 = vadd.xlane.f32.xlu0 %v824_v19 }
 0x6ce   :  { %828 = vadd.xlane.f32.xlu0 %v827_v21 }
 0x6d2   :  { %1283 = vadd.xlane.f32.xlu0 %v1282_v35 }
 0x6d6   :  { %1289 = vadd.xlane.f32.xlu0 %v1288_v30 }
 0x70e   :  { %v1718_v0 = vpop.xlane.xlu0 %1717 }
 0x70f   :  { %v1728_v38 = vsub.f32 %v1560_v59, %v1718_v0 }
 0x711   :  { %v1732_v17 = vmul.f32 1.442695, %v1728_v38 }
 0x712   :  { %v1721_v41 = vpop.xlane.xlu1 %1720 }
 0x713   :  { %2537 = vpow2.f32 %v1732_v17  ;;  %v1729_v42 = vsub.f32 %v1610_v2, %v1721_v41 }
 0x715   :  { %v1734_v43 = vmul.f32 1.442695, %v1729_v42 }
 0x716   :  { %v1724_v46 = vpop.xlane.xlu0 %1723  ;;  %v1853_v52 = vpop.permute.xlu1 %1852 }
 0x717   :  { %2539 = vpow2.f32 %v1734_v43  ;;  %v1730_v48 = vsub.f32 %v1660_v12, %v1724_v46  ;;  %v1858_v59 = vsel %vm394_vm3, %v1853_v52, 0  ;;  %v373_v12 = vsel %vm155_vm2, %v2815_v4, 0.0 }
 0x719   :  { %v1736_v47 = vmul.f32 1.442695, %v1730_v48 }
 0x71a   :  { %v1727_v49 = vpop.xlane.xlu0 %1726  ;;  %v1901_v60 = vpop.permute.xlu1 %1900 }
 0x71b   :  { %2541 = vpow2.f32 %v1736_v47  ;;  %v1731_v51 = vsub.f32 %v1710_v25, %v1727_v49  ;;  %v1906_v2 = vsel %vm394_vm3, %v1901_v60, 0 }
 0x71d   :  { %v1738_v7 = vmul.f32 1.442695, %v1731_v51 }
 0x71e   :  { %v1805_v53 = vpop.permute.xlu0 %1804 }
 0x71f   :  { %2543 = vpow2.f32 %v1738_v7  ;;  %v1810_v24 = vsel %vm394_vm3, %v1805_v53, 0 }
 0x720   :  { %v2538_v55 = vpop.eup %2537  ;;  %2462 = vmatpush3.bf16.msra.mxu0 %v1810_v24 }
 0x721   :  { %v1740_v56 = vsel %vm155_vm2, %v2538_v55, 0.0  ;;  %v1752_v57 = vpack.c.bf16 %v2538_v55, %v2538_v55  ;;  %2473 = vmatprep.subr.bf16.mxu0 %v2682_v8 }
 0x722   :  { %1741 = vadd.xlane.f32.xlu1 %v1740_v56 }
 0x723   :  { %2458 = vmatmul.mubr.msk.bf16.vlgmr.msra.gmra.mxu1 %vm155_vm2, %v1752_v57 }
 0x724   :  { %v2540_v16 = vpop.eup %2539  ;;  %2468 = vmatpush3.bf16.msra.mxu1 %v1858_v59  ;;  %2469 = vmatprep.mubr.msk.bf16.mxu1 %vm2683_vm1, %v2682_v8 }
 0x725   :  { %v1743_v62 = vsel %vm155_vm2, %v2540_v16, 0.0  ;;  %v1753_v63 = vpack.c.bf16 %v2540_v16, %v2540_v16 }
 0x726   :  { %1744 = vadd.xlane.f32.xlu0 %v1743_v62 }
 0x727   :  { %2464 = vmatmul.mubr.msk.bf16.vlgmr.msra.gmra.mxu0 %vm155_vm2, %v1753_v63  ;;  %v2511_v63 = vld [vmem:[#allocation8 + $0x8] sm:$0xff]  }
 0x728   :  { %v2542_v3 = vpop.eup %2541  ;;  %2474 = vmatpush3.bf16.msra.mxu0 %v1906_v2  ;;  %2475 = vmatprep.mubr.msk.bf16.mxu0 %vm2683_vm1, %v2682_v8  ;;  %v379_v8 = vsel %vm155_vm2, %v2831_v15, 0.0 }
 0x729   :  { %v1746_v5 = vsel %vm155_vm2, %v2542_v3, 0.0  ;;  %v1754_v10 = vpack.c.bf16 %v2542_v3, %v2542_v3  ;;  %2479 = vmatprep.subr.bf16.mxu1 %v2511_v63 }
 0x72a   :  { %1747 = vadd.xlane.f32.xlu1 %v1746_v5 }
 0x72b   :  { %2470 = vmatmul.mubr.msk.bf16.vlgmr.msra.gmra.mxu1 %vm155_vm2, %v1754_v10  ;;  %v2512_v10 = vld [vmem:[#allocation8] sm:$0xff]  }
 0x72c   :  { %v2544_v11 = vpop.eup %2543  ;;  %2480 = vmatpush3.bf16.msra.mxu1 %v2511_v63 }
 0x72d   :  { %v1749_v14 = vsel %vm155_vm2, %v2544_v11, 0.0  ;;  %v1755_v18 = vpack.c.bf16 %v2544_v11, %v2544_v11  ;;  %2481 = vmatprep.subr.bf16.mxu1 %v2512_v10 }
 0x72e   :  { %374 = vadd.xlane.f32.xlu1 %v373_v12  ;;  %1750 = vadd.xlane.f32.xlu0 %v1749_v14 }
 0x72f   :  { %2476 = vmatmul.mubr.msk.bf16.vlgmr.msra.gmra.mxu0 %vm155_vm2, %v1755_v18 }
 0x730   :  { %2482 = vmatpush3.bf16.msra.mxu1 %v2512_v10 }
 0x732   :  { %380 = vadd.xlane.f32.xlu1 %v379_v8  ;;  %377 = vadd.xlane.f32.xlu0 %v376_v20 }
 0x736   :  { %383 = vadd.xlane.f32.xlu0 %v382_v23 }
 0x74b   :  { %v823_v4 = vpop.xlane.xlu1 %822 }
 0x74c   :  { %2545 = vrcp.f32 %v823_v4 }
 0x74f   :  { %v1281_v25 = vpop.xlane.xlu1 %1280  ;;  %v820_v26 = vpop.xlane.xlu0 %819 }
 0x750   :  { %2547 = vrcp.f32 %v1281_v25 }
 0x751   :  { %2549 = vrcp.f32 %v820_v26 }
 0x753   :  { %v1287_v27 = vpop.xlane.xlu1 %1286  ;;  %v826_v28 = vpop.xlane.xlu0 %825 }
 0x754   :  { %2551 = vrcp.f32 %v1287_v27 }
 0x755   :  { %2553 = vrcp.f32 %v826_v28 }
 0x757   :  { %v829_v15 = vpop.xlane.xlu0 %828 }
 0x758   :  { %2555 = vrcp.f32 %v829_v15 }
 0x759   :  { %v2546_v29 = vpop.eup %2545 }
 0x75a   :  { %v1029_v9 = vmul.f32 %v2546_v29, %v2956_v61 }
 0x75b   :  { %v1284_v31 = vpop.xlane.xlu0 %1283 }
 0x75c   :  { %2557 = vrcp.f32 %v1284_v31  ;;  %1040 = vrot.lane.b32.xlu0 %v1029_v9, %s2680_s29 }
 0x75d   :  { %v2548_v22 = vpop.eup %2547 }
 0x75e   :  { %v2550_v32 = vpop.eup %2549  ;;  %v1488_v34 = vmul.f32 %v2548_v22, %v3038_v39 }
 0x75f   :  { %v1290_v37 = vpop.xlane.xlu0 %1289  ;;  %v1027_v13 = vmul.f32 %v2550_v32, %v2954_v58 }
 0x760   :  { %2559 = vrcp.f32 %v1290_v37  ;;  %1499 = vrot.lane.b32.xlu0 %v1488_v34, %s2694_s20 }
 0x761   :  { %v2552_v19 = vpop.eup %2551  ;;  %1038 = vrot.lane.b32.xlu1 %v1027_v13, %s2680_s29 }
 0x762   :  { %v2554_v21 = vpop.eup %2553  ;;  %v1492_v61 = vmul.f32 %v2552_v19, %v3042_v50 }
 0x763   :  { %v1031_v35 = vmul.f32 %v2554_v21, %v2958_v1 }
 0x764   :  { %1503 = vrot.lane.b32.xlu0 %v1492_v61, %s2694_s20 }
 0x765   :  { %v2556_v30 = vpop.eup %2555  ;;  %1042 = vrot.lane.b32.xlu1 %v1031_v35, %s2680_s29 }
 0x766   :  { %v1033_v39 = vmul.f32 %v2556_v30, %v2960_v6 }
 0x769   :  { %v2558_v0 = vpop.eup %2557  ;;  %1044 = vrot.lane.b32.xlu1 %v1033_v39, %s2680_s29 }
 0x76a   :  { %v1490_v58 = vmul.f32 %v2558_v0, %v3040_v45  ;;  %v2200_v0 = vld [vmem:[%s3181_s4] ss:$0 sm:$0xff] }
 0x76d   :  { %v2560_v38 = vpop.eup %2559  ;;  %1501 = vrot.lane.b32.xlu1 %v1490_v58, %s2694_s20 }
 0x76e   :  { %v1494_v17 = vmul.f32 %v2560_v38, %v3044_v54 }
 0x771   :  { %1505 = vrot.lane.b32.xlu1 %v1494_v17, %s2694_s20 }
 0x7ab   :  { %v1742_v41 = vpop.xlane.xlu1 %1741 }
 0x7af   :  { %v1745_v50 = vpop.xlane.xlu0 %1744 }
 0x7b3   :  { %v1748_v42 = vpop.xlane.xlu1 %1747 }
 0x7b7   :  { %v375_v1 = vpop.xlane.xlu1 %374  ;;  %v1751_v43 = vpop.xlane.xlu0 %1750 }
 0x7b8   :  { %2561 = vrcp.f32 %v375_v1 }
 0x7bb   :  { %v381_v46 = vpop.xlane.xlu1 %380  ;;  %v378_v48 = vpop.xlane.xlu0 %377 }
 0x7bc   :  { %2563 = vrcp.f32 %v381_v46 }
 0x7bd   :  { %2565 = vrcp.f32 %v378_v48 }
 0x7bf   :  { %v384_v6 = vpop.xlane.xlu0 %383 }
 0x7c0   :  { %2567 = vrcp.f32 %v384_v6 }
 0x7c1   :  { %2569 = vrcp.f32 %v1742_v41  ;;  %v2585_v41 = vld [vmem:[#allocation3 + $0x10] sm:$0xff] }
 0x7c2   :  { %2571 = vrcp.f32 %v1745_v50 }
 0x7c3   :  { %2573 = vrcp.f32 %v1748_v42 }
 0x7c4   :  { %2575 = vrcp.f32 %v1751_v43  ;;  %v2586_v43 = vld [vmem:[#allocation3] sm:$0xff] }
 0x7c5   :  { %v2562_v47 = vpop.eup %2561 }
 0x7c6   :  { %v583_v45 = vmul.f32 %v2562_v47, %v2870_v33 }
 0x7c8   :  { %590 = vst.msk [vmem:[#allocation2] sm:$0xff] %vm155_vm2, %v583_v45 }
 0x7c9   :  { %v2564_v49 = vpop.eup %2563 }
 0x7ca   :  { %v2566_v54 = vpop.eup %2565  ;;  %v587_v51 = vmul.f32 %v2564_v49, %v2874_v40 }
 0x7cb   :  { %v585_v7 = vmul.f32 %v2566_v54, %v2872_v36  ;;  %v2587_v54 = vld [vmem:[#allocation3 + $0x18] sm:$0xff] }
 0x7cc   :  { %592 = vst.msk [vmem:[#allocation2 + $0x10] sm:$0xff] %vm155_vm2, %v587_v51 }
 0x7cd   :  { %v2568_v52 = vpop.eup %2567  ;;  %591 = vst.msk [vmem:[#allocation2 + $0x8] sm:$0xff] %vm155_vm2, %v585_v7  ;;  %v2588_v7 = vld [vmem:[#allocation3 + $0x8] sm:$0xff] }
 0x7ce   :  { %v1041_v53 = vpop.permute.xlu0 %1040  ;;  %v589_v24 = vmul.f32 %v2568_v52, %v2876_v44  ;;  %v2570_v57 = vpop.eup %2569 }
 0x7cf   :  { %1052 = vst.msk [vmem:[#allocation2 + $0x8] sm:$0xff] %vm1050_vm4, %v1041_v53  ;;  %v2572_v2 = vpop.eup %2571 }
 0x7d0   :  { %593 = vst.msk [vmem:[#allocation2 + $0x18] sm:$0xff] %vm155_vm2, %v589_v24  ;;  %v2574_v18 = vpop.eup %2573 }
 0x7d1   :  { %v2576_v26 = vpop.eup %2575 }
 0x7d2   :  { %v1500_v33 = vpop.permute.xlu0 %1499 }
 0x7d3   :  { %v1039_v55 = vpop.permute.xlu1 %1038 }
 0x7d4   :  { %1051 = vst.msk [vmem:[#allocation2] sm:$0xff] %vm1050_vm4, %v1039_v55 }
 0x7d5   :  { %1512 = vst.msk [vmem:[#allocation2] sm:$0xff] %vm1511_vm5, %v1500_v33 }
 0x7d6   :  { %v1504_v36 = vpop.permute.xlu0 %1503 }
 0x7d7   :  { %v1043_v40 = vpop.permute.xlu1 %1042 }
 0x7d8   :  { %1053 = vst.msk [vmem:[#allocation2 + $0x10] sm:$0xff] %vm1050_vm4, %v1043_v40 }
 0x7d9   :  { %1514 = vst.msk [vmem:[#allocation2 + $0x10] sm:$0xff] %vm1511_vm5, %v1504_v36 }
 0x7db   :  { %v1045_v44 = vpop.permute.xlu1 %1044 }
 0x7dc   :  { %1054 = vst.msk [vmem:[#allocation2 + $0x18] sm:$0xff] %vm1050_vm4, %v1045_v44 }
 0x7df   :  { %v1502_v56 = vpop.permute.xlu1 %1501 }
 0x7e0   :  { %1513 = vst.msk [vmem:[#allocation2 + $0x8] sm:$0xff] %vm1511_vm5, %v1502_v56 }
 0x7e3   :  { %v1506_v59 = vpop.permute.xlu1 %1505  ;;  %v1798_v16 = vpop.f32.mrf.mxu1 }
 0x7e4   :  { %1515 = vst.msk [vmem:[#allocation2 + $0x18] sm:$0xff] %vm1511_vm5, %v1506_v59  ;;  %v1949_v60 = vmul.f32 %v2570_v57, %v1798_v16 }
 0x7e5   :  { %v2459_v62 = vpop.f32.mrf.mxu1 }
 0x7e6   :  { %1960 = vrot.lane.b32.xlu0 %v1949_v60, %s2695_s21 }
 0x7e7   :  { %v1801_v3 = vpop.f32.mrf.mxu1  ;;  %v1846_v5 = vpop.f32.mrf.mxu0 }
 0x7e8   :  { %v1951_v11 = vmul.f32 %v2572_v2, %v1846_v5 }
 0x7e9   :  { %v2460_v12 = vpop.f32.mrf.mxu1  ;;  %v2465_v14 = vpop.f32.mrf.mxu0 }
 0x7ea   :  { %1962 = vrot.lane.b32.xlu1 %v1951_v11, %s2695_s21 }
 0x7eb   :  { %v1849_v8 = vpop.f32.mrf.mxu0  ;;  %v1894_v20 = vpop.f32.mrf.mxu1 }
 0x7ec   :  { %v1953_v23 = vmul.f32 %v2574_v18, %v1894_v20 }
 0x7ed   :  { %v2466_v4 = vpop.f32.mrf.mxu0  ;;  %v2471_v25 = vpop.f32.mrf.mxu1 }
 0x7ee   :  { %1964 = vrot.lane.b32.xlu0 %v1953_v23, %s2695_s21 }
 0x7ef   :  { %v1897_v27 = vpop.f32.mrf.mxu1  ;;  %v1942_v28 = vpop.f32.mrf.mxu0 }
 0x7f0   :  { %v1955_v15 = vmul.f32 %v2576_v26, %v1942_v28 }
 0x7f1   :  { %v2472_v29 = vpop.f32.mrf.mxu1  ;;  %v2477_v9 = vpop.f32.mrf.mxu0 }
 0x7f2   :  { %1966 = vrot.lane.b32.xlu1 %v1955_v15, %s2695_s21 }
 0x7f3   :  { %v1945_v31 = vpop.f32.mrf.mxu0 }
 0x7f5   :  { %v2478_v22 = vpop.f32.mrf.mxu0 }
 0x858   :  { %v1961_v32 = vpop.permute.xlu0 %1960 }
 0x859   :  { %1973 = vst.msk [vmem:[#allocation2] sm:$0xff] %vm1972_vm6, %v1961_v32 }
 0x85c   :  { %v1963_v34 = vpop.permute.xlu1 %1962 }
 0x85d   :  { %1974 = vst.msk [vmem:[#allocation2 + $0x8] sm:$0xff] %vm1972_vm6, %v1963_v34 }
 0x860   :  { %v1965_v37 = vpop.permute.xlu0 %1964  ;;  %v1977_v19 = vld [vmem:[#allocation2] sm:$0xff] }
 0x861   :  { %1975 = vst.msk [vmem:[#allocation2 + $0x10] sm:$0xff] %vm1972_vm6, %v1965_v37 }
 0x864   :  { %v1967_v13 = vpop.permute.xlu1 %1966  ;;  %v1978_v21 = vld [vmem:[#allocation2 + $0x8] sm:$0xff] }
 0x865   :  { %1976 = vst.msk [vmem:[#allocation2 + $0x18] sm:$0xff] %vm1972_vm6, %v1967_v13  ;;  %v1981_v61 = vpack.c.bf16 %v1978_v21, %v1977_v19  ;;  %v2205_v21 = vld [vmem:[%s3181_s4 + $0x1] ss:$0 sm:$0xff] }
 0x867   :  { %2483 = vmatprep.mubr.msk.bf16.mxu1 %vm92_vm0, %v1981_v61 }
 0x868   :  { %v1979_v35 = vld [vmem:[#allocation2 + $0x10] sm:$0xff] }
 0x86c   :  { %v1980_v30 = vld [vmem:[#allocation2 + $0x18] sm:$0xff] }
 0x86d   :  { %v1982_v39 = vpack.c.bf16 %v1980_v30, %v1979_v35  ;;  %v2206_v35 = vld [vmem:[%s3181_s4 + $0x2] ss:$0 sm:$0xff]  ;;  %s2696_s4 = smov [#allocation9]  }
 0x86e   :  { %s2150_s30 = sshll.u32 %s2696_s4, 4  ;;  %s2151_s30 = int_to_ptr.vmem [resolvable:$true] %s2150_s30 }
 0x86f   :  { %2484 = vmatmul.mubr.msk.bf16.vlgmr.msra.gmra.mxu1 %vm92_vm0, %v1982_v39  ;;  %s2649_s6 = scalar_lea.vmem %s2151_s30, 512  ;;  %p2654_p2 = scmp.lt.s32.totalorder %s2151_s30, %s2151_s30 }
 0x870   :  { %p2650_p1 = scmp.ne.s32.totalorder %s2151_s30, %s2649_s6  ;;  %p2655_p3 = scmp.lt.s32.totalorder %s2649_s6, %s2649_s6 }
 0x872   :  { %p2656_p4 = por %p2655_p3, %p2654_p2 }
 0x874   :  { %p2657_p5 = pnand %p2656_p4, %p2650_p1 }
 0x92f   :  { %v2485_v58 = vpop.f32.mrf.mxu1 }
 0x930   :  { %v2053_v38 = vadd.f32 %v2485_v58, %v2200_v0 }
 0x931   :  { %v2044_v17 = vpop.f32.mrf.mxu1 }
 0x932   :  { %v3129_v50 = vadd.f32 %v2585_v41, %v2053_v38  ;;  %v2045_v42 = vadd.f32 %v2200_v0, %v2044_v17 }
 0x933   :  { %v2486_v1 = vpop.f32.mrf.mxu1 }
 0x934   :  { %v3131_v46 = vadd.f32 %v2586_v43, %v2045_v42  ;;  %v2056_v48 = vadd.f32 %v2486_v1, %v2200_v0  ;;  %v2069_v6 = vsel %vm92_vm0, %v3129_v50, 0.0  ;;  %v2081_v36 = vmul.f32 %v3129_v50, %v3129_v50 }
 0x935   :  { %2070 = vadd.xlane.f32.xlu0 %v2069_v6  ;;  %v2047_v47 = vpop.f32.mrf.mxu1 }
 0x936   :  { %v2048_v45 = vadd.f32 %v2200_v0, %v2047_v47  ;;  %v2079_v49 = vmul.f32 %v3131_v46, %v3131_v46  ;;  %v3137_v51 = vadd.f32 %v2587_v54, %v2056_v48  ;;  %v2063_v24 = vsel %vm92_vm0, %v3131_v46, 0.0 }
 0x937   :  { %v2089_v44 = vsel %vm92_vm0, %v2081_v36, 0.0 }
 0x938   :  { %v3139_v52 = vadd.f32 %v2588_v7, %v2048_v45  ;;  %v2083_v53 = vsel %vm92_vm0, %v2079_v49, 0.0  ;;  %v2072_v55 = vsel %vm92_vm0, %v3137_v51, 0.0  ;;  %v2082_v57 = vmul.f32 %v3137_v51, %v3137_v51 }
 0x939   :  { %2084 = vadd.xlane.f32.xlu1 %v2083_v53  ;;  %2064 = vadd.xlane.f32.xlu0 %v2063_v24 }
 0x93a   :  { %v2066_v33 = vsel %vm92_vm0, %v3139_v52, 0.0  ;;  %v2080_v40 = vmul.f32 %v3139_v52, %v3139_v52  ;;  %v2092_v59 = vsel %vm92_vm0, %v2082_v57, 0.0 }
 0x93c   :  { %v2086_v56 = vsel %vm92_vm0, %v2080_v40, 0.0 }
 0x93d   :  { %2067 = vadd.xlane.f32.xlu1 %v2066_v33  ;;  %2073 = vadd.xlane.f32.xlu0 %v2072_v55 }
 0x941   :  { %2090 = vadd.xlane.f32.xlu1 %v2089_v44  ;;  %2087 = vadd.xlane.f32.xlu0 %v2086_v56 }
 0x945   :  { %2093 = vadd.xlane.f32.xlu0 %v2092_v59 }
 0x9be   :  { %v2071_v16 = vpop.xlane.xlu0 %2070 }
 0x9bf   :  { %v2077_v5 = vmul.f32 0.03125, %v2071_v16 }
 0x9c1   :  { %v2101_v8 = vmul.f32 %v2077_v5, %v2077_v5  ;;  %v2109_v39 = vsub.f32 %v3129_v50, %v2077_v5 }
 0x9c2   :  { %v2085_v60 = vpop.xlane.xlu1 %2084  ;;  %v2065_v62 = vpop.xlane.xlu0 %2064 }
 0x9c3   :  { %v2075_v63 = vmul.f32 0.03125, %v2065_v62  ;;  %v2095_v2 = vmul.f32 0.03125, %v2085_v60 }
 0x9c5   :  { %v2099_v3 = vmul.f32 %v2075_v63, %v2075_v63  ;;  %v2107_v13 = vsub.f32 %v3131_v46, %v2075_v63 }
 0x9c6   :  { %v2068_v10 = vpop.xlane.xlu1 %2067  ;;  %v2074_v11 = vpop.xlane.xlu0 %2073 }
 0x9c7   :  { %v2103_v12 = vsub.f32 %v2095_v2, %v2099_v3  ;;  %v2076_v14 = vmul.f32 0.03125, %v2068_v10  ;;  %v2078_v20 = vmul.f32 0.03125, %v2074_v11 }
 0x9c9   :  { %v2111_v18 = vadd.f32 1e-05, %v2103_v12  ;;  %v2100_v25 = vmul.f32 %v2076_v14, %v2076_v14  ;;  %v2102_v9 = vmul.f32 %v2078_v20, %v2078_v20  ;;  %v2108_v38 = vsub.f32 %v3139_v52, %v2076_v14 }
 0x9ca   :  { %v2091_v23 = vpop.xlane.xlu1 %2090  ;;  %v2088_v4 = vpop.xlane.xlu0 %2087  ;;  %v2110_v1 = vsub.f32 %v3137_v51, %v2078_v20 }
 0x9cb   :  { %2577 = vrsqrt.f32 %v2111_v18  ;;  %v2097_v26 = vmul.f32 0.03125, %v2091_v23  ;;  %v2096_v27 = vmul.f32 0.03125, %v2088_v4 }
 0x9cd   :  { %v2105_v28 = vsub.f32 %v2097_v26, %v2101_v8  ;;  %v2104_v15 = vsub.f32 %v2096_v27, %v2100_v25 }
 0x9ce   :  { %v2094_v29 = vpop.xlane.xlu0 %2093 }
 0x9cf   :  { %v2113_v31 = vadd.f32 1e-05, %v2105_v28  ;;  %v2112_v22 = vadd.f32 1e-05, %v2104_v15  ;;  %v2098_v32 = vmul.f32 0.03125, %v2094_v29 }
 0x9d1   :  { %2579 = vrsqrt.f32 %v2113_v31  ;;  %v2106_v34 = vsub.f32 %v2098_v32, %v2102_v9 }
 0x9d2   :  { %2581 = vrsqrt.f32 %v2112_v22 }
 0x9d3   :  { %v2114_v37 = vadd.f32 1e-05, %v2106_v34 }
 0x9d5   :  { %2583 = vrsqrt.f32 %v2114_v37 }
 0x9d8   :  { %v2578_v19 = vpop.eup %2577 }
 0x9d9   :  { %v2119_v61 = vmul.f32 %v2578_v19, %v2107_v13 }
 0x9db   :  { %v2128_v30 = vmul.f32 %v2205_v21, %v2119_v61 }
 0x9dd   :  { %v2137_v0 = vadd.f32 %v2206_v35, %v2128_v30 }
 0x9de   :  { %v2580_v58 = vpop.eup %2579 }
 0x9df   :  { %v2582_v17 = vpop.eup %2581  ;;  %2141 = vst.msk [vmem:[#allocation9] sm:$0xff] %vm92_vm0, %v2137_v0  ;;  %v2121_v41 = vmul.f32 %v2580_v58, %v2109_v39 }
 0x9e0   :  { %v2120_v42 = vmul.f32 %v2582_v17, %v2108_v38 }
 0x9e1   :  { %v2130_v43 = vmul.f32 %v2205_v21, %v2121_v41 }
 0x9e2   :  { %v2584_v46 = vpop.eup %2583  ;;  %v2129_v48 = vmul.f32 %v2205_v21, %v2120_v42 }
 0x9e3   :  { %v2122_v6 = vmul.f32 %v2584_v46, %v2110_v1  ;;  %v2139_v47 = vadd.f32 %v2206_v35, %v2130_v43 }
 0x9e4   :  { %v2138_v45 = vadd.f32 %v2206_v35, %v2129_v48 }
 0x9e5   :  { %v2131_v50 = vmul.f32 %v2205_v21, %v2122_v6  ;;  %2143 = vst.msk [vmem:[#allocation9 + $0x10] sm:$0xff] %vm92_vm0, %v2139_v47 }
 0x9e6   :  { %2142 = vst.msk [vmem:[#allocation9 + $0x8] sm:$0xff] %vm92_vm0, %v2138_v45 }
 0x9e7   :  { %v2140_v49 = vadd.f32 %v2206_v35, %v2131_v50 }
 0x9e9   :  { %2144 = vst.msk [vmem:[#allocation9 + $0x18] sm:$0xff] %vm92_vm0, %v2140_v49 }
 0x9ea   :  { %2660 = shalt.err (!%p2657_p5)
}
 0x9eb   :  { %2156 = dma.vmem_to_hbm [thread:$0]  %s2151_s30, 512, %s3182_s5, [#allocation5], %s2679_s28, %s2679_s28, %s2680_s29  }
 0x9ec   :  { %2673 = dma.done.wait [#allocation5], 512  }
 0x9ed   :  { %2674 = vsyncadd [#allocation5], 4294966784 }
 0x9ee   :  { %2160 = vsyncpa [#allocation4], 1 }
 0x9ef   :  { %2161 = vsyncpa [#allocation7], 1 }
 0x9f0   :  { %2162 = vsyncpa [#allocation5], 1 }

</bundles_post_ra>
